<compile_context>
chip_gen: v5e
topology: v5e:2x2
jax: 0.10.0
libtpu: 0.0.40
codegen_flags: <defaults>
</compile_context>

<pallas_src>
import jax
import jax.numpy as jnp
from jax.experimental import pallas as pl
from jax.experimental.pallas import tpu as pltpu

LANE = 128  # TPU lane width


def _round_up(x, m):
    return ((x + m - 1) // m) * m


def _flow_head_kernel(x_ref, w1_ref, b1_ref, w2_ref, b2_ref, o_ref,
                      xpad_ref, hpad_ref):
    """One batch element.

    x_ref:   (H, W, Cin)           activations (compute dtype)
    w1_ref:  (9*Cin, CHID_PAD)     conv1 weights, im2col layout
    b1_ref:  (1, CHID_PAD)         conv1 bias (f32)
    w2_ref:  (9*CHID_PAD, COUT_PAD) conv2 weights, im2col layout
    b2_ref:  (1, COUT_PAD)         conv2 bias (f32)
    o_ref:   (H*W, COUT_PAD)       lane-dense output (f32)
    xpad_ref: VMEM (H+2, W+2, Cin)        input staged with zero halo
    hpad_ref: VMEM (H+2, W+2, CHID_PAD)   hidden staged with zero halo
    """
    h, w, cin = x_ref.shape
    chid = hpad_ref.shape[-1]

    # ---- conv1: stage input with zero halo (no jnp.pad in the wrapper) ----
    xpad_ref[...] = jnp.zeros_like(xpad_ref)
    xpad_ref[1:h + 1, 1:w + 1, :] = x_ref[...].astype(xpad_ref.dtype)

    # im2col: fold the 9 taps into the contraction dim -> one MXU matmul.
    cols = []
    for ky in range(3):
        for kx in range(3):
            tap = xpad_ref[ky:ky + h, kx:kx + w, :]          # (H, W, Cin)
            cols.append(tap.reshape(h * w, cin))
    patch1 = jnp.concatenate(cols, axis=-1)                  # (H*W, 9*Cin)

    acc1 = jnp.dot(patch1, w1_ref[...],
                   preferred_element_type=jnp.float32)       # (H*W, CHID_PAD)
    hid = jnp.maximum(acc1 + b1_ref[...].astype(jnp.float32), 0.0)

    # ---- conv2: hidden stays resident in VMEM (no HBM round-trip) ----
    hpad_ref[...] = jnp.zeros_like(hpad_ref)
    hpad_ref[1:h + 1, 1:w + 1, :] = hid.reshape(h, w, chid).astype(
        hpad_ref.dtype)

    cols2 = []
    for ky in range(3):
        for kx in range(3):
            tap = hpad_ref[ky:ky + h, kx:kx + w, :]          # (H, W, CHID_PAD)
            cols2.append(tap.reshape(h * w, chid))
    patch2 = jnp.concatenate(cols2, axis=-1)                 # (H*W, 9*CHID_PAD)

    acc2 = jnp.dot(patch2, w2_ref[...],
                   preferred_element_type=jnp.float32)       # (H*W, COUT_PAD)
    o_ref[...] = (acc2 + b2_ref[...].astype(jnp.float32)).astype(o_ref.dtype)


def _pack_conv_weight(w_oihw, cin_pad, cout_pad, dtype):
    """torch OIHW (Cout, Cin, 3, 3) -> im2col matrix (9*cin_pad, cout_pad)."""
    cout, cin, kh, kw = w_oihw.shape
    w = jnp.transpose(w_oihw, (2, 3, 1, 0))                  # (kh, kw, Cin, Cout)
    w = jnp.pad(w, ((0, 0), (0, 0),
                    (0, cin_pad - cin), (0, cout_pad - cout)))
    return w.reshape(kh * kw * cin_pad, cout_pad).astype(dtype)


def _pack_bias(b, cpad):
    return jnp.pad(b, (0, cpad - b.shape[0])).reshape(1, cpad).astype(
        jnp.float32)


def flow_head_forward(x_nchw, params, *, compute_dtype=jnp.bfloat16):
    """Pallas equivalent of FlowHead.forward: conv2(relu(conv1(x)))."""
    n, cin, h, w = x_nchw.shape
    hidden = params["b1"].shape[0]
    cout = params["b2"].shape[0]
    chid_pad = _round_up(hidden, LANE)   # lane-dense hidden
    cout_pad = _round_up(cout, LANE)     # lane-dense (128-padded) output slab

    w1m = _pack_conv_weight(params["w1_oihw"], cin, chid_pad, compute_dtype)
    b1p = _pack_bias(params["b1"], chid_pad)
    w2m = _pack_conv_weight(params["w2_oihw"], chid_pad, cout_pad,
                            compute_dtype)
    b2p = _pack_bias(params["b2"], cout_pad)

    # NCHW -> NHWC (channels on the lane axis), bf16 halves input HBM traffic.
    x_nhwc = jnp.transpose(x_nchw, (0, 2, 3, 1)).astype(compute_dtype)

    out_flat = pl.pallas_call(
        _flow_head_kernel,
        out_shape=jax.ShapeDtypeStruct((n, h * w, cout_pad), jnp.float32),
        grid=(n,),
        in_specs=[
            pl.BlockSpec((None, h, w, cin), lambda b: (b, 0, 0, 0)),
            pl.BlockSpec((9 * cin, chid_pad), lambda b: (0, 0)),
            pl.BlockSpec((1, chid_pad), lambda b: (0, 0)),
            pl.BlockSpec((9 * chid_pad, cout_pad), lambda b: (0, 0)),
            pl.BlockSpec((1, cout_pad), lambda b: (0, 0)),
        ],
        out_specs=pl.BlockSpec((None, h * w, cout_pad), lambda b: (b, 0, 0)),
        scratch_shapes=[
            pltpu.VMEM((h + 2, w + 2, cin), compute_dtype),
            pltpu.VMEM((h + 2, w + 2, chid_pad), compute_dtype),
        ],
        compiler_params=pltpu.CompilerParams(
            dimension_semantics=("parallel",),     # batch sharded on v7x 2xTC
            vmem_limit_bytes=32 * 1024 * 1024,
        ),
    )(x_nhwc, w1m, b1p, w2m, b2p)

    # Layout plumbing only: drop the zero-padded channels, back to NCHW.
    out = out_flat[:, :, :cout].reshape(n, h, w, cout)
    return jnp.transpose(out, (0, 3, 1, 2))


def init_params(key, input_dim, hidden_dim, output_dim):
    """Deterministic synthetic parameters in torch layout (OIHW)."""
    k1, k2, k3, k4 = jax.random.split(key, 4)
    return {
        "w1_oihw": 0.1 * jax.random.normal(
            k1, (hidden_dim, input_dim, 3, 3), dtype=jnp.float32),
        "b1": 0.1 * jax.random.normal(k2, (hidden_dim,), dtype=jnp.float32),
        "w2_oihw": 0.1 * jax.random.normal(
            k3, (output_dim, hidden_dim, 3, 3), dtype=jnp.float32),
        "b2": 0.1 * jax.random.normal(k4, (output_dim,), dtype=jnp.float32),
    }


def flow_head_reference(x_nchw, params):
    """Pure-JAX f32 reference (NCHW conv) for correctness checking."""
    dn = ("NCHW", "OIHW", "NCHW")
    h = jax.lax.conv_general_dilated(
        x_nchw, params["w1_oihw"], window_strides=(1, 1),
        padding=((1, 1), (1, 1)), dimension_numbers=dn)
    h = jnp.maximum(h + params["b1"][None, :, None, None], 0.0)
    y = jax.lax.conv_general_dilated(
        h, params["w2_oihw"], window_strides=(1, 1),
        padding=((1, 1), (1, 1)), dimension_numbers=dn)
    return y + params["b2"][None, :, None, None]


if __name__ == "__main__":
    # Small shapes consistent with FlowHead(input_dim, hidden_dim, output_dim=2).
    batch, input_dim, hidden_dim, output_dim = 2, 16, 32, 2
    height = width = 16

    key = jax.random.PRNGKey(0)
    k_x, k_p = jax.random.split(key)
    x = jax.random.normal(k_x, (batch, input_dim, height, width),
                          dtype=jnp.float32)
    params = init_params(k_p, input_dim, hidden_dim, output_dim)

    ref = jax.block_until_ready(flow_head_reference(x, params))

    # 1) f32 compute path: tight numerical check of the fused kernel.
    out_f32 = jax.block_until_ready(
        flow_head_forward(x, params, compute_dtype=jnp.float32))
    assert out_f32.shape == (batch, output_dim, height, width)
    assert jnp.allclose(out_f32, ref, atol=1e-4, rtol=1e-4), (
        float(jnp.max(jnp.abs(out_f32 - ref))))

    # 2) bf16 MXU fast path (default): check within bf16-appropriate tolerance.
    out_bf16 = jax.block_until_ready(flow_head_forward(x, params))
    assert out_bf16.shape == (batch, output_dim, height, width)
    err = float(jnp.max(jnp.abs(out_bf16 - ref)))
    scale = float(jnp.max(jnp.abs(ref))) + 1e-6
    assert err <= 5e-2 * scale, (err, scale)

    print("KERNEL_OK")
</pallas_src>

<mosaic_0001>
module attributes {stable_mosaic.version = 11 : i64} {
  func.func @_flow_head_kernel(%arg0: i32, %arg1: memref<1x16x16x16xf32, #tpu.memory_space<vmem>>, %arg2: memref<144x128xf32, #tpu.memory_space<vmem>>, %arg3: memref<1x128xf32, #tpu.memory_space<vmem>>, %arg4: memref<1152x128xf32, #tpu.memory_space<vmem>>, %arg5: memref<1x128xf32, #tpu.memory_space<vmem>>, %arg6: memref<1x256x128xf32, #tpu.memory_space<vmem>>, %arg7: memref<18x18x16xf32, #tpu.memory_space<vmem>>, %arg8: memref<18x18x128xf32, #tpu.memory_space<vmem>>) attributes {dimension_semantics = [#tpu.dimension_semantics<parallel>], iteration_bounds = array<i64: 2>, scalar_prefetch = 0 : i64, scratch_operands = 2 : i64, tpu.core_type = #tpu.core_type<tc>, window_params = [{transform_indices = @transform_0, window_bounds = array<i64: 1, 16, 16, 16>}, {pipeline_mode = #tpu.pipeline_mode<synchronous>, transform_indices = @transform_1, window_bounds = array<i64: 144, 128>}, {pipeline_mode = #tpu.pipeline_mode<synchronous>, transform_indices = @transform_2, window_bounds = array<i64: 1, 128>}, {pipeline_mode = #tpu.pipeline_mode<synchronous>, transform_indices = @transform_3, window_bounds = array<i64: 1152, 128>}, {pipeline_mode = #tpu.pipeline_mode<synchronous>, transform_indices = @transform_4, window_bounds = array<i64: 1, 128>}, {transform_indices = @transform_5, window_bounds = array<i64: 1, 256, 128>}]} {
    %cst = arith.constant 0.000000e+00 : f32
    %0 = vector.broadcast %cst : f32 to vector<18x18x16xf32>
    %c0 = arith.constant 0 : index
    %c0_0 = arith.constant 0 : index
    %c0_1 = arith.constant 0 : index
    %1 = vector.load %arg7[%c0, %c0_0, %c0_1] : memref<18x18x16xf32, #tpu.memory_space<vmem>>, vector<18x18x16xf32>
    tpu.vector_store %arg7[%c0, %c0_0, %c0_1], %0 {strides = array<i32>} : memref<18x18x16xf32, #tpu.memory_space<vmem>>, vector<18x18x16xf32>,
    %c0_2 = arith.constant 0 : index
    %c0_3 = arith.constant 0 : index
    %c0_4 = arith.constant 0 : index
    %c0_5 = arith.constant 0 : index
    %2 = vector.load %arg1[%c0_2, %c0_3, %c0_4, %c0_5] : memref<1x16x16x16xf32, #tpu.memory_space<vmem>>, vector<1x16x16x16xf32>
    %3 = vector.shape_cast %2 : vector<1x16x16x16xf32> to vector<16x16x16xf32>
    %c1 = arith.constant 1 : index
    %c1_6 = arith.constant 1 : index
    %c0_7 = arith.constant 0 : index
    %4 = vector.load %arg7[%c1, %c1_6, %c0_7] : memref<18x18x16xf32, #tpu.memory_space<vmem>>, vector<16x16x16xf32>
    tpu.vector_store %arg7[%c1, %c1_6, %c0_7], %3 {strides = array<i32>} : memref<18x18x16xf32, #tpu.memory_space<vmem>>, vector<16x16x16xf32>,
    %c0_8 = arith.constant 0 : index
    %c0_9 = arith.constant 0 : index
    %c0_10 = arith.constant 0 : index
    %5 = vector.load %arg7[%c0_8, %c0_9, %c0_10] : memref<18x18x16xf32, #tpu.memory_space<vmem>>, vector<16x16x16xf32>
    %6 = vector.shape_cast %5 : vector<16x16x16xf32> to vector<256x16xf32>
    %c0_11 = arith.constant 0 : index
    %c1_12 = arith.constant 1 : index
    %c0_13 = arith.constant 0 : index
    %7 = vector.load %arg7[%c0_11, %c1_12, %c0_13] : memref<18x18x16xf32, #tpu.memory_space<vmem>>, vector<16x16x16xf32>
    %8 = vector.shape_cast %7 : vector<16x16x16xf32> to vector<256x16xf32>
    %c0_14 = arith.constant 0 : index
    %c2 = arith.constant 2 : index
    %c0_15 = arith.constant 0 : index
    %9 = vector.load %arg7[%c0_14, %c2, %c0_15] : memref<18x18x16xf32, #tpu.memory_space<vmem>>, vector<16x16x16xf32>
    %10 = vector.shape_cast %9 : vector<16x16x16xf32> to vector<256x16xf32>
    %c1_16 = arith.constant 1 : index
    %c0_17 = arith.constant 0 : index
    %c0_18 = arith.constant 0 : index
    %11 = vector.load %arg7[%c1_16, %c0_17, %c0_18] : memref<18x18x16xf32, #tpu.memory_space<vmem>>, vector<16x16x16xf32>
    %12 = vector.shape_cast %11 : vector<16x16x16xf32> to vector<256x16xf32>
    %c1_19 = arith.constant 1 : index
    %c1_20 = arith.constant 1 : index
    %c0_21 = arith.constant 0 : index
    %13 = vector.load %arg7[%c1_19, %c1_20, %c0_21] : memref<18x18x16xf32, #tpu.memory_space<vmem>>, vector<16x16x16xf32>
    %14 = vector.shape_cast %13 : vector<16x16x16xf32> to vector<256x16xf32>
    %c1_22 = arith.constant 1 : index
    %c2_23 = arith.constant 2 : index
    %c0_24 = arith.constant 0 : index
    %15 = vector.load %arg7[%c1_22, %c2_23, %c0_24] : memref<18x18x16xf32, #tpu.memory_space<vmem>>, vector<16x16x16xf32>
    %16 = vector.shape_cast %15 : vector<16x16x16xf32> to vector<256x16xf32>
    %c2_25 = arith.constant 2 : index
    %c0_26 = arith.constant 0 : index
    %c0_27 = arith.constant 0 : index
    %17 = vector.load %arg7[%c2_25, %c0_26, %c0_27] : memref<18x18x16xf32, #tpu.memory_space<vmem>>, vector<16x16x16xf32>
    %18 = vector.shape_cast %17 : vector<16x16x16xf32> to vector<256x16xf32>
    %c2_28 = arith.constant 2 : index
    %c1_29 = arith.constant 1 : index
    %c0_30 = arith.constant 0 : index
    %19 = vector.load %arg7[%c2_28, %c1_29, %c0_30] : memref<18x18x16xf32, #tpu.memory_space<vmem>>, vector<16x16x16xf32>
    %20 = vector.shape_cast %19 : vector<16x16x16xf32> to vector<256x16xf32>
    %c2_31 = arith.constant 2 : index
    %c2_32 = arith.constant 2 : index
    %c0_33 = arith.constant 0 : index
    %21 = vector.load %arg7[%c2_31, %c2_32, %c0_33] : memref<18x18x16xf32, #tpu.memory_space<vmem>>, vector<16x16x16xf32>
    %22 = vector.shape_cast %21 : vector<16x16x16xf32> to vector<256x16xf32>
    %23 = tpu.concatenate %6, %8, %10, %12, %14, %16, %18, %20, %22 in 1 : vector<256x16xf32>, vector<256x16xf32>, vector<256x16xf32>, vector<256x16xf32>, vector<256x16xf32>, vector<256x16xf32>, vector<256x16xf32>, vector<256x16xf32>, vector<256x16xf32> -> vector<256x144xf32>
    %c0_34 = arith.constant 0 : index
    %c0_35 = arith.constant 0 : index
    %24 = vector.load %arg2[%c0_34, %c0_35] : memref<144x128xf32, #tpu.memory_space<vmem>>, vector<144x128xf32>
    %cst_36 = arith.constant dense<0.000000e+00> : vector<256x128xf32>
    %25 = tpu.matmul %23, %24, %cst_36 {dimension_numbers = #tpu.dot_dimension_numbers<[1], [0], [0], [1], [0, 0, 1, 1], [], []>} : vector<256x144xf32>, vector<144x128xf32>, vector<256x128xf32> -> vector<256x128xf32>
    %c0_37 = arith.constant 0 : index
    %c0_38 = arith.constant 0 : index
    %26 = vector.load %arg3[%c0_37, %c0_38] : memref<1x128xf32, #tpu.memory_space<vmem>>, vector<1x128xf32>
    %27 = vector.broadcast %26 : vector<1x128xf32> to vector<256x128xf32>
    %28 = arith.addf %25, %27 : vector<256x128xf32>
    %cst_39 = arith.constant 0.000000e+00 : f32
    %29 = vector.broadcast %cst_39 : f32 to vector<256x128xf32>
    %30 = arith.maximumf %28, %29 : vector<256x128xf32>
    %cst_40 = arith.constant 0.000000e+00 : f32
    %31 = vector.broadcast %cst_40 : f32 to vector<18x18x128xf32>
    %c0_41 = arith.constant 0 : index
    %c0_42 = arith.constant 0 : index
    %c0_43 = arith.constant 0 : index
    %32 = vector.load %arg8[%c0_41, %c0_42, %c0_43] : memref<18x18x128xf32, #tpu.memory_space<vmem>>, vector<18x18x128xf32>
    tpu.vector_store %arg8[%c0_41, %c0_42, %c0_43], %31 {strides = array<i32>} : memref<18x18x128xf32, #tpu.memory_space<vmem>>, vector<18x18x128xf32>,
    %33 = vector.shape_cast %30 : vector<256x128xf32> to vector<16x16x128xf32>
    %c1_44 = arith.constant 1 : index
    %c1_45 = arith.constant 1 : index
    %c0_46 = arith.constant 0 : index
    %34 = vector.load %arg8[%c1_44, %c1_45, %c0_46] : memref<18x18x128xf32, #tpu.memory_space<vmem>>, vector<16x16x128xf32>
    tpu.vector_store %arg8[%c1_44, %c1_45, %c0_46], %33 {strides = array<i32>} : memref<18x18x128xf32, #tpu.memory_space<vmem>>, vector<16x16x128xf32>,
    %c0_47 = arith.constant 0 : index
    %c0_48 = arith.constant 0 : index
    %c0_49 = arith.constant 0 : index
    %35 = vector.load %arg8[%c0_47, %c0_48, %c0_49] : memref<18x18x128xf32, #tpu.memory_space<vmem>>, vector<16x16x128xf32>
    %36 = vector.shape_cast %35 : vector<16x16x128xf32> to vector<256x128xf32>
    %c0_50 = arith.constant 0 : index
    %c1_51 = arith.constant 1 : index
    %c0_52 = arith.constant 0 : index
    %37 = vector.load %arg8[%c0_50, %c1_51, %c0_52] : memref<18x18x128xf32, #tpu.memory_space<vmem>>, vector<16x16x128xf32>
    %38 = vector.shape_cast %37 : vector<16x16x128xf32> to vector<256x128xf32>
    %c0_53 = arith.constant 0 : index
    %c2_54 = arith.constant 2 : index
    %c0_55 = arith.constant 0 : index
    %39 = vector.load %arg8[%c0_53, %c2_54, %c0_55] : memref<18x18x128xf32, #tpu.memory_space<vmem>>, vector<16x16x128xf32>
    %40 = vector.shape_cast %39 : vector<16x16x128xf32> to vector<256x128xf32>
    %c1_56 = arith.constant 1 : index
    %c0_57 = arith.constant 0 : index
    %c0_58 = arith.constant 0 : index
    %41 = vector.load %arg8[%c1_56, %c0_57, %c0_58] : memref<18x18x128xf32, #tpu.memory_space<vmem>>, vector<16x16x128xf32>
    %42 = vector.shape_cast %41 : vector<16x16x128xf32> to vector<256x128xf32>
    %c1_59 = arith.constant 1 : index
    %c1_60 = arith.constant 1 : index
    %c0_61 = arith.constant 0 : index
    %43 = vector.load %arg8[%c1_59, %c1_60, %c0_61] : memref<18x18x128xf32, #tpu.memory_space<vmem>>, vector<16x16x128xf32>
    %44 = vector.shape_cast %43 : vector<16x16x128xf32> to vector<256x128xf32>
    %c1_62 = arith.constant 1 : index
    %c2_63 = arith.constant 2 : index
    %c0_64 = arith.constant 0 : index
    %45 = vector.load %arg8[%c1_62, %c2_63, %c0_64] : memref<18x18x128xf32, #tpu.memory_space<vmem>>, vector<16x16x128xf32>
    %46 = vector.shape_cast %45 : vector<16x16x128xf32> to vector<256x128xf32>
    %c2_65 = arith.constant 2 : index
    %c0_66 = arith.constant 0 : index
    %c0_67 = arith.constant 0 : index
    %47 = vector.load %arg8[%c2_65, %c0_66, %c0_67] : memref<18x18x128xf32, #tpu.memory_space<vmem>>, vector<16x16x128xf32>
    %48 = vector.shape_cast %47 : vector<16x16x128xf32> to vector<256x128xf32>
    %c2_68 = arith.constant 2 : index
    %c1_69 = arith.constant 1 : index
    %c0_70 = arith.constant 0 : index
    %49 = vector.load %arg8[%c2_68, %c1_69, %c0_70] : memref<18x18x128xf32, #tpu.memory_space<vmem>>, vector<16x16x128xf32>
    %50 = vector.shape_cast %49 : vector<16x16x128xf32> to vector<256x128xf32>
    %c2_71 = arith.constant 2 : index
    %c2_72 = arith.constant 2 : index
    %c0_73 = arith.constant 0 : index
    %51 = vector.load %arg8[%c2_71, %c2_72, %c0_73] : memref<18x18x128xf32, #tpu.memory_space<vmem>>, vector<16x16x128xf32>
    %52 = vector.shape_cast %51 : vector<16x16x128xf32> to vector<256x128xf32>
    %53 = tpu.concatenate %36, %38, %40, %42, %44, %46, %48, %50, %52 in 1 : vector<256x128xf32>, vector<256x128xf32>, vector<256x128xf32>, vector<256x128xf32>, vector<256x128xf32>, vector<256x128xf32>, vector<256x128xf32>, vector<256x128xf32>, vector<256x128xf32> -> vector<256x1152xf32>
    %c0_74 = arith.constant 0 : index
    %c0_75 = arith.constant 0 : index
    %54 = vector.load %arg4[%c0_74, %c0_75] : memref<1152x128xf32, #tpu.memory_space<vmem>>, vector<1152x128xf32>
    %cst_76 = arith.constant dense<0.000000e+00> : vector<256x128xf32>
    %55 = tpu.matmul %53, %54, %cst_76 {dimension_numbers = #tpu.dot_dimension_numbers<[1], [0], [0], [1], [0, 0, 1, 1], [], []>} : vector<256x1152xf32>, vector<1152x128xf32>, vector<256x128xf32> -> vector<256x128xf32>
    %c0_77 = arith.constant 0 : index
    %c0_78 = arith.constant 0 : index
    %56 = vector.load %arg5[%c0_77, %c0_78] : memref<1x128xf32, #tpu.memory_space<vmem>>, vector<1x128xf32>
    %57 = vector.broadcast %56 : vector<1x128xf32> to vector<256x128xf32>
    %58 = arith.addf %55, %57 : vector<256x128xf32>
    %c0_79 = arith.constant 0 : index
    %c0_80 = arith.constant 0 : index
    %c0_81 = arith.constant 0 : index
    %59 = vector.load %arg6[%c0_79, %c0_80, %c0_81] : memref<1x256x128xf32, #tpu.memory_space<vmem>>, vector<1x256x128xf32>
    %60 = vector.shape_cast %59 : vector<1x256x128xf32> to vector<256x128xf32>
    %61 = vector.shape_cast %58 : vector<256x128xf32> to vector<1x256x128xf32>
    tpu.vector_store %arg6[%c0_79, %c0_80, %c0_81], %61 {strides = array<i32>} : memref<1x256x128xf32, #tpu.memory_space<vmem>>, vector<1x256x128xf32>,
    return
  }
  func.func @transform_0(%arg0: i32) -> (i32, i32, i32, i32) {
    %c0_i32 = arith.constant 0 : i32
    %c0_i32_0 = arith.constant 0 : i32
    %c0_i32_1 = arith.constant 0 : i32
    %c0_i32_2 = arith.constant 0 : i32
    return %arg0, %c0_i32, %c0_i32_0, %c0_i32_1 : i32, i32, i32, i32
  }
  func.func @transform_1(%arg0: i32) -> (i32, i32) {
    %c0_i32 = arith.constant 0 : i32
    %c0_i32_0 = arith.constant 0 : i32
    %c0_i32_1 = arith.constant 0 : i32
    return %c0_i32, %c0_i32_0 : i32, i32
  }
  func.func @transform_2(%arg0: i32) -> (i32, i32) {
    %c0_i32 = arith.constant 0 : i32
    %c0_i32_0 = arith.constant 0 : i32
    %c0_i32_1 = arith.constant 0 : i32
    return %c0_i32, %c0_i32_0 : i32, i32
  }
  func.func @transform_3(%arg0: i32) -> (i32, i32) {
    %c0_i32 = arith.constant 0 : i32
    %c0_i32_0 = arith.constant 0 : i32
    %c0_i32_1 = arith.constant 0 : i32
    return %c0_i32, %c0_i32_0 : i32, i32
  }
  func.func @transform_4(%arg0: i32) -> (i32, i32) {
    %c0_i32 = arith.constant 0 : i32
    %c0_i32_0 = arith.constant 0 : i32
    %c0_i32_1 = arith.constant 0 : i32
    return %c0_i32, %c0_i32_0 : i32, i32
  }
  func.func @transform_5(%arg0: i32) -> (i32, i32, i32) {
    %c0_i32 = arith.constant 0 : i32
    %c0_i32_0 = arith.constant 0 : i32
    %c0_i32_1 = arith.constant 0 : i32
    return %arg0, %c0_i32, %c0_i32_0 : i32, i32, i32
  }
}

</mosaic_0001>

<bundles_post_ra>
// kernel: tpu_custom_call.1
= control target key start
LH: loop header
LB: loop body
LE: loop exit
PB: predicated region body
PF: predicated region fallthrough
CT: control target
= control target key end

     0   :  { %10 = vsyncpa [#allocation5], 0  ;;  %s7339_s0 = inlined_call_operand.hbm [shape: f32[2,16,16,16], index: 0, kind: input, shape index: {}]   ;;  %s7340_s1 = inlined_call_operand.hbm [shape: f32[144,128], index: 1, kind: input, shape index: {}]   ;;  %s7341_s2 = inlined_call_operand.vmem [shape: f32[1,128], index: 2, kind: input, shape index: {}]   ;;  %s7342_s3 = inlined_call_operand.hbm [shape: f32[1152,128], index: 3, kind: input, shape index: {}]   ;;  %s7343_s4 = inlined_call_operand.vmem [shape: f32[1,128], index: 4, kind: input, shape index: {}]   ;;  %s7344_s5 = inlined_call_operand.hbm [shape: f32[2,256,128], index: 5, kind: output, shape index: {}]  }
   0x1   :  { %12 = vsyncpa [#allocation5 + $0x1], 0 }
   0x2   :  { %13 = vsyncpa [#allocation8], 0 }
   0x3   :  { %14 = vsyncpa [#allocation6], 0 }
   0x4   :  { %16 = vsyncpa [#allocation6 + $0x1], 0  ;;  %s4793_s18 = smov 0   ;;  %s4795_s19 = smov 0  }
   0x5   :  { %s4797_s20 = smov 0   ;;  %s4799_s21 = smov 0  }
   0x6 LB: > { %s4814_s22 = sadd.s32 4294967295, %s4747_s21   ;;  %s3871_s23 = sadd.s32 4294967294, %s4747_s21   ;;  %s4747_s21 = sphi %s4799_s21, %s7644_s21   ;;  %s4743_s20 = sphi %s4797_s20, %s7643_s20   ;;  %s4739_s19 = sphi %s4795_s19, %s7642_s19   ;;  %s4735_s18 = sphi %s4793_s18, %s7641_s18  }
   0x7   : > { %p42_p0 = scmp.ne.s32.totalorder %s4739_s19, %s4735_s18  ;;  %p43_p1 = scmp.eq.s32.totalorder %s4814_s22, 0 }
   0x8   : > { %p150_p2 = scmp.eq.s32.totalorder %s4814_s22, 1  ;;  %p156_p3 = scmp.eq.s32.totalorder %s3871_s23, 1 }
   0x9   : > { %p4823_p4 = por %p43_p1, %p42_p0  ;;  %p3872_p5 = scmp.ge.s32.totalorder %s4747_s21, 1 }
   0xa   : > { %p4828_p6 = por %p156_p3, %p42_p0  ;;  %p163_p7 = scmp.lt.s32.totalorder %s4747_s21, 3 }
   0xb   : > { %s174_s28 = sshll.u32 %s7340_s1, 4  ;;  %s4749_s30 = smov [#allocation7]   ;;  %s175_s28 = int_to_ptr.hbm [resolvable:$true] %s174_s28 }
   0xc   : > { %p4836_p8 = pnand %p3872_p5, %p163_p7  ;;  %s176_s6 = sshll.u32 %s4749_s30, 4  ;;  %s177_s6 = int_to_ptr.vmem [resolvable:$true] %s176_s6 }
   0xd   : > { %s191_s9 = sshll.u32 %s7342_s3, 4  ;;  %s7345_s10 = smov 128   ;;  %s192_s9 = int_to_ptr.hbm [resolvable:$true] %s191_s9 }
   0xe   : > { %p3969_p9 = pneg %p4836_p8  ;;  %s4751_s11 = smov 8  }
   0xf   : > { %s4752_s12 = smov [#allocation9]   ;;  %s4855_s14 = sadd.s32 1, %s4747_s21  }
  0x10   : > { %p3970_p10 = pnand %p3969_p9, %p43_p1  ;;  %s193_s13 = sshll.u32 %s4752_s12, 4  ;;  %s194_s13 = int_to_ptr.vmem [resolvable:$true] %s193_s13 }
  0x11   : > { %s29_s15 = sadd.s32 1, %s4743_s20  ;;  %s26_s16 = ssub.s32 %s4747_s21, %s4855_s14 }
  0x12   : > { %3972 = dma.hbm_to_vmem [thread:$0]  (!%p3970_p10), %s175_s28, 2304, %s177_s6, [#allocation8], %s7345_s10, %s7345_s10, %s4751_s11  }
  0x13   : > { %3975 = dma.hbm_to_vmem [thread:$0]  (!%p3970_p10), %s192_s9, 18432, %s194_s13, [#allocation8], %s7345_s10, %s7345_s10, %s4751_s11  }
  0x14   : > { %p36_p12 = scmp.ne.s32.totalorder %s4743_s20, %s4739_s19  ;;  %p27_p13 = scmp.eq.s32.totalorder %s26_s16, 0 }
  0x15   : > { %p37_p0 = scmp.eq.s32.totalorder %s4747_s21, 0  ;;  %p3986_p5 = scmp.lt.s32.totalorder %s4747_s21, 2 }
  0x16   : > { %p4865_p3 = por %p150_p2, %p36_p12  ;;  %s210_s26 = sand.u32 1, %s4743_s20  }
  0x17   : > { %s4871_s23 = scalar_select %p27_p13, %s4743_s20, %s29_s15  }
  0x18   : > { %p38_p7 = por %p37_p0, %p36_p12  ;;  %s3876_s27 = sshll.u32 %s210_s26, 8 }
  0x19   : > { %s3921_s28 = sshll.u32 %s4747_s21, 8  ;;  %s214_s8 = scalar_lea.vmem [#allocation4], %s3876_s27 }
  0x1a   : > { %s219_s7 = scalar_lea.hbm %s7339_s0, %s3921_s28  ;;  %s222_s9 = sshll.u32 %s214_s8, 4  ;;  %s223_s9 = int_to_ptr.vmem [resolvable:$true] %s222_s9 }
  0x1b   : > { %s220_s12 = sshll.u32 %s219_s7, 4  ;;  %p4878_p2 = pnand %p3986_p5, %p38_p7  ;;  %s221_s12 = int_to_ptr.hbm [resolvable:$true] %s220_s12 }
  0x1c   : > { %s211_s15 = scalar_lea.sflag [#allocation5], %s210_s26  ;;  %s4647_s16 = sshra.s32 %s221_s12, 4  ;;  %s4648_s16 = int_to_ptr.hbm [resolvable:$true] %s4647_s16 }
  0x1d   : > { %s4649_s10 = scalar_lea.hbm %s4648_s16, 256  ;;  %p4651_p10 = pneg %p4878_p2 }
  0x1e   : > { %p4650_p9 = scmp.ne.s32.totalorder %s4648_s16, %s4649_s10  ;;  %s4654_s30 = scalar_lea.hbm %s7339_s0, 512 }
  0x1f   : > { %p4655_p0 = scmp.lt.s32.totalorder %s4648_s16, %s7339_s0  ;;  %p4656_p5 = scmp.lt.s32.totalorder %s4654_s30, %s4649_s10 }
  0x20   : > { %p4652_p12 = pnand %p4651_p10, %p4650_p9 }
  0x21   : > { %p4657_p7 = por %p4656_p5, %p4655_p0 }
  0x22   : > { %p4653_p13 = pneg %p4652_p12 }
  0x24   : > { %p4658_p11 = pnand %p4657_p7, %p4653_p13 }
  0x26   : > { %4661 = shalt.err (!%p4658_p11)
}
  0x27   : > { %s7365_s26 = smov 128   ;;  %234 = sbr.rel (%p4836_p8) target bundleno = 1408 (0x580), region = 40 }
  0x28   : > { %3979 = dma.hbm_to_vmem [thread:$0]  (!%p4878_p2), %s221_s12, 4096, %s223_s9, %s211_s15, %s7365_s26, %s7365_s26, %s4751_s11  }
  0x2c   : > { %s4898_s8 = sand.u32 1, %s4739_s19  }
  0x2d   : > { %s3880_s10 = sshll.u32 %s4898_s8, 8  ;;  %s237_s16 = scalar_lea.sflag [#allocation5], %s4898_s8 }
  0x2e   : > { %s4904_s28 = scalar_lea.vmem [#allocation4], %s3880_s10 }
  0x2f   : > { %4722 = dma.done.wait (%p4823_p4), %s237_s16, 4096  }
  0x30   : > { %4724 = vsyncadd (%p4823_p4), %s237_s16, 4294963200 }
  0x31   : > { %4726 = dma.done.wait (%p43_p1), [#allocation8], 20736  }
  0x32   : > { %4728 = vsyncadd (%p43_p1), [#allocation8], 4294946560  ;;  %vm278_vm0 = vcmask 130048   ;;  %vm281_vm1 = vcmask 123904   ;;  %v4753_v0 = vmov 0.0   ;;  %s4754_s24 = smov 16  }
  0x33   : > { %279 = vst.msk [vmem:[#allocation2] sm:$0xff] %vm278_vm0, %v4753_v0  ;;  %s4755_s29 = smov 32   ;;  %v334_v7 = vld [vmem:[%s4904_s28] sm:$0xff]  ;;  %v335_v8 = vld [vmem:[%s4904_s28 + $0x8] sm:$0xff]  ;;  %v336_v9 = vld [vmem:[%s4904_s28 + $0x10] sm:$0xff]  ;;  %s4756_s11 = smov 48  }
  0x34   : > { %280 = vst.msk [vmem:[#allocation2 + $0x8] sm:$0xff] %vm278_vm0, %v4753_v0  ;;  %v337_v10 = vld [vmem:[%s4904_s28 + $0x18] sm:$0xff]  ;;  %v338_v11 = vld [vmem:[%s4904_s28 + $0x20] sm:$0xff]  ;;  %v339_v12 = vld [vmem:[%s4904_s28 + $0x28] sm:$0xff]  ;;  %s4757_s9 = smov 80   ;;  %s4758_s12 = smov 112  }
  0x35   : > { %282 = vst.msk [vmem:[#allocation2 + $0x10] sm:$0x3] %vm281_vm1, %v4753_v0  ;;  %v340_v27 = vld [vmem:[%s4904_s28 + $0x30] sm:$0xff]  ;;  %v341_v28 = vld [vmem:[%s4904_s28 + $0x38] sm:$0xff]  ;;  %s4759_s13 = smov 64   ;;  %v5110_v30 = vld [vmem:[#allocation7 + $0x88] sm:$0xff] }
  0x36   : > { %283 = vst.msk [vmem:[#allocation2 + $0x18] sm:$0xff] %vm278_vm0, %v4753_v0  ;;  %v5112_v31 = vld [vmem:[#allocation7 + $0x80] sm:$0xff]  ;;  %s4760_s15 = smov 96   ;;  %2059 = vmatpush.msra.mxu1 %v5110_v30  ;;  %v343_v39 = vld [vmem:[%s4904_s28 + $0x48] sm:$0xff]  ;;  %v344_v46 = vld [vmem:[%s4904_s28 + $0x50] sm:$0xff]  ;;  %vm1616_vm2 = vcmask 261120  }
  0x37   : > { %284 = vst.msk [vmem:[#allocation2 + $0x20] sm:$0xff] %vm278_vm0, %v4753_v0  ;;  %v342_v38 = vld [vmem:[%s4904_s28 + $0x40] sm:$0xff]  ;;  %v345_v47 = vld [vmem:[%s4904_s28 + $0x58] sm:$0xff]  ;;  %vm1649_vm3 = vcmask 392192   ;;  %vm1682_vm4 = vcmask 523264   ;;  %vm1715_vm5 = vcmask 654336  }
  0x38   : > { %285 = vst.msk [vmem:[#allocation2 + $0x28] sm:$0x3] %vm281_vm1, %v4753_v0  ;;  %2060 = vmatpush.msra.mxu1 %v5112_v31  ;;  %v346_v63 = vld [vmem:[%s4904_s28 + $0x60] sm:$0xff]  ;;  %vm1748_vm6 = vcmask 785408   ;;  %vm1781_vm7 = vcmask 916480   ;;  %s4697_s6 = scalar_lea.hbm %s7344_s5, 512 }
  0x39   : > { %286 = vst.msk [vmem:[#allocation2 + $0x30] sm:$0xff] %vm278_vm0, %v4753_v0 }
  0x3a   : > { %287 = vst.msk [vmem:[#allocation2 + $0x38] sm:$0xff] %vm278_vm0, %v4753_v0 }
  0x3b   : > { %v431_v1 = vld [vmem:[#allocation2 + $0x1] sm:$0xff]  ;;  %288 = vst.msk [vmem:[#allocation2 + $0x40] sm:$0x3] %vm281_vm1, %v4753_v0 }
  0x3c   : > { %v432_v2 = vld [vmem:[#allocation2 + $0x9] sm:$0xff]  ;;  %289 = vst.msk [vmem:[#allocation2 + $0x48] sm:$0xff] %vm278_vm0, %v4753_v0 }
  0x3d   : > { %v4036_v3 = vpack.i.bf16 %v432_v2, %v431_v1  ;;  %290 = vst.msk [vmem:[#allocation2 + $0x50] sm:$0xff] %vm278_vm0, %v4753_v0  ;;  %v463_v4 = vld [vmem:[#allocation2 + $0x2] sm:$0xff]  ;;  %v464_v5 = vld [vmem:[#allocation2 + $0xa] sm:$0xff]  ;;  %v1829_v2 = vld [vmem:[#allocation7 + $0x78] sm:$0xff] }
  0x3e   : > { %291 = vst.msk [vmem:[#allocation2 + $0x58] sm:$0x3] %vm281_vm1, %v4753_v0  ;;  %v4041_v6 = vpack.i.bf16 %v464_v5, %v463_v4  ;;  %1932 = vmatpush.msra.mxu0 %v1829_v2  ;;  %v1827_v4 = vld [vmem:[#allocation7 + $0x68] sm:$0xff]  ;;  %3923 = vmatpush.msra.mxu3 %v1829_v2 }
  0x3f   : > { %4037 = vrot.lane.b32.xlu0 %v4036_v3, %s4754_s24  ;;  %292 = vst.msk [vmem:[#allocation2 + $0x60] sm:$0xff] %vm278_vm0, %v4753_v0  ;;  %v1828_v3 = vld [vmem:[#allocation7 + $0x70] sm:$0xff] }
  0x40   : > { %293 = vst.msk [vmem:[#allocation2 + $0x68] sm:$0xff] %vm278_vm0, %v4753_v0  ;;  %1933 = vmatpush.msra.mxu0 %v1828_v3  ;;  %3924 = vmatpush.msra.mxu3 %v1828_v3 }
  0x41   : > { %294 = vst.msk [vmem:[#allocation2 + $0x70] sm:$0x3] %vm281_vm1, %v4753_v0 }
  0x42   : > { %295 = vst.msk [vmem:[#allocation2 + $0x78] sm:$0xff] %vm278_vm0, %v4753_v0  ;;  %1934 = vmatpush.msra.mxu0 %v1827_v4  ;;  %3925 = vmatpush.msra.mxu3 %v1827_v4  ;;  %v399_v4 = vld [vmem:[#allocation2] sm:$0xff] }
  0x43   : > { %296 = vst.msk [vmem:[#allocation2 + $0x80] sm:$0xff] %vm278_vm0, %v4753_v0 }
  0x44   : > { %297 = vst.msk [vmem:[#allocation2 + $0x88] sm:$0x3] %vm281_vm1, %v4753_v0 }
  0x45   : > { %298 = vst.msk [vmem:[#allocation2 + $0x90] sm:$0xff] %vm278_vm0, %v4753_v0 }
  0x46   : > { %299 = vst.msk [vmem:[#allocation2 + $0x98] sm:$0xff] %vm278_vm0, %v4753_v0 }
  0x47   : > { %300 = vst.msk [vmem:[#allocation2 + $0xa0] sm:$0x3] %vm281_vm1, %v4753_v0  ;;  %4042 = vrot.lane.b32.xlu0 %v4041_v6, %s4755_s29 }
  0x48   : > { %301 = vst.msk [vmem:[#allocation2 + $0xa8] sm:$0xff] %vm278_vm0, %v4753_v0 }
  0x49   : > { %302 = vst.msk [vmem:[#allocation2 + $0xb0] sm:$0xff] %vm278_vm0, %v4753_v0 }
  0x4a   : > { %303 = vst.msk [vmem:[#allocation2 + $0xb8] sm:$0x3] %vm281_vm1, %v4753_v0 }
  0x4b   : > { %304 = vst.msk [vmem:[#allocation2 + $0xc0] sm:$0xff] %vm278_vm0, %v4753_v0 }
  0x4c   : > { %305 = vst.msk [vmem:[#allocation2 + $0xc8] sm:$0xff] %vm278_vm0, %v4753_v0 }
  0x4d   : > { %306 = vst.msk [vmem:[#allocation2 + $0xd0] sm:$0x3] %vm281_vm1, %v4753_v0 }
  0x4e   : > { %307 = vst.msk [vmem:[#allocation2 + $0xd8] sm:$0xff] %vm278_vm0, %v4753_v0 }
  0x4f   : > { %308 = vst.msk [vmem:[#allocation2 + $0xe0] sm:$0xff] %vm278_vm0, %v4753_v0 }
  0x50   : > { %309 = vst.msk [vmem:[#allocation2 + $0xe8] sm:$0x3] %vm281_vm1, %v4753_v0 }
  0x51   : > { %310 = vst.msk [vmem:[#allocation2 + $0xf0] sm:$0xff] %vm278_vm0, %v4753_v0 }
  0x52   : > { %311 = vst.msk [vmem:[#allocation2 + $0xf8] sm:$0xff] %vm278_vm0, %v4753_v0 }
  0x53   : > { %312 = vst.msk [vmem:[#allocation2 + $0x100] sm:$0x3] %vm281_vm1, %v4753_v0 }
  0x54   : > { %313 = vst.msk [vmem:[#allocation2 + $0x108] sm:$0xff] %vm278_vm0, %v4753_v0 }
  0x55   : > { %314 = vst.msk [vmem:[#allocation2 + $0x110] sm:$0xff] %vm278_vm0, %v4753_v0 }
  0x56   : > { %315 = vst.msk [vmem:[#allocation2 + $0x118] sm:$0x3] %vm281_vm1, %v4753_v0 }
  0x57   : > { %316 = vst.msk [vmem:[#allocation2 + $0x120] sm:$0xff] %vm278_vm0, %v4753_v0 }
  0x58   : > { %317 = vst.msk [vmem:[#allocation2 + $0x128] sm:$0xff] %vm278_vm0, %v4753_v0 }
  0x59   : > { %318 = vst.msk [vmem:[#allocation2 + $0x130] sm:$0x3] %vm281_vm1, %v4753_v0 }
  0x5a   : > { %319 = vst.msk [vmem:[#allocation2 + $0x138] sm:$0xff] %vm278_vm0, %v4753_v0 }
  0x5b   : > { %320 = vst.msk [vmem:[#allocation2 + $0x140] sm:$0xff] %vm278_vm0, %v4753_v0 }
  0x5c   : > { %321 = vst.msk [vmem:[#allocation2 + $0x148] sm:$0x3] %vm281_vm1, %v4753_v0 }
  0x5d   : > { %322 = vst.msk [vmem:[#allocation2 + $0x150] sm:$0xff] %vm278_vm0, %v4753_v0 }
  0x5e   : > { %323 = vst.msk [vmem:[#allocation2 + $0x158] sm:$0xff] %vm278_vm0, %v4753_v0 }
  0x5f   : > { %324 = vst.msk [vmem:[#allocation2 + $0x160] sm:$0x3] %vm281_vm1, %v4753_v0 }
  0x60   : > { %325 = vst.msk [vmem:[#allocation2 + $0x168] sm:$0xff] %vm278_vm0, %v4753_v0 }
  0x61   : > { %326 = vst.msk [vmem:[#allocation2 + $0x170] sm:$0xff] %vm278_vm0, %v4753_v0 }
  0x62   : > { %327 = vst.msk [vmem:[#allocation2 + $0x178] sm:$0x3] %vm281_vm1, %v4753_v0 }
  0x63   : > { %328 = vst.msk [vmem:[#allocation2 + $0x180] sm:$0xff] %vm278_vm0, %v4753_v0 }
  0x64   : > { %329 = vst.msk [vmem:[#allocation2 + $0x188] sm:$0xff] %vm278_vm0, %v4753_v0 }
  0x65   : > { %330 = vst.msk [vmem:[#allocation2 + $0x190] sm:$0x3] %vm281_vm1, %v4753_v0 }
  0x66   : > { %331 = vst.msk [vmem:[#allocation2 + $0x198] sm:$0xff] %vm278_vm0, %v4753_v0 }
  0x67   : > { %332 = vst.msk [vmem:[#allocation2 + $0x1a0] sm:$0xff] %vm278_vm0, %v4753_v0 }
  0x68   : > { %333 = vst.msk [vmem:[#allocation2 + $0x1a8] sm:$0x3] %vm281_vm1, %v4753_v0 }
  0x69   : > { %2190 = vst [vmem:[#allocation3] sm:$0xff] %v4753_v0 }
  0x6a   : > { %2191 = vst [vmem:[#allocation3 + $0x8] sm:$0xff] %v4753_v0 }
  0x6b   : > { %2192 = vst [vmem:[#allocation3 + $0x10] sm:$0x3] %v4753_v0 }
  0x6c   : > { %2193 = vst [vmem:[#allocation3 + $0x18] sm:$0xff] %v4753_v0 }
  0x6d   : > { %2194 = vst [vmem:[#allocation3 + $0x20] sm:$0xff] %v4753_v0 }
  0x6e   : > { %2195 = vst [vmem:[#allocation3 + $0x28] sm:$0x3] %v4753_v0 }
  0x6f   : > { %2196 = vst [vmem:[#allocation3 + $0x30] sm:$0xff] %v4753_v0 }
  0x70   : > { %2197 = vst [vmem:[#allocation3 + $0x38] sm:$0xff] %v4753_v0 }
  0x71   : > { %2198 = vst [vmem:[#allocation3 + $0x40] sm:$0x3] %v4753_v0 }
  0x72   : > { %2199 = vst [vmem:[#allocation3 + $0x48] sm:$0xff] %v4753_v0 }
  0x73   : > { %2200 = vst [vmem:[#allocation3 + $0x50] sm:$0xff] %v4753_v0 }
  0x74   : > { %2201 = vst [vmem:[#allocation3 + $0x58] sm:$0x3] %v4753_v0 }
  0x75   : > { %2202 = vst [vmem:[#allocation3 + $0x60] sm:$0xff] %v4753_v0 }
  0x76   : > { %2203 = vst [vmem:[#allocation3 + $0x68] sm:$0xff] %v4753_v0 }
  0x77   : > { %2204 = vst [vmem:[#allocation3 + $0x70] sm:$0x3] %v4753_v0 }
  0x78   : > { %2205 = vst [vmem:[#allocation3 + $0x78] sm:$0xff] %v4753_v0 }
  0x79   : > { %2206 = vst [vmem:[#allocation3 + $0x80] sm:$0xff] %v4753_v0 }
  0x7a   : > { %2207 = vst [vmem:[#allocation3 + $0x88] sm:$0x3] %v4753_v0 }
  0x7b   : > { %2208 = vst [vmem:[#allocation3 + $0x90] sm:$0xff] %v4753_v0 }
  0x7c   : > { %2209 = vst [vmem:[#allocation3 + $0x98] sm:$0xff] %v4753_v0 }
  0x7d   : > { %2210 = vst [vmem:[#allocation3 + $0xa0] sm:$0x3] %v4753_v0 }
  0x7e   : > { %2211 = vst [vmem:[#allocation3 + $0xa8] sm:$0xff] %v4753_v0 }
  0x7f   : > { %2212 = vst [vmem:[#allocation3 + $0xb0] sm:$0xff] %v4753_v0 }
  0x80   : > { %2213 = vst [vmem:[#allocation3 + $0xb8] sm:$0x3] %v4753_v0 }
  0x81   : > { %2214 = vst [vmem:[#allocation3 + $0xc0] sm:$0xff] %v4753_v0 }
  0x82   : > { %2215 = vst [vmem:[#allocation3 + $0xc8] sm:$0xff] %v4753_v0 }
  0x83   : > { %2216 = vst [vmem:[#allocation3 + $0xd0] sm:$0x3] %v4753_v0 }
  0x84   : > { %2217 = vst [vmem:[#allocation3 + $0xd8] sm:$0xff] %v4753_v0 }
  0x85   : > { %2218 = vst [vmem:[#allocation3 + $0xe0] sm:$0xff] %v4753_v0 }
  0x86   : > { %2219 = vst [vmem:[#allocation3 + $0xe8] sm:$0x3] %v4753_v0 }
  0x87   : > { %2220 = vst [vmem:[#allocation3 + $0xf0] sm:$0xff] %v4753_v0 }
  0x88   : > { %2221 = vst [vmem:[#allocation3 + $0xf8] sm:$0xff] %v4753_v0 }
  0x89   : > { %2222 = vst [vmem:[#allocation3 + $0x100] sm:$0x3] %v4753_v0 }
  0x8a   : > { %2223 = vst [vmem:[#allocation3 + $0x108] sm:$0xff] %v4753_v0 }
  0x8b   : > { %2224 = vst [vmem:[#allocation3 + $0x110] sm:$0xff] %v4753_v0 }
  0x8c   : > { %2225 = vst [vmem:[#allocation3 + $0x118] sm:$0x3] %v4753_v0 }
  0x8d   : > { %2226 = vst [vmem:[#allocation3 + $0x120] sm:$0xff] %v4753_v0 }
  0x8e   : > { %2227 = vst [vmem:[#allocation3 + $0x128] sm:$0xff] %v4753_v0 }
  0x8f   : > { %2228 = vst [vmem:[#allocation3 + $0x130] sm:$0x3] %v4753_v0 }
  0x90   : > { %2229 = vst [vmem:[#allocation3 + $0x138] sm:$0xff] %v4753_v0 }
  0x91   : > { %2230 = vst [vmem:[#allocation3 + $0x140] sm:$0xff] %v4753_v0 }
  0x92   : > { %2231 = vst [vmem:[#allocation3 + $0x148] sm:$0x3] %v4753_v0 }
  0x93   : > { %2232 = vst [vmem:[#allocation3 + $0x150] sm:$0xff] %v4753_v0 }
  0x94   : > { %2233 = vst [vmem:[#allocation3 + $0x158] sm:$0xff] %v4753_v0 }
  0x95   : > { %2234 = vst [vmem:[#allocation3 + $0x160] sm:$0x3] %v4753_v0 }
  0x96   : > { %2235 = vst [vmem:[#allocation3 + $0x168] sm:$0xff] %v4753_v0 }
  0x97   : > { %2236 = vst [vmem:[#allocation3 + $0x170] sm:$0xff] %v4753_v0 }
  0x98   : > { %2237 = vst [vmem:[#allocation3 + $0x178] sm:$0x3] %v4753_v0 }
  0x99   : > { %2238 = vst [vmem:[#allocation3 + $0x180] sm:$0xff] %v4753_v0 }
  0x9a   : > { %2239 = vst [vmem:[#allocation3 + $0x188] sm:$0xff] %v4753_v0 }
  0x9b   : > { %2240 = vst [vmem:[#allocation3 + $0x190] sm:$0x3] %v4753_v0 }
  0x9c   : > { %2241 = vst [vmem:[#allocation3 + $0x198] sm:$0xff] %v4753_v0 }
  0x9d   : > { %2242 = vst [vmem:[#allocation3 + $0x1a0] sm:$0xff] %v4753_v0 }
  0x9e   : > { %2243 = vst [vmem:[#allocation3 + $0x1a8] sm:$0x3] %v4753_v0  ;;  %v347_v0 = vld [vmem:[%s4904_s28 + $0x68] sm:$0xff] }
  0x9f   : > { %367 = vst.msk [vmem:[#allocation2 + $0x19] sm:$0xff] %vm278_vm0, %v334_v7 }
  0xa0   : > { %368 = vst.msk [vmem:[#allocation2 + $0x21] sm:$0xff] %vm278_vm0, %v335_v8  ;;  %v1826_v8 = vld [vmem:[#allocation7 + $0x60] sm:$0xff] }
  0xa1   : > { %369 = vst.msk [vmem:[#allocation2 + $0x31] sm:$0xff] %vm278_vm0, %v336_v9  ;;  %1935 = vmatpush.msra.mxu0 %v1826_v8  ;;  %3926 = vmatpush.msra.mxu3 %v1826_v8  ;;  %v400_v8 = vld [vmem:[#allocation2 + $0x8] sm:$0xff] }
  0xa2   : > { %370 = vst.msk [vmem:[#allocation2 + $0x39] sm:$0xff] %vm278_vm0, %v337_v10  ;;  %v1825_v10 = vld [vmem:[#allocation7 + $0x58] sm:$0xff] }
  0xa3   : > { %371 = vst.msk [vmem:[#allocation2 + $0x49] sm:$0xff] %vm278_vm0, %v338_v11  ;;  %1936 = vmatpush.msra.mxu0 %v1825_v10  ;;  %v1824_v11 = vld [vmem:[#allocation7 + $0x50] sm:$0xff]  ;;  %3927 = vmatpush.msra.mxu3 %v1825_v10 }
  0xa4   : > { %372 = vst.msk [vmem:[#allocation2 + $0x51] sm:$0xff] %vm278_vm0, %v339_v12  ;;  %v1823_v12 = vld [vmem:[#allocation7 + $0x48] sm:$0xff] }
  0xa5   : > { %373 = vst.msk [vmem:[#allocation2 + $0x61] sm:$0xff] %vm278_vm0, %v340_v27  ;;  %1937 = vmatpush.msra.mxu0 %v1824_v11  ;;  %3928 = vmatpush.msra.mxu3 %v1824_v11  ;;  %v1819_v27 = vld [vmem:[#allocation7 + $0x28] sm:$0xff]  ;;  %v356_v11 = vld [vmem:[%s4904_s28 + $0xb0] sm:$0xff] }
  0xa6   : > { %v5090_v13 = vld [vmem:[#allocation2 + $0x18] sm:$0xff]  ;;  %374 = vst.msk [vmem:[#allocation2 + $0x69] sm:$0xff] %vm278_vm0, %v341_v28 }
  0xa7   : > { %v5092_v14 = vld [vmem:[#allocation2 + $0x20] sm:$0xff]  ;;  %375 = vst.msk [vmem:[#allocation2 + $0x79] sm:$0xff] %vm278_vm0, %v342_v38  ;;  %1938 = vmatpush.msra.mxu0 %v1823_v12  ;;  %3929 = vmatpush.msra.mxu3 %v1823_v12  ;;  %v1816_v38 = vld [vmem:[#allocation7 + $0x10] sm:$0xff] }
  0xa8   : > { %v559_v15 = vld [vmem:[#allocation2 + $0x1a] sm:$0xff]  ;;  %v4046_v16 = vpack.i.bf16 %v5092_v14, %v5090_v13  ;;  %v624_v17 = vld [vmem:[#allocation2 + $0x31] sm:$0xff]  ;;  %v560_v18 = vld [vmem:[#allocation2 + $0x22] sm:$0xff]  ;;  %376 = vst.msk [vmem:[#allocation2 + $0x81] sm:$0xff] %vm278_vm0, %v343_v39 }
  0xa9   : > { %v625_v19 = vld [vmem:[#allocation2 + $0x39] sm:$0xff]  ;;  %v4056_v20 = vpack.i.bf16 %v560_v18, %v559_v15  ;;  %v528_v23 = vld [vmem:[#allocation2 + $0x21] sm:$0xff]  ;;  %v5099_v24 = vld [vmem:[#allocation2 + $0x30] sm:$0xff]  ;;  %377 = vst.msk [vmem:[#allocation2 + $0x91] sm:$0xff] %vm278_vm0, %v344_v46 }
  0xaa   : > { %4047 = vrot.lane.b32.xlu1 %v4046_v16, %s4756_s11  ;;  %v4066_v21 = vpack.i.bf16 %v625_v19, %v624_v17  ;;  %v527_v22 = vld [vmem:[#allocation2 + $0x19] sm:$0xff]  ;;  %v5117_v32 = vld [vmem:[#allocation2 + $0x48] sm:$0xff]  ;;  %378 = vst.msk [vmem:[#allocation2 + $0x99] sm:$0xff] %vm278_vm0, %v345_v47  ;;  %v348_v18 = vld [vmem:[%s4904_s28 + $0x70] sm:$0xff] }
  0xab   : > { %4057 = vrot.lane.b32.xlu2 %v4056_v20, %s4757_s9  ;;  %v5101_v25 = vld [vmem:[#allocation2 + $0x38] sm:$0xff]  ;;  %v4051_v26 = vpack.i.bf16 %v528_v23, %v527_v22  ;;  %v5119_v33 = vld [vmem:[#allocation2 + $0x50] sm:$0xff]  ;;  %379 = vst.msk [vmem:[#allocation2 + $0xa9] sm:$0xff] %vm278_vm0, %v346_v63  ;;  %v1822_v16 = vld [vmem:[#allocation7 + $0x40] sm:$0xff] }
  0xac   : > { %4067 = vrot.lane.b32.xlu0 %v4066_v21, %s4758_s12  ;;  %v4081_v29 = vpack.i.bf16 %v5101_v25, %v5099_v24  ;;  %v467_v34 = vld [vmem:[#allocation2 + $0x32] sm:$0xff]  ;;  %v4096_v35 = vpack.i.bf16 %v5119_v33, %v5117_v32  ;;  %v468_v36 = vld [vmem:[#allocation2 + $0x3a] sm:$0xff]  ;;  %v626_v40 = vld [vmem:[#allocation2 + $0x49] sm:$0xff]  ;;  %380 = vst.msk [vmem:[#allocation2 + $0xb1] sm:$0xff] %vm278_vm0, %v347_v0  ;;  %1939 = vmatpush.msra.mxu0 %v1822_v16 }
  0xad   : > { %3884 = vmatmul.msk.f32.vlgmr.msra.gmra.mxu1 %vm278_vm0, %v467_v34  ;;  %v4111_v37 = vpack.i.bf16 %v468_v36, %v467_v34  ;;  %v627_v41 = vld [vmem:[#allocation2 + $0x51] sm:$0xff]  ;;  %v5145_v48 = vld [vmem:[#allocation2 + $0x60] sm:$0xff]  ;;  %v5147_v49 = vld [vmem:[#allocation2 + $0x68] sm:$0xff]  ;;  %381 = vst.msk [vmem:[#allocation2 + $0xc1] sm:$0xff] %vm278_vm0, %v348_v18  ;;  %3930 = vmatpush.msra.mxu3 %v1822_v16 }
  0xae   : > { %v563_v42 = vld [vmem:[#allocation2 + $0x4a] sm:$0xff]  ;;  %v564_v43 = vld [vmem:[#allocation2 + $0x52] sm:$0xff]  ;;  %v4101_v44 = vpack.i.bf16 %v627_v41, %v626_v40  ;;  %v533_v50 = vld [vmem:[#allocation2 + $0x61] sm:$0xff]  ;;  %v4131_v53 = vpack.i.bf16 %v5147_v49, %v5145_v48  ;;  %389 = vst.msk [vmem:[#allocation2 + $0x121] sm:$0xff] %vm278_vm0, %v356_v11 }
  0xaf   : > { %v4126_v45 = vpack.i.bf16 %v564_v43, %v563_v42  ;;  %v534_v51 = vld [vmem:[#allocation2 + $0x69] sm:$0xff]  ;;  %v630_v56 = vld [vmem:[#allocation2 + $0x79] sm:$0xff]  ;;  %v631_v57 = vld [vmem:[#allocation2 + $0x81] sm:$0xff] }
  0xb0   : > { %v565_v52 = vld [vmem:[#allocation2 + $0x62] sm:$0xff]  ;;  %v4156_v54 = vpack.i.bf16 %v534_v51, %v533_v50  ;;  %v566_v55 = vld [vmem:[#allocation2 + $0x6a] sm:$0xff]  ;;  %v5159_v58 = vpack.i.bf16 %v631_v57, %v630_v56  ;;  %v5165_v59 = vld [vmem:[#allocation2 + $0x78] sm:$0xff] }
  0xb1   : > { %v504_v60 = vld [vmem:[#allocation2 + $0x80] sm:$0xff]  ;;  %v4161_v62 = vpack.i.bf16 %v566_v55, %v565_v52  ;;  %v600_v5 = vld [vmem:[#allocation2 + $0x90] sm:$0xff]  ;;  %v601_v6 = vld [vmem:[#allocation2 + $0x98] sm:$0xff] }
  0xb2   : > { %4052 = vrot.lane.b32.xlu1 %v4051_v26, %s4759_s13  ;;  %v473_v61 = vld [vmem:[#allocation2 + $0x7a] sm:$0xff]  ;;  %v4186_v1 = vpack.i.bf16 %v504_v60, %v5165_v59  ;;  %v474_v7 = vld [vmem:[#allocation2 + $0x82] sm:$0xff]  ;;  %v5177_v9 = vpack.i.bf16 %v601_v6, %v600_v5  ;;  %v569_v15 = vld [vmem:[#allocation2 + $0x92] sm:$0xff] }
  0xb3   : > { %4062 = vrot.lane.b32.xlu2 %v4081_v29, %s4760_s15  ;;  %v4216_v17 = vpack.i.bf16 %v474_v7, %v473_v61  ;;  %v1821_v19 = vld [vmem:[#allocation7 + $0x38] sm:$0xff]  ;;  %v1815_v39 = vld [vmem:[#allocation7 + $0x8] sm:$0xff]  ;;  %v1814_v40 = vld [vmem:[#allocation7] sm:$0xff] }
  0xb4   : > { %4082 = vrot.lane.b32.xlu0 %v4081_v29, %s4756_s11  ;;  %v633_v22 = vld [vmem:[#allocation2 + $0x99] sm:$0xff]  ;;  %1940 = vmatpush.msra.mxu0 %v1821_v19  ;;  %v539_v46 = vld [vmem:[#allocation2 + $0xa9] sm:$0xff]  ;;  %v540_v47 = vld [vmem:[#allocation2 + $0xb1] sm:$0xff] }
  0xb5   : > { %3885 = vmatmul.msk.f32.gmra.mxu1 %vm278_vm0, %v468_v36  ;;  %3931 = vmatpush.msra.mxu3 %v1821_v19  ;;  %v570_v23 = vld [vmem:[#allocation2 + $0x9a] sm:$0xff]  ;;  %v572_v50 = vld [vmem:[#allocation2 + $0xb2] sm:$0xff] }
  0xb6   : > { %v1818_v29 = vld [vmem:[#allocation7 + $0x20] sm:$0xff]  ;;  %v4231_v34 = vpack.i.bf16 %v570_v23, %v569_v15  ;;  %v352_v6 = vld [vmem:[%s4904_s28 + $0x90] sm:$0xff] }
  0xb7   : > { %v350_v41 = vld [vmem:[%s4904_s28 + $0x80] sm:$0xff]  ;;  %385 = vst.msk [vmem:[#allocation2 + $0xf1] sm:$0xff] %vm278_vm0, %v352_v6 }
  0xb8   : > { %383 = vst.msk [vmem:[#allocation2 + $0xd9] sm:$0xff] %vm278_vm0, %v350_v41  ;;  %v509_v60 = vld [vmem:[#allocation2 + $0xc0] sm:$0xff] }
  0xba   : > { %4072 = vrot.lane.b32.xlu1 %v4051_v26, %s4754_s24  ;;  %v1820_v26 = vld [vmem:[#allocation7 + $0x30] sm:$0xff] }
  0xbb   : > { %4077 = vrot.lane.b32.xlu2 %v4056_v20, %s4755_s29  ;;  %v349_v20 = vld [vmem:[%s4904_s28 + $0x78] sm:$0xff]  ;;  %1941 = vmatpush.msra.mxu0 %v1820_v26 }
  0xbc   : > { %4097 = vrot.lane.b32.xlu0 %v4096_v35, %s4760_s15  ;;  %382 = vst.msk [vmem:[#allocation2 + $0xc9] sm:$0xff] %vm278_vm0, %v349_v20  ;;  %3932 = vmatpush.msra.mxu3 %v1820_v26 }
  0xbd   : > { %3886 = vmatmul.msk.f32.gmra.mxu1 %vm278_vm0, %v563_v42  ;;  %1942 = vmatpush.msra.mxu0 %v1819_v27  ;;  %v4038_v42 = vpop.permute.xlu0 %4037 }
  0xbe   : > { %3933 = vmatpush.msra.mxu3 %v1819_v27  ;;  %v4039_v63 = vunpack.i.l.bf16 %v4038_v42  ;;  %v4040_v3 = vunpack.i.h.bf16 %v4038_v42 }
  0xbf   : > { %1943 = vmatpush.msra.mxu0 %v1818_v29  ;;  %v606_v26 = vld [vmem:[#allocation2 + $0xd8] sm:$0xff] }
  0xc0   : > { %3934 = vmatpush.msra.mxu3 %v1818_v29  ;;  %v1584_v12 = vsel %vm278_vm0, %v399_v4, %v4039_v63 }
  0xc2   : > { %4087 = vrot.lane.b32.xlu1 %v4066_v21, %s4759_s13 }
  0xc3   : > { %4092 = vrot.lane.b32.xlu2 %v4111_v37, %s4757_s9  ;;  %v5222_v57 = vld [vmem:[#allocation2 + $0xc2] sm:$0xff]  ;;  %v5236_v2 = vld [vmem:[#allocation2 + $0xca] sm:$0xff] }
  0xc4   : > { %4112 = vrot.lane.b32.xlu0 %v4111_v37, %s4755_s29  ;;  %v571_v37 = vld [vmem:[#allocation2 + $0xaa] sm:$0xff] }
  0xc5   : > { %3887 = vmatmul.msk.f32.gmra.mxu1 %vm278_vm0, %v564_v43  ;;  %v351_v43 = vld [vmem:[%s4904_s28 + $0x88] sm:$0xff]  ;;  %v4266_v0 = vpack.i.bf16 %v572_v50, %v571_v37 }
  0xc6   : > { %384 = vst.msk [vmem:[#allocation2 + $0xe1] sm:$0xff] %vm278_vm0, %v351_v43 }
  0xca   : > { %4102 = vrot.lane.b32.xlu1 %v4101_v44, %s4758_s12 }
  0xcb   : > { %4107 = vrot.lane.b32.xlu2 %v4066_v21, %s4754_s24  ;;  %v632_v21 = vld [vmem:[#allocation2 + $0x91] sm:$0xff] }
  0xcc   : > { %4127 = vrot.lane.b32.xlu0 %v4126_v45, %s4757_s9  ;;  %v4206_v28 = vpack.i.bf16 %v633_v22, %v632_v21 }
  0xcd   : > { %3888 = vmatmul.msk.f32.gmra.mxu1 %vm278_vm0, %v565_v52  ;;  %v607_v27 = vld [vmem:[#allocation2 + $0xe0] sm:$0xff] }
  0xce   : > { %v5269_v43 = vpack.i.bf16 %v607_v27, %v606_v26 }
  0xd2   : > { %4117 = vrot.lane.b32.xlu1 %v4096_v35, %s4756_s11  ;;  %v1817_v35 = vld [vmem:[#allocation7 + $0x18] sm:$0xff] }
  0xd3   : > { %4122 = vrot.lane.b32.xlu2 %v4101_v44, %s4759_s13  ;;  %1944 = vmatpush.msra.mxu0 %v1817_v35 }
  0xd4   : > { %4142 = vrot.lane.b32.xlu0 %v4101_v44, %s4754_s24  ;;  %3935 = vmatpush.msra.mxu3 %v1817_v35  ;;  %v602_v44 = vld [vmem:[#allocation2 + $0xa8] sm:$0xff] }
  0xd5   : > { %3889 = vmatmul.msk.f32.gmra.mxu1 %vm278_vm0, %v566_v55  ;;  %1945 = vmatpush.msra.mxu0 %v1816_v38  ;;  %v637_v55 = vld [vmem:[#allocation2 + $0xc9] sm:$0xff] }
  0xd6   : > { %3936 = vmatpush.msra.mxu3 %v1816_v38  ;;  %v5261_v38 = vld [vmem:[#allocation2 + $0xda] sm:$0xff] }
  0xd7   : > { %1946 = vmatpush.msra.mxu0 %v1815_v39 }
  0xd8   : > { %3937 = vmatpush.msra.mxu3 %v1815_v39 }
  0xd9   : > { %1947 = vmatpush.msra.mxu0 %v1814_v40 }
  0xda   : > { %4132 = vrot.lane.b32.xlu1 %v4131_v53, %s4760_s15  ;;  %3938 = vmatpush.msra.mxu3 %v1814_v40  ;;  %v357_v40 = vld [vmem:[%s4904_s28 + $0xb8] sm:$0xff] }
  0xdb   : > { %4137 = vrot.lane.b32.xlu2 %v4156_v54, %s4758_s12  ;;  %390 = vst.msk [vmem:[#allocation2 + $0x129] sm:$0xff] %vm278_vm0, %v357_v40 }
  0xdc   : > { %4157 = vrot.lane.b32.xlu0 %v4156_v54, %s4759_s13  ;;  %3939 = vmatpush.msrb.mxu3 %v5110_v30  ;;  %v4043_v30 = vpop.permute.xlu0 %4042 }
  0xdd   : > { %3890 = vmatmul.msk.f32.gmra.mxu1 %vm278_vm0, %v473_v61  ;;  %v510_v61 = vld [vmem:[#allocation2 + $0xc8] sm:$0xff]  ;;  %v4044_v5 = vunpack.i.l.bf16 %v4043_v30 }
  0xde   : > { %3940 = vmatpush.msrb.mxu3 %v5112_v31  ;;  %v4291_v10 = vpack.i.bf16 %v510_v61, %v509_v60  ;;  %v5290_v60 = vld [vmem:[#allocation2 + $0xe2] sm:$0xff] }
  0xdf   : > { %v1617_v16 = vsel %vm1616_vm2, %v1584_v12, %v4044_v5  ;;  %v359_v61 = vld [vmem:[%s4904_s28 + $0xc8] sm:$0xff]  ;;  %v360_v5 = vld [vmem:[%s4904_s28 + $0xd0] sm:$0xff] }
  0xe0   : > { %392 = vst.msk [vmem:[#allocation2 + $0x141] sm:$0xff] %vm278_vm0, %v359_v61 }
  0xe1   : > { %393 = vst.msk [vmem:[#allocation2 + $0x151] sm:$0xff] %vm278_vm0, %v360_v5 }
  0xe2   : > { %4147 = vrot.lane.b32.xlu1 %v4126_v45, %s4755_s29  ;;  %v603_v45 = vld [vmem:[#allocation2 + $0xb0] sm:$0xff] }
  0xe3   : > { %4152 = vrot.lane.b32.xlu2 %v4131_v53, %s4756_s11  ;;  %v4236_v52 = vpack.i.bf16 %v603_v45, %v602_v44  ;;  %v5213_v53 = vpack.i.bf16 %v540_v47, %v539_v46  ;;  %v358_v46 = vld [vmem:[%s4904_s28 + $0xc0] sm:$0xff] }
  0xe4   : > { %4172 = vrot.lane.b32.xlu0 %v5159_v58, %s4758_s12  ;;  %391 = vst.msk [vmem:[#allocation2 + $0x139] sm:$0xff] %vm278_vm0, %v358_v46 }
  0xe5   : > { %3891 = vmatmul.msk.f32.gmra.mxu1 %vm278_vm0, %v474_v7  ;;  %v353_v7 = vld [vmem:[%s4904_s28 + $0x98] sm:$0xff] }
  0xe6   : > { %386 = vst.msk [vmem:[#allocation2 + $0xf9] sm:$0xff] %vm278_vm0, %v353_v7  ;;  %v638_v7 = vld [vmem:[#allocation2 + $0xd9] sm:$0xff] }
  0xea   : > { %4162 = vrot.lane.b32.xlu1 %v4161_v62, %s4757_s9 }
  0xeb   : > { %4167 = vrot.lane.b32.xlu2 %v4186_v1, %s4760_s15 }
  0xec   : > { %4187 = vrot.lane.b32.xlu0 %v4186_v1, %s4756_s11 }
  0xed   : > { %3892 = vmatmul.msk.f32.gmra.mxu1 %vm278_vm0, %v569_v15  ;;  %v1585_v15 = vsel %vm278_vm0, %v400_v8, %v4040_v3  ;;  %v354_v3 = vld [vmem:[%s4904_s28 + $0xa0] sm:$0xff] }
  0xee   : > { %387 = vst.msk [vmem:[#allocation2 + $0x109] sm:$0xff] %vm278_vm0, %v354_v3  ;;  %v5309_v8 = vld [vmem:[#allocation2 + $0xe1] sm:$0xff] }
  0xef   : > { %v4311_v11 = vpack.i.bf16 %v5309_v8, %v638_v7 }
  0xf2   : > { %4177 = vrot.lane.b32.xlu1 %v4156_v54, %s4754_s24  ;;  %v636_v54 = vld [vmem:[#allocation2 + $0xc1] sm:$0xff] }
  0xf3   : > { %4182 = vrot.lane.b32.xlu2 %v4161_v62, %s4755_s29  ;;  %v5226_v31 = vpack.i.bf16 %v637_v55, %v636_v54 }
  0xf4   : > { %4202 = vrot.lane.b32.xlu0 %v5177_v9, %s4760_s15 }
  0xf5   : > { %3893 = vmatmul.msk.f32.gmra.mxu1 %vm278_vm0, %v570_v23 }
  0xfa   : > { %4192 = vrot.lane.b32.xlu1 %v5159_v58, %s4759_s13 }
  0xfb   : > { %4197 = vrot.lane.b32.xlu2 %v4216_v17, %s4757_s9 }
  0xfc   : > { %4217 = vrot.lane.b32.xlu0 %v4216_v17, %s4755_s29 }
  0xfd   : > { %3894 = vmatmul.msk.f32.gmra.mxu1 %vm278_vm0, %v571_v37 }
 0x102   : > { %4207 = vrot.lane.b32.xlu1 %v4206_v28, %s4758_s12 }
 0x103   : > { %4212 = vrot.lane.b32.xlu2 %v5159_v58, %s4754_s24 }
 0x104   : > { %4232 = vrot.lane.b32.xlu0 %v4231_v34, %s4757_s9 }
 0x105   : > { %v5197_v36 = vpop.permute.xlu2 %4057  ;;  %3895 = vmatmul.msk.f32.gmra.mxu1 %vm278_vm0, %v572_v50 }
 0x106   : > { %v4059_v18 = vunpack.i.l.bf16 %v5197_v36  ;;  %v4060_v47 = vunpack.i.h.bf16 %v5197_v36 }
 0x10a   : > { %4222 = vrot.lane.b32.xlu1 %v5177_v9, %s4756_s11  ;;  %v4045_v9 = vunpack.i.h.bf16 %v4043_v30 }
 0x10b   : > { %4227 = vrot.lane.b32.xlu2 %v4206_v28, %s4759_s13 }
 0x10c   : > { %4247 = vrot.lane.b32.xlu0 %v4206_v28, %s4754_s24  ;;  %v1618_v19 = vsel %vm1616_vm2, %v1585_v15, %v4045_v9  ;;  %v5320_v15 = vld [vmem:[#allocation2 + $0xf2] sm:$0xff] }
 0x10d   : > { %v5209_v51 = vpop.permute.xlu2 %4062  ;;  %3896 = vmatmul.msk.f32.gmra.mxu1 %vm278_vm0, %v5222_v57 }
 0x10e   : > { %v4064_v23 = vunpack.i.l.bf16 %v5209_v51 }
 0x112   : > { %4237 = vrot.lane.b32.xlu1 %v4236_v52, %s4760_s15 }
 0x113   : > { %4242 = vrot.lane.b32.xlu2 %v5213_v53, %s4758_s12 }
 0x114   : > { %4262 = vrot.lane.b32.xlu0 %v5213_v53, %s4759_s13 }
 0x115   : > { %v5220_v56 = vpop.permute.xlu2 %4077  ;;  %3897 = vmatmul.msk.f32.gmra.mxu1 %vm278_vm0, %v5236_v2 }
 0x116   : > { %v4079_v63 = vunpack.i.l.bf16 %v5220_v56 }
 0x11a   : > { %4252 = vrot.lane.b32.xlu1 %v4231_v34, %s4755_s29 }
 0x11b   : > { %4257 = vrot.lane.b32.xlu2 %v4236_v52, %s4756_s11  ;;  %v4065_v52 = vunpack.i.h.bf16 %v5209_v51 }
 0x11c   : > { %v4048_v58 = vpop.permute.xlu1 %4047  ;;  %4277 = vrot.lane.b32.xlu0 %v5226_v31, %s4758_s12 }
 0x11d   : > { %v5232_v62 = vpop.permute.xlu2 %4092  ;;  %v4049_v17 = vunpack.i.l.bf16 %v4048_v58  ;;  %v4050_v29 = vunpack.i.h.bf16 %v4048_v58  ;;  %3898 = vmatmul.msk.f32.gmra.mxu1 %vm278_vm0, %v5261_v38 }
 0x11e   : > { %v5234_v1 = vpop.permute.xlu0 %4067 }
 0x11f   : > { %v1650_v34 = vsel %vm1649_vm3, %v1617_v16, %v4049_v17  ;;  %v4069_v35 = vunpack.i.l.bf16 %v5234_v1  ;;  %v1651_v41 = vsel %vm1649_vm3, %v1618_v19, %v4050_v29  ;;  %v4070_v55 = vunpack.i.h.bf16 %v5234_v1 }
 0x120   : > { %v4094_v17 = vunpack.i.l.bf16 %v5232_v62 }
 0x122   : > { %4267 = vrot.lane.b32.xlu1 %v4266_v0, %s4757_s9 }
 0x123   : > { %4272 = vrot.lane.b32.xlu2 %v4291_v10, %s4760_s15 }
 0x124   : > { %v4053_v20 = vpop.permute.xlu1 %4052  ;;  %4292 = vrot.lane.b32.xlu0 %v4291_v10, %s4756_s11 }
 0x125   : > { %v4055_v21 = vunpack.i.h.bf16 %v4053_v20  ;;  %v4054_v22 = vunpack.i.l.bf16 %v4053_v20  ;;  %v5255_v28 = vpop.permute.xlu2 %4107  ;;  %3899 = vmatmul.msk.f32.gmra.mxu1 %vm278_vm0, %v5290_v60  ;;  %v4336_v20 = vpack.i.bf16 %v5290_v60, %v5261_v38 }
 0x126   : > { %v5259_v37 = vpop.permute.xlu0 %4082  ;;  %v4109_v46 = vunpack.i.l.bf16 %v5255_v28  ;;  %v4110_v3 = vunpack.i.h.bf16 %v5255_v28 }
 0x127   : > { %v1683_v39 = vsel %vm1682_vm4, %v1650_v34, %v4054_v22  ;;  %v1684_v44 = vsel %vm1682_vm4, %v1651_v41, %v4055_v21  ;;  %v4084_v6 = vunpack.i.l.bf16 %v5259_v37  ;;  %v355_v41 = vld [vmem:[%s4904_s28 + $0xa8] sm:$0xff] }
 0x128   : > { %v1716_v42 = vsel %vm1715_vm5, %v1683_v39, %v4059_v18  ;;  %v1717_v54 = vsel %vm1715_vm5, %v1684_v44, %v4060_v47  ;;  %v4080_v18 = vunpack.i.h.bf16 %v5220_v56  ;;  %v5344_v39 = vld [vmem:[#allocation2 + $0xfa] sm:$0xff]  ;;  %388 = vst.msk [vmem:[#allocation2 + $0x111] sm:$0xff] %vm278_vm0, %v355_v41 }
 0x129   : > { %v1749_v45 = vsel %vm1748_vm6, %v1716_v42, %v4064_v23  ;;  %v1750_v51 = vsel %vm1748_vm6, %v1717_v54, %v4065_v52  ;;  %v4085_v23 = vunpack.i.h.bf16 %v5259_v37  ;;  %v4095_v42 = vunpack.i.h.bf16 %v5232_v62 }
 0x12a   : > { %4282 = vrot.lane.b32.xlu1 %v5213_v53, %s4754_s24  ;;  %v1782_v50 = vsel %vm1781_vm7, %v1749_v45, %v4069_v35  ;;  %v1783_v4 = vsel %vm1781_vm7, %v1750_v51, %v4070_v55  ;;  %v5366_v55 = vld [vmem:[#allocation2 + $0xf8] sm:$0xff]  ;;  %v1588_v51 = vsel %vm278_vm0, %v5099_v24, %v4109_v46 }
 0x12b   : > { %1948 = vmatmul.f32.vlgmr.msra.gmra.mxu0 %v1782_v50  ;;  %4287 = vrot.lane.b32.xlu2 %v4266_v0, %s4755_s29  ;;  %v4321_v0 = vpack.i.bf16 %v5236_v2, %v5222_v57  ;;  %v361_v50 = vld [vmem:[%s4904_s28 + $0xd8] sm:$0xff] }
 0x12c   : > { %v4073_v30 = vpop.permute.xlu1 %4072  ;;  %4307 = vrot.lane.b32.xlu0 %v5269_v43, %s4760_s15  ;;  %394 = vst.msk [vmem:[#allocation2 + $0x159] sm:$0xff] %vm278_vm0, %v361_v50 }
 0x12d   : > { %v4074_v36 = vunpack.i.l.bf16 %v4073_v30  ;;  %v5285_v53 = vpop.permute.xlu2 %4122  ;;  %v4075_v2 = vunpack.i.h.bf16 %v4073_v30  ;;  %3900 = vmatmul.msk.f32.gmra.mxu1 %vm278_vm0, %v5320_v15 }
 0x12e   : > { %v5288_v58 = vpop.permute.xlu0 %4097 }
 0x12f   : > { %v1586_v1 = vsel %vm278_vm0, %v5090_v13, %v4074_v36  ;;  %v1587_v21 = vsel %vm278_vm0, %v5092_v14, %v4075_v2  ;;  %v4099_v22 = vunpack.i.l.bf16 %v5288_v58  ;;  %v5340_v14 = vld [vmem:[#allocation2 + $0x121] sm:$0xff]  ;;  %v4100_v52 = vunpack.i.h.bf16 %v5288_v58  ;;  %v608_v36 = vld [vmem:[#allocation2 + $0xf0] sm:$0xff]  ;;  %v5372_v58 = vld [vmem:[#allocation2 + $0xf9] sm:$0xff] }
 0x130   : > { %v1619_v13 = vsel %vm1616_vm2, %v1586_v1, %v4079_v63  ;;  %v1620_v56 = vsel %vm1616_vm2, %v1587_v21, %v4080_v18  ;;  %v4351_v47 = vpack.i.bf16 %v5340_v14, %v638_v7  ;;  %v545_v63 = vld [vmem:[#allocation2 + $0xf1] sm:$0xff]  ;;  %v4341_v5 = vpack.i.bf16 %v5366_v55, %v608_v36 }
 0x131   : > { %v1652_v16 = vsel %vm1649_vm3, %v1619_v13, %v4084_v6  ;;  %v5383_v24 = vld [vmem:[#allocation2 + $0x10a] sm:$0xff]  ;;  %v4124_v13 = vunpack.i.l.bf16 %v5285_v53  ;;  %v4346_v2 = vpack.i.bf16 %v5372_v58, %v545_v63 }
 0x132   : > { %4297 = vrot.lane.b32.xlu1 %v5226_v31, %s4759_s13 }
 0x133   : > { %1951 = vmatmul.f32.gmra.mxu0 %v1783_v4  ;;  %4302 = vrot.lane.b32.xlu2 %v4321_v0, %s4757_s9 }
 0x134   : > { %v4088_v57 = vpop.permute.xlu1 %4087  ;;  %4322 = vrot.lane.b32.xlu0 %v4321_v0, %s4755_s29  ;;  %v5374_v0 = vld [vmem:[#allocation2 + $0x139] sm:$0xff] }
 0x135   : > { %v4089_v9 = vunpack.i.l.bf16 %v4088_v57  ;;  %v5315_v10 = vpop.permute.xlu2 %4137  ;;  %v4090_v27 = vunpack.i.h.bf16 %v4088_v57  ;;  %3901 = vmatmul.msk.f32.gmra.mxu1 %vm278_vm0, %v5344_v39 }
 0x136   : > { %v5318_v12 = vpop.permute.xlu0 %4112 }
 0x137   : > { %v1685_v19 = vsel %vm1682_vm4, %v1652_v16, %v4089_v9  ;;  %v4114_v30 = vunpack.i.l.bf16 %v5318_v12  ;;  %v5393_v9 = vpack.i.bf16 %v5374_v0, %v545_v63  ;;  %v1589_v16 = vsel %vm278_vm0, %v5101_v25, %v4110_v3  ;;  %v5437_v63 = vld [vmem:[#allocation2 + $0x140] sm:$0xff] }
 0x138   : > { %v1718_v26 = vsel %vm1715_vm5, %v1685_v19, %v4094_v17 }
 0x139   : > { %v1751_v37 = vsel %vm1748_vm6, %v1718_v26, %v4099_v22  ;;  %v1621_v7 = vsel %vm1616_vm2, %v1588_v51, %v4114_v30  ;;  %v4139_v22 = vunpack.i.l.bf16 %v5315_v10  ;;  %v4140_v30 = vunpack.i.h.bf16 %v5315_v10  ;;  %v616_v51 = vld [vmem:[#allocation2 + $0x150] sm:$0xff] }
 0x13a   : > { %4312 = vrot.lane.b32.xlu1 %v4311_v11, %s4758_s12 }
 0x13b   : > { %4317 = vrot.lane.b32.xlu2 %v5226_v31, %s4754_s24  ;;  %v1653_v31 = vsel %vm1649_vm3, %v1620_v56, %v4085_v23  ;;  %v4125_v23 = vunpack.i.h.bf16 %v5285_v53  ;;  %v642_v56 = vld [vmem:[#allocation2 + $0x109] sm:$0xff] }
 0x13c   : > { %v4103_v29 = vpop.permute.xlu1 %4102  ;;  %4337 = vrot.lane.b32.xlu0 %v4336_v20, %s4757_s9  ;;  %v1686_v45 = vsel %vm1682_vm4, %v1653_v31, %v4090_v27  ;;  %v487_v20 = vld [vmem:[#allocation2 + $0x122] sm:$0xff]  ;;  %v648_v27 = vld [vmem:[#allocation2 + $0x151] sm:$0xff] }
 0x13d   : > { %v4104_v34 = vunpack.i.l.bf16 %v4103_v29  ;;  %v5342_v35 = vpop.permute.xlu2 %4152  ;;  %v4105_v62 = vunpack.i.h.bf16 %v4103_v29  ;;  %v1719_v54 = vsel %vm1715_vm5, %v1686_v45, %v4095_v42  ;;  %3902 = vmatmul.msk.f32.gmra.mxu1 %vm278_vm0, %v5383_v24  ;;  %v4356_v41 = vpack.i.bf16 %v487_v20, %v5261_v38  ;;  %v5416_v42 = vld [vmem:[#allocation2 + $0x112] sm:$0xff] }
 0x13e   : > { %v5347_v40 = vpop.permute.xlu0 %4127  ;;  %v1752_v4 = vsel %vm1748_vm6, %v1719_v54, %v4100_v52 }
 0x13f   : > { %v1784_v44 = vsel %vm1781_vm7, %v1751_v37, %v4104_v34  ;;  %v1785_v57 = vsel %vm1781_vm7, %v1752_v4, %v4105_v62  ;;  %v4129_v18 = vunpack.i.l.bf16 %v5347_v40  ;;  %v4130_v53 = vunpack.i.h.bf16 %v5347_v40  ;;  %v5429_v62 = vld [vmem:[#allocation2 + $0x13a] sm:$0xff] }
 0x140   : > { %1954 = vmatmul.f32.gmra.mxu0 %v1784_v44  ;;  %v5443_v4 = vpack.i.bf16 %v5429_v62, %v5320_v15 }
 0x142   : > { %4327 = vrot.lane.b32.xlu1 %v5269_v43, %s4756_s11 }
 0x143   : > { %4332 = vrot.lane.b32.xlu2 %v4311_v11, %s4759_s13  ;;  %v4115_v11 = vunpack.i.h.bf16 %v5318_v12  ;;  %v5405_v12 = vld [vmem:[#allocation2 + $0x138] sm:$0xff] }
 0x144   : > { %v4118_v61 = vpop.permute.xlu1 %4117  ;;  %4352 = vrot.lane.b32.xlu0 %v4351_v47, %s4754_s24  ;;  %v4361_v45 = vpack.i.bf16 %v5405_v12, %v608_v36  ;;  %v5424_v47 = vpack.i.bf16 %v648_v27, %v642_v56  ;;  %v610_v36 = vld [vmem:[#allocation2 + $0x108] sm:$0xff] }
 0x145   : > { %v4119_v43 = vunpack.i.l.bf16 %v4118_v61  ;;  %v5376_v1 = vpop.permute.xlu2 %4167  ;;  %v4120_v17 = vunpack.i.h.bf16 %v4118_v61  ;;  %v1622_v25 = vsel %vm1616_vm2, %v1589_v16, %v4115_v11  ;;  %3903 = vmatmul.msk.f32.gmra.mxu1 %vm278_vm0, %v5416_v42  ;;  %v4396_v16 = vpack.i.bf16 %v5437_v63, %v5366_v55 }
 0x146   : > { %v5381_v6 = vpop.permute.xlu0 %4142 }
 0x147   : > { %v1654_v28 = vsel %vm1649_vm3, %v1621_v7, %v4119_v43  ;;  %v1655_v34 = vsel %vm1649_vm3, %v1622_v25, %v4120_v17  ;;  %v4144_v52 = vunpack.i.l.bf16 %v5381_v6  ;;  %v4155_v17 = vunpack.i.h.bf16 %v5342_v35 }
 0x148   : > { %1957 = vmatmul.f32.gmra.mxu0 %v1785_v57  ;;  %v1687_v19 = vsel %vm1682_vm4, %v1654_v28, %v4124_v13  ;;  %v1688_v50 = vsel %vm1682_vm4, %v1655_v34, %v4125_v23  ;;  %v4154_v13 = vunpack.i.l.bf16 %v5342_v35  ;;  %v5451_v57 = vpack.i.bf16 %v616_v51, %v610_v36  ;;  %v611_v35 = vld [vmem:[#allocation2 + $0x110] sm:$0xff]  ;;  %v617_v23 = vld [vmem:[#allocation2 + $0x158] sm:$0xff] }
 0x149   : > { %v1720_v37 = vsel %vm1715_vm5, %v1687_v19, %v4129_v18  ;;  %v1721_v40 = vsel %vm1715_vm5, %v1688_v50, %v4130_v53  ;;  %v1590_v7 = vsel %vm278_vm0, %v5117_v32, %v4144_v52  ;;  %v5467_v19 = vld [vmem:[#allocation2 + $0x129] sm:$0xff]  ;;  %v552_v52 = vld [vmem:[#allocation2 + $0x141] sm:$0xff] }
 0x14a   : > { %4342 = vrot.lane.b32.xlu1 %v4341_v5, %s4760_s15  ;;  %v4145_v5 = vunpack.i.h.bf16 %v5381_v6  ;;  %v4386_v34 = vpack.i.bf16 %v5467_v19, %v5309_v8 }
 0x14b   : > { %4347 = vrot.lane.b32.xlu2 %v4346_v2, %s4758_s12  ;;  %v362_v2 = vld [vmem:[%s4904_s28 + $0xe0] sm:$0xff] }
 0x14c   : > { %v4133_v21 = vpop.permute.xlu1 %4132  ;;  %4367 = vrot.lane.b32.xlu0 %v5393_v9, %s4759_s13  ;;  %395 = vst.msk [vmem:[#allocation2 + $0x169] sm:$0xff] %vm278_vm0, %v362_v2  ;;  %v1591_v6 = vsel %vm278_vm0, %v5119_v33, %v4145_v5 }
 0x14d   : > { %v4134_v26 = vunpack.i.l.bf16 %v4133_v21  ;;  %v5409_v29 = vpop.permute.xlu2 %4182  ;;  %v4135_v38 = vunpack.i.h.bf16 %v4133_v21  ;;  %3904 = vmatmul.msk.f32.gmra.mxu1 %vm278_vm0, %v487_v20  ;;  %v4169_v21 = vunpack.i.l.bf16 %v5376_v1 }
 0x14e   : > { %v5414_v31 = vpop.permute.xlu0 %4157 }
 0x14f   : > { %v1753_v44 = vsel %vm1748_vm6, %v1720_v37, %v4134_v26  ;;  %v1754_v43 = vsel %vm1748_vm6, %v1721_v40, %v4135_v38  ;;  %v4159_v32 = vunpack.i.l.bf16 %v5414_v31  ;;  %v4160_v56 = vunpack.i.h.bf16 %v5414_v31 }
 0x150   : > { %v1786_v46 = vsel %vm1781_vm7, %v1753_v44, %v4139_v22  ;;  %v1787_v15 = vsel %vm1781_vm7, %v1754_v43, %v4140_v30  ;;  %v5474_v22 = vld [vmem:[#allocation2 + $0x12a] sm:$0xff]  ;;  %v4170_v38 = vunpack.i.h.bf16 %v5376_v1  ;;  %v5510_v43 = vpack.i.bf16 %v552_v52, %v5372_v58 }
 0x151   : > { %1960 = vmatmul.f32.gmra.mxu0 %v1786_v46  ;;  %v4391_v53 = vpack.i.bf16 %v5474_v22, %v5290_v60  ;;  %v5492_v46 = vpack.i.bf16 %v617_v23, %v611_v35  ;;  %v5505_v1 = vld [vmem:[#allocation9 + $0x78] sm:$0xff] }
 0x152   : > { %4357 = vrot.lane.b32.xlu1 %v4356_v41, %s4755_s29  ;;  %2714 = vmatpush.msra.mxu2 %v5505_v1  ;;  %v2613_v23 = vld [vmem:[#allocation9 + $0x178] sm:$0xff] }
 0x153   : > { %4362 = vrot.lane.b32.xlu2 %v4361_v45, %s4756_s11  ;;  %2940 = vmatpush.msrb.mxu1 %v2613_v23  ;;  %v5611_v23 = vld [vmem:[#allocation2 + $0x120] sm:$0xff] }
 0x154   : > { %v4148_v54 = vpop.permute.xlu1 %4147  ;;  %4382 = vrot.lane.b32.xlu0 %v5424_v47, %s4758_s12 }
 0x155   : > { %v4149_v61 = vunpack.i.l.bf16 %v4148_v54  ;;  %v5439_v3 = vpop.permute.xlu2 %4197  ;;  %v4150_v28 = vunpack.i.h.bf16 %v4148_v54  ;;  %3905 = vmatmul.msk.f32.gmra.mxu1 %vm278_vm0, %v5474_v22  ;;  %v584_v54 = vld [vmem:[#allocation2 + $0x142] sm:$0xff] }
 0x156   : > { %v5445_v10 = vpop.permute.xlu0 %4172  ;;  %v4199_v35 = vunpack.i.l.bf16 %v5439_v3 }
 0x157   : > { %v1623_v11 = vsel %vm1616_vm2, %v1590_v7, %v4149_v61  ;;  %v1624_v55 = vsel %vm1616_vm2, %v1591_v6, %v4150_v28  ;;  %v4174_v33 = vunpack.i.l.bf16 %v5445_v10  ;;  %v4175_v40 = vunpack.i.h.bf16 %v5445_v10  ;;  %v5507_v61 = vpop.f32.mrf.mxu1  ;;  %v5525_v28 = vld [vmem:[#allocation9 + $0x70] sm:$0xff] }
 0x158   : > { %v1656_v18 = vsel %vm1649_vm3, %v1623_v11, %v4154_v13  ;;  %v1657_v41 = vsel %vm1649_vm3, %v1624_v55, %v4155_v17  ;;  %v5517_v13 = vpack.i.bf16 %v584_v54, %v5344_v39  ;;  %v4184_v10 = vunpack.i.l.bf16 %v5409_v29  ;;  %v363_v11 = vld [vmem:[%s4904_s28 + $0xe8] sm:$0xff]  ;;  %2715 = vmatpush.msra.mxu2 %v5525_v28 }
 0x159   : > { %1963 = vmatmul.f32.gmra.mxu0 %v1787_v15  ;;  %v1689_v27 = vsel %vm1682_vm4, %v1656_v18, %v4159_v32  ;;  %v1690_v8 = vsel %vm1682_vm4, %v1657_v41, %v4160_v56  ;;  %v5530_v15 = vld [vmem:[#allocation9 + $0x68] sm:$0xff]  ;;  %396 = vst.msk [vmem:[#allocation2 + $0x171] sm:$0xff] %vm278_vm0, %v363_v11  ;;  %v2608_v11 = vld [vmem:[#allocation9 + $0x150] sm:$0xff] }
 0x15a   : > { %4372 = vrot.lane.b32.xlu1 %v5443_v4, %s4757_s9  ;;  %v585_v18 = vld [vmem:[#allocation2 + $0x152] sm:$0xff]  ;;  %2716 = vmatpush.msra.mxu2 %v5530_v15 }
 0x15b   : > { %4377 = vrot.lane.b32.xlu2 %v5451_v57, %s4760_s15  ;;  %v5560_v41 = vpack.i.bf16 %v585_v18, %v5383_v24 }
 0x15c   : > { %v4163_v20 = vpop.permute.xlu1 %4162  ;;  %4397 = vrot.lane.b32.xlu0 %v4396_v16, %s4756_s11  ;;  %v649_v16 = vld [vmem:[#allocation2 + $0x159] sm:$0xff] }
 0x15d   : > { %v4164_v25 = vunpack.i.l.bf16 %v4163_v20  ;;  %v5477_v26 = vpop.permute.xlu2 %4212  ;;  %v4165_v44 = vunpack.i.h.bf16 %v4163_v20  ;;  %3906 = vmatmul.msk.f32.gmra.mxu1 %vm278_vm0, %v5429_v62  ;;  %v643_v62 = vld [vmem:[#allocation2 + $0x111] sm:$0xff] }
 0x15e   : > { %v5483_v37 = vpop.permute.xlu0 %4187  ;;  %v5543_v20 = vld [vmem:[#allocation9 + $0x60] sm:$0xff] }
 0x15f   : > { %v1722_v45 = vsel %vm1715_vm5, %v1689_v27, %v4164_v25  ;;  %v1723_v30 = vsel %vm1715_vm5, %v1690_v8, %v4165_v44  ;;  %v4189_v39 = vunpack.i.l.bf16 %v5483_v37  ;;  %2717 = vmatpush.msra.mxu2 %v5543_v20  ;;  %v5555_v56 = vpop.f32.mrf.mxu1  ;;  %v4185_v27 = vunpack.i.h.bf16 %v5409_v29  ;;  %v5570_v29 = vld [vmem:[#allocation9 + $0x48] sm:$0xff] }
 0x160   : > { %v1755_v31 = vsel %vm1748_vm6, %v1722_v45, %v4169_v21  ;;  %v1756_v5 = vsel %vm1748_vm6, %v1723_v30, %v4170_v38  ;;  %v5545_v21 = vpack.i.bf16 %v649_v16, %v643_v62  ;;  %v5565_v45 = vld [vmem:[#allocation9 + $0x50] sm:$0xff]  ;;  %v4190_v24 = vunpack.i.h.bf16 %v5483_v37  ;;  %v5583_v37 = vld [vmem:[#allocation9 + $0x40] sm:$0xff] }
 0x161   : > { %v1788_v50 = vsel %vm1781_vm7, %v1755_v31, %v4174_v33  ;;  %v1789_v58 = vsel %vm1781_vm7, %v1756_v5, %v4175_v40  ;;  %v2609_v5 = vld [vmem:[#allocation9 + $0x158] sm:$0xff]  ;;  %v4214_v62 = vunpack.i.l.bf16 %v5477_v26  ;;  %v5597_v16 = vld [vmem:[#allocation9 + $0x30] sm:$0xff] }
 0x162   : > { %4387 = vrot.lane.b32.xlu1 %v4386_v34, %s4754_s24  ;;  %1966 = vmatmul.f32.gmra.mxu0 %v1788_v50  ;;  %v2611_v50 = vld [vmem:[#allocation9 + $0x168] sm:$0xff] }
 0x163   : > { %4392 = vrot.lane.b32.xlu2 %v4391_v53, %s4755_s29  ;;  %v2612_v53 = vld [vmem:[#allocation9 + $0x170] sm:$0xff] }
 0x164   : > { %v4178_v60 = vpop.permute.xlu1 %4177  ;;  %4412 = vrot.lane.b32.xlu0 %v5492_v46, %s4760_s15  ;;  %2941 = vmatpush.msrb.mxu1 %v2612_v53 }
 0x165   : > { %v4179_v36 = vunpack.i.l.bf16 %v4178_v60  ;;  %v5503_v51 = vpop.permute.xlu2 %4227  ;;  %v4180_v6 = vunpack.i.h.bf16 %v4178_v60  ;;  %3907 = vmatmul.msk.f32.gmra.mxu1 %vm278_vm0, %v584_v54  ;;  %v2610_v54 = vld [vmem:[#allocation9 + $0x160] sm:$0xff] }
 0x166   : > { %v5513_v7 = vpop.permute.xlu0 %4202  ;;  %2942 = vmatpush.msrb.mxu1 %v2611_v50  ;;  %v2606_v50 = vld [vmem:[#allocation9 + $0x140] sm:$0xff] }
 0x167   : > { %v1592_v2 = vsel %vm278_vm0, %v5145_v48, %v4179_v36  ;;  %v1593_v44 = vsel %vm278_vm0, %v5147_v49, %v4180_v6  ;;  %v4204_v31 = vunpack.i.l.bf16 %v5513_v7  ;;  %v5588_v36 = vld [vmem:[#allocation9 + $0x38] sm:$0xff]  ;;  %v5606_v6 = vld [vmem:[#allocation9 + $0x28] sm:$0xff] }
 0x168   : > { %v1625_v48 = vsel %vm1616_vm2, %v1592_v2, %v4184_v10  ;;  %v1626_v49 = vsel %vm1616_vm2, %v1593_v44, %v4185_v27  ;;  %2943 = vmatpush.msrb.mxu1 %v2610_v54  ;;  %v4200_v2 = vunpack.i.h.bf16 %v5439_v3  ;;  %v4205_v3 = vunpack.i.h.bf16 %v5513_v7  ;;  %v618_v27 = vld [vmem:[#allocation2 + $0x168] sm:$0xff] }
 0x169   : > { %v1658_v33 = vsel %vm1649_vm3, %v1625_v48, %v4189_v39  ;;  %v1659_v10 = vsel %vm1649_vm3, %v1626_v49, %v4190_v24  ;;  %v364_v48 = vld [vmem:[%s4904_s28 + $0xf0] sm:$0xff]  ;;  %v4215_v24 = vunpack.i.h.bf16 %v5477_v26  ;;  %v5646_v26 = vld [vmem:[#allocation9 + $0x18] sm:$0xff] }
 0x16a   : > { %4402 = vrot.lane.b32.xlu1 %v5510_v43, %s4759_s13  ;;  %1969 = vmatmul.f32.gmra.mxu0 %v1789_v58  ;;  %397 = vst.msk [vmem:[#allocation2 + $0x181] sm:$0xff] %vm278_vm0, %v364_v48  ;;  %v5657_v48 = vld [vmem:[#allocation9 + $0x8] sm:$0xff] }
 0x16b   : > { %4407 = vrot.lane.b32.xlu2 %v5517_v13, %s4757_s9  ;;  %2944 = vmatpush.msrb.mxu1 %v2609_v5 }
 0x16c   : > { %v4193_v32 = vpop.permute.xlu1 %4192  ;;  %4427 = vrot.lane.b32.xlu0 %v5443_v4, %s4755_s29  ;;  %v5553_v4 = vld [vmem:[#allocation9 + $0x58] sm:$0xff] }
 0x16d   : > { %v4194_v17 = vunpack.i.l.bf16 %v4193_v32  ;;  %v5540_v55 = vpop.permute.xlu2 %4242  ;;  %2718 = vmatpush.msra.mxu2 %v5553_v4  ;;  %v4195_v38 = vunpack.i.h.bf16 %v4193_v32  ;;  %3908 = vmatmul.msk.f32.gmra.mxu1 %vm278_vm0, %v585_v18  ;;  %v5601_v32 = vpop.f32.mrf.mxu1 }
 0x16e   : > { %v5547_v25 = vpop.permute.xlu0 %4217  ;;  %2945 = vmatpush.msrb.mxu1 %v2608_v11 }
 0x16f   : > { %v1691_v34 = vsel %vm1682_vm4, %v1658_v33, %v4194_v17  ;;  %2719 = vmatpush.msra.mxu2 %v5565_v45  ;;  %v1692_v39 = vsel %vm1682_vm4, %v1659_v10, %v4195_v38  ;;  %v2607_v17 = vld [vmem:[#allocation9 + $0x148] sm:$0xff]  ;;  %v4219_v33 = vunpack.i.l.bf16 %v5547_v25  ;;  %v4220_v10 = vunpack.i.h.bf16 %v5547_v25 }
 0x170   : > { %v1724_v8 = vsel %vm1715_vm5, %v1691_v34, %v4199_v35  ;;  %v1725_v35 = vsel %vm1715_vm5, %v1692_v39, %v4200_v2  ;;  %v5620_v34 = vld [vmem:[#allocation2 + $0x169] sm:$0xff]  ;;  %2946 = vmatpush.msrb.mxu1 %v2607_v17  ;;  %v5651_v2 = vld [vmem:[#allocation9 + $0x10] sm:$0xff] }
 0x171   : > { %2720 = vmatpush.msra.mxu2 %v5570_v29  ;;  %v5641_v54 = vpack.i.bf16 %v5620_v34, %v5340_v14  ;;  %v2604_v14 = vld [vmem:[#allocation9 + $0x130] sm:$0xff] }
 0x172   : > { %4417 = vrot.lane.b32.xlu1 %v5545_v21, %s4758_s12  ;;  %2947 = vmatpush.msrb.mxu1 %v2606_v50  ;;  %v5675_v50 = vld [vmem:[#allocation9] sm:$0xff] }
 0x173   : > { %4422 = vrot.lane.b32.xlu2 %v5393_v9, %s4754_s24  ;;  %v1757_v9 = vsel %vm1748_vm6, %v1724_v8, %v4204_v31  ;;  %2721 = vmatpush.msra.mxu2 %v5583_v37  ;;  %v5625_v31 = vld [vmem:[#allocation9 + $0x20] sm:$0xff]  ;;  %v1758_v8 = vsel %vm1748_vm6, %v1725_v35, %v4205_v3  ;;  %v2603_v3 = vld [vmem:[#allocation9 + $0x128] sm:$0xff] }
 0x174   : > { %v4208_v52 = vpop.permute.xlu1 %4207  ;;  %4442 = vrot.lane.b32.xlu0 %v5560_v41, %s4757_s9 }
 0x175   : > { %v4209_v30 = vunpack.i.l.bf16 %v4208_v52  ;;  %v5580_v60 = vpop.permute.xlu2 %4257  ;;  %2722 = vmatpush.msra.mxu2 %v5588_v36  ;;  %v4210_v18 = vunpack.i.h.bf16 %v4208_v52  ;;  %v4229_v52 = vunpack.i.l.bf16 %v5503_v51  ;;  %v5663_v17 = vpop.f32.mrf.mxu1 }
 0x176   : > { %v5586_v40 = vpop.permute.xlu0 %4232 }
 0x177   : > { %v1790_v58 = vsel %vm1781_vm7, %v1757_v9, %v4209_v30  ;;  %2723 = vmatpush.msra.mxu2 %v5597_v16  ;;  %v1791_v30 = vsel %vm1781_vm7, %v1758_v8, %v4210_v18  ;;  %v2605_v9 = vld [vmem:[#allocation9 + $0x138] sm:$0xff] }
 0x178   : > { %1972 = vmatmul.f32.gmra.mxu0 %v1790_v58  ;;  %2948 = vmatpush.msrb.mxu1 %v2605_v9  ;;  %v4583_v58 = vld [vmem:[#allocation2 + $0x80] sm:$0xff]  ;;  %v2601_v9 = vld [vmem:[#allocation9 + $0x118] sm:$0xff] }
 0x179   : > { %2724 = vmatpush.msra.mxu2 %v5606_v6  ;;  %v1595_v11 = vsel %vm278_vm0, %v4583_v58, %v4215_v24  ;;  %v2602_v24 = vld [vmem:[#allocation9 + $0x120] sm:$0xff] }
 0x17a   : > { %4432 = vrot.lane.b32.xlu1 %v5451_v57, %s4756_s11  ;;  %v1594_v57 = vsel %vm278_vm0, %v5165_v59, %v4214_v62  ;;  %v5630_v59 = vpack.i.bf16 %v618_v27, %v5611_v23  ;;  %v4234_v62 = vunpack.i.l.bf16 %v5586_v40  ;;  %2949 = vmatpush.msrb.mxu1 %v2604_v14  ;;  %v1628_v35 = vsel %vm1616_vm2, %v1595_v11, %v4220_v10  ;;  %v4584_v58 = vld [vmem:[#allocation3] sm:$0xff] }
 0x17b   : > { %4437 = vrot.lane.b32.xlu2 %v5424_v47, %s4759_s13  ;;  %v1627_v38 = vsel %vm1616_vm2, %v1594_v57, %v4219_v33  ;;  %2725 = vmatpush.msra.mxu2 %v5625_v31  ;;  %v4244_v33 = vunpack.i.l.bf16 %v5540_v55  ;;  %v4230_v27 = vunpack.i.h.bf16 %v5503_v51 }
 0x17c   : > { %v4223_v7 = vpop.permute.xlu1 %4222  ;;  %4457 = vrot.lane.b32.xlu0 %v5510_v43, %s4754_s24  ;;  %v5634_v43 = vld [vmem:[#allocation2 + $0x15a] sm:$0xff]  ;;  %2950 = vmatpush.msrb.mxu1 %v2603_v3 }
 0x17d   : > { %v4224_v44 = vunpack.i.l.bf16 %v4223_v7  ;;  %v5622_v53 = vpop.permute.xlu2 %4272  ;;  %3909 = vmatmul.msk.f32.gmra.mxu1 %vm278_vm0, %v5634_v43  ;;  %2726 = vmatpush.msra.mxu2 %v5646_v26  ;;  %v4225_v39 = vunpack.i.h.bf16 %v4223_v7  ;;  %v5670_v7 = vld [vmem:[#allocation2 + $0x171] sm:$0xff] }
 0x17e   : > { %v5632_v49 = vpop.permute.xlu0 %4247  ;;  %2951 = vmatpush.msrb.mxu1 %v2602_v24  ;;  %v4486_v14 = vpack.i.bf16 %v5670_v7, %v5467_v19  ;;  %v4245_v19 = vunpack.i.h.bf16 %v5540_v55  ;;  %v5709_v55 = vpack.i.bf16 %v5634_v43, %v5416_v42  ;;  %v365_v43 = vld [vmem:[%s4904_s28 + $0xf8] sm:$0xff]  ;;  %s7002_s28 = scalar_lea.vmem [#allocation10], %s3880_s10  ;;  %s3922_s10 = sshll.u32 %s4814_s22, 8 }
 0x17f   : > { %v1660_v5 = vsel %vm1649_vm3, %v1627_v38, %v4224_v44  ;;  %2727 = vmatpush.msra.mxu2 %v5651_v2  ;;  %v1661_v8 = vsel %vm1649_vm3, %v1628_v35, %v4225_v39  ;;  %v4249_v3 = vunpack.i.l.bf16 %v5632_v49  ;;  %398 = vst.msk [vmem:[#allocation2 + $0x189] sm:$0xff] %vm278_vm0, %v365_v43  ;;  %v4275_v43 = vunpack.i.h.bf16 %v5622_v53  ;;  %s3764_s22 = scalar_lea.sflag [#allocation6], %s4898_s8 }
 0x180   : > { %1975 = vmatmul.f32.gmra.mxu0 %v1791_v30  ;;  %v1693_v25 = vsel %vm1682_vm4, %v1660_v5, %v4229_v52  ;;  %v5681_v30 = vld [vmem:[#allocation2 + $0x16a] sm:$0xff]  ;;  %v4235_v5 = vunpack.i.h.bf16 %v5586_v40  ;;  %2952 = vmatpush.msrb.mxu1 %v2601_v9  ;;  %v1694_v11 = vsel %vm1682_vm4, %v1661_v8, %v4230_v27  ;;  %v2599_v40 = vld [vmem:[#allocation9 + $0x108] sm:$0xff]  ;;  %v4250_v9 = vunpack.i.h.bf16 %v5632_v49 }
 0x181   : > { %2728 = vmatpush.msra.mxu2 %v5657_v48  ;;  %v1726_v38 = vsel %vm1715_vm5, %v1693_v25, %v4234_v62  ;;  %v2600_v62 = vld [vmem:[#allocation9 + $0x110] sm:$0xff]  ;;  %v411_v25 = vld [vmem:[#allocation2 + $0x90] sm:$0xff] }
 0x182   : > { %4447 = vrot.lane.b32.xlu1 %v5630_v59, %s4760_s15  ;;  %2953 = vmatpush.msrb.mxu1 %v2600_v62  ;;  %v1727_v35 = vsel %vm1715_vm5, %v1694_v11, %v4235_v5  ;;  %v619_v27 = vld [vmem:[#allocation2 + $0x170] sm:$0xff]  ;;  %v1596_v5 = vsel %vm278_vm0, %v411_v25, %v4249_v3  ;;  %v412_v11 = vld [vmem:[#allocation2 + $0x98] sm:$0xff] }
 0x183   : > { %4452 = vrot.lane.b32.xlu2 %v5641_v54, %s4758_s12  ;;  %2729 = vmatpush.msra.mxu2 %v5675_v50  ;;  %v2598_v8 = vld [vmem:[#allocation9 + $0x100] sm:$0xff]  ;;  %v1597_v3 = vsel %vm278_vm0, %v412_v11, %v4250_v9  ;;  %v2342_v9 = vld [vmem:[#allocation3 + $0xa] sm:$0xff] }
 0x184   : > { %v4238_v18 = vpop.permute.xlu1 %4237  ;;  %4472 = vrot.lane.b32.xlu0 %v5545_v21, %s4759_s13  ;;  %2730 = vmatmul.f32.vlgmr.msra.gmra.mxu2 %v4584_v58 }
 0x185   : > { %v4239_v57 = vunpack.i.l.bf16 %v4238_v18  ;;  %v5672_v44 = vpop.permute.xlu2 %4287  ;;  %3910 = vmatmul.msk.f32.gmra.mxu1 %vm278_vm0, %v5681_v30  ;;  %v4240_v39 = vunpack.i.h.bf16 %v4238_v18  ;;  %v5700_v18 = vld [vmem:[#allocation2 + $0x128] sm:$0xff] }
 0x186   : > { %v5679_v52 = vpop.permute.xlu0 %4262  ;;  %2954 = vmatpush.msrb.mxu1 %v2599_v40  ;;  %v4260_v40 = vunpack.i.h.bf16 %v5580_v60 }
 0x187   : > { %v1759_v51 = vsel %vm1748_vm6, %v1726_v38, %v4239_v57  ;;  %v1760_v57 = vsel %vm1748_vm6, %v1727_v35, %v4240_v39  ;;  %v4264_v49 = vunpack.i.l.bf16 %v5679_v52 }
 0x188   : > { %v1792_v10 = vsel %vm1781_vm7, %v1759_v51, %v4244_v33  ;;  %2955 = vmatpush.msrb.mxu1 %v2598_v8  ;;  %v2341_v51 = vld [vmem:[#allocation3 + $0x2] sm:$0xff]  ;;  %v1793_v42 = vsel %vm1781_vm7, %v1760_v57, %v4245_v19 }
 0x189   : > { %1978 = vmatmul.f32.gmra.mxu0 %v1792_v10  ;;  %v4259_v10 = vunpack.i.l.bf16 %v5580_v60  ;;  %v4265_v60 = vunpack.i.h.bf16 %v5679_v52 }
 0x18a   : > { %4462 = vrot.lane.b32.xlu1 %v5517_v13, %s4755_s29 }
 0x18b   : > { %4467 = vrot.lane.b32.xlu2 %v5492_v46, %s4756_s11  ;;  %v5705_v46 = vpop.f32.mrf.mxu1 }
 0x18c   : > { %v4253_v33 = vpop.permute.xlu1 %4252  ;;  %4487 = vrot.lane.b32.xlu0 %v4486_v14, %s4758_s12  ;;  %v5715_v14 = vpack.i.bf16 %v619_v27, %v5700_v18  ;;  %2733 = vmatmul.f32.gmra.mxu2 %v4584_v58 }
 0x18d   : > { %v4254_v13 = vunpack.i.l.bf16 %v4253_v33  ;;  %v5703_v24 = vpop.permute.xlu2 %4302  ;;  %2956 = vmatmul.f32.vlgmr.msrb.gmra.mxu1 %v2341_v51  ;;  %v4255_v39 = vunpack.i.h.bf16 %v4253_v33  ;;  %v4274_v33 = vunpack.i.l.bf16 %v5622_v53 }
 0x18e   : > { %v4278_v38 = vpop.permute.xlu0 %4277 }
 0x18f   : > { %v1629_v62 = vsel %vm1616_vm2, %v1596_v5, %v4254_v13  ;;  %v1630_v58 = vsel %vm1616_vm2, %v1597_v3, %v4255_v39  ;;  %v4279_v27 = vunpack.i.l.bf16 %v4278_v38  ;;  %v5733_v13 = vld [vmem:[#allocation2 + $0x180] sm:$0xff] }
 0x190   : > { %v1662_v25 = vsel %vm1649_vm3, %v1629_v62, %v4259_v10  ;;  %v1663_v5 = vsel %vm1649_vm3, %v1630_v58, %v4260_v40  ;;  %v4516_v62 = vpack.i.bf16 %v5733_v13, %v5405_v12  ;;  %v581_v40 = vld [vmem:[#allocation2 + $0x122] sm:$0xff]  ;;  %v4280_v12 = vunpack.i.h.bf16 %v4278_v38 }
 0x191   : > { %1981 = vmatmul.f32.gmra.mxu0 %v1793_v42  ;;  %v1695_v8 = vsel %vm1682_vm4, %v1662_v25, %v4264_v49  ;;  %v1696_v42 = vsel %vm1682_vm4, %v1663_v5, %v4265_v60 }
 0x192   : > { %4477 = vrot.lane.b32.xlu1 %v5709_v55, %s4757_s9 }
 0x193   : > { %4482 = vrot.lane.b32.xlu2 %v5715_v14, %s4760_s15 }
 0x194   : > { %v4268_v19 = vpop.permute.xlu1 %4267  ;;  %4502 = vrot.lane.b32.xlu0 %v5630_v59, %s4756_s11  ;;  %v5743_v59 = vpop.f32.mrf.mxu1 }
 0x195   : > { %v4269_v35 = vunpack.i.l.bf16 %v4268_v19  ;;  %v5735_v57 = vpop.permute.xlu2 %4317  ;;  %v4270_v10 = vunpack.i.h.bf16 %v4268_v19  ;;  %2959 = vmatmul.f32.gmra.mxu1 %v2342_v9  ;;  %v413_v19 = vld [vmem:[#allocation2 + $0xa8] sm:$0xff] }
 0x196   : > { %v5739_v51 = vpop.permute.xlu0 %4292 }
 0x197   : > { %v1728_v11 = vsel %vm1715_vm5, %v1695_v8, %v4269_v35  ;;  %v1729_v49 = vsel %vm1715_vm5, %v1696_v42, %v4270_v10  ;;  %v4289_v35 = vunpack.i.l.bf16 %v5672_v44  ;;  %v4294_v38 = vunpack.i.l.bf16 %v5739_v51  ;;  %v5771_v8 = vld [vmem:[#allocation2 + $0x181] sm:$0xff] }
 0x198   : > { %v1761_v39 = vsel %vm1748_vm6, %v1728_v11, %v4274_v33  ;;  %v1762_v53 = vsel %vm1748_vm6, %v1729_v49, %v4275_v43  ;;  %v4521_v42 = vpack.i.bf16 %v5771_v8, %v5374_v0 }
 0x199   : > { %v1794_v52 = vsel %vm1781_vm7, %v1761_v39, %v4279_v27  ;;  %v5780_v39 = vld [vmem:[%s7341_s2] ss:$0 sm:$0xff] }
 0x19a   : > { %4492 = vrot.lane.b32.xlu1 %v5424_v47, %s4754_s24  ;;  %1984 = vmatmul.f32.gmra.mxu0 %v1794_v52  ;;  %v4511_v47 = vpack.i.bf16 %v5681_v30, %v581_v40  ;;  %v414_v52 = vld [vmem:[#allocation2 + $0xb0] sm:$0xff] }
 0x19b   : > { %4497 = vrot.lane.b32.xlu2 %v5560_v41, %s4755_s29  ;;  %v1795_v41 = vsel %vm1781_vm7, %v1762_v53, %v4280_v12 }
 0x19c   : > { %v4283_v3 = vpop.permute.xlu1 %4282  ;;  %4517 = vrot.lane.b32.xlu0 %v4516_v62, %s4760_s15  ;;  %v5766_v60 = vpop.f32.mrf.mxu1 }
 0x19d   : > { %v4284_v25 = vunpack.i.l.bf16 %v4283_v3  ;;  %v5757_v58 = vpop.permute.xlu2 %4332  ;;  %v4285_v10 = vunpack.i.h.bf16 %v4283_v3  ;;  %v4290_v3 = vunpack.i.h.bf16 %v5672_v44 }
 0x19e   : > { %v5760_v33 = vpop.permute.xlu0 %4307 }
 0x19f   : > { %v1598_v27 = vsel %vm278_vm0, %v413_v19, %v4284_v25  ;;  %v1599_v19 = vsel %vm278_vm0, %v414_v52, %v4285_v10  ;;  %v4309_v0 = vunpack.i.l.bf16 %v5760_v33 }
 0x1a0   : > { %v1631_v9 = vsel %vm1616_vm2, %v1598_v27, %v4289_v35 }
 0x1a1   : > { %v1664_v49 = vsel %vm1649_vm3, %v1631_v9, %v4294_v38  ;;  %v550_v9 = vld [vmem:[#allocation2 + $0x129] sm:$0xff] }
 0x1a2   : > { %4507 = vrot.lane.b32.xlu1 %v5641_v54, %s4759_s13  ;;  %1987 = vmatmul.f32.gmra.mxu0 %v1795_v41  ;;  %v5782_v54 = vld [vmem:[#allocation2 + $0x172] sm:$0xff] }
 0x1a3   : > { %4512 = vrot.lane.b32.xlu2 %v4511_v47, %s4757_s9  ;;  %v4546_v25 = vpack.i.bf16 %v5782_v54, %v5474_v22  ;;  %v4295_v47 = vunpack.i.h.bf16 %v5739_v51  ;;  %v1632_v22 = vsel %vm1616_vm2, %v1599_v19, %v4290_v3  ;;  %v4319_v3 = vunpack.i.l.bf16 %v5735_v57 }
 0x1a4   : > { %v4298_v5 = vpop.permute.xlu1 %4297  ;;  %4532 = vrot.lane.b32.xlu0 %v5709_v55, %s4755_s29  ;;  %v4304_v55 = vunpack.i.l.bf16 %v5703_v24  ;;  %v5805_v27 = vpop.f32.mrf.mxu1 }
 0x1a5   : > { %v4299_v11 = vunpack.i.l.bf16 %v4298_v5  ;;  %v5784_v62 = vpop.permute.xlu2 %4347  ;;  %v4300_v41 = vunpack.i.h.bf16 %v4298_v5  ;;  %v4541_v5 = vpack.i.bf16 %v5670_v7, %v550_v9 }
 0x1a6   : > { %v5788_v43 = vpop.permute.xlu0 %4322 }
 0x1a7   : > { %v1697_v40 = vsel %vm1682_vm4, %v1664_v49, %v4299_v11 }
 0x1a8   : > { %v1949_v12 = vpop.f32.mrf.mxu0  ;;  %v1730_v44 = vsel %vm1715_vm5, %v1697_v40, %v4304_v55 }
 0x1a9   : > { %v1950_v53 = vadd.f32 %v5780_v39, %v1949_v12  ;;  %v4561_v12 = vpack.i.bf16 %v5670_v7, %v5620_v34 }
 0x1aa   : > { %4522 = vrot.lane.b32.xlu1 %v4521_v42, %s4758_s12  ;;  %v1665_v42 = vsel %vm1649_vm3, %v1632_v22, %v4295_v47 }
 0x1ab   : > { %v2063_v35 = vadd.f32 %v5507_v61, %v1950_v53  ;;  %4527 = vrot.lane.b32.xlu2 %v5545_v21, %s4754_s24  ;;  %v1763_v61 = vsel %vm1748_vm6, %v1730_v44, %v4309_v0  ;;  %v4305_v21 = vunpack.i.h.bf16 %v5703_v24  ;;  %v1698_v55 = vsel %vm1682_vm4, %v1665_v42, %v4300_v41  ;;  %v5829_v44 = vld [vmem:[#allocation2 + $0x188] sm:$0xff] }
 0x1ac   : > { %v4313_v38 = vpop.permute.xlu1 %4312  ;;  %4547 = vrot.lane.b32.xlu0 %v4546_v25, %s4757_s9  ;;  %v415_v25 = vld [vmem:[#allocation2 + $0xc0] sm:$0xff]  ;;  %v4310_v53 = vunpack.i.h.bf16 %v5760_v33  ;;  %v4324_v0 = vunpack.i.l.bf16 %v5788_v43  ;;  %v5836_v9 = vpop.f32.mrf.mxu1 }
 0x1ad   : > { %v2158_v10 = vmax.f32 %v2063_v35, 0.0  ;;  %v4314_v11 = vunpack.i.l.bf16 %v4313_v38  ;;  %v5809_v52 = vpop.permute.xlu2 %4362  ;;  %v4315_v24 = vunpack.i.h.bf16 %v4313_v38  ;;  %v1731_v35 = vsel %vm1715_vm5, %v1698_v55, %v4305_v21  ;;  %v647_v33 = vld [vmem:[#allocation2 + $0x141] sm:$0xff] }
 0x1ae   : > { %v5812_v51 = vpop.permute.xlu0 %4337  ;;  %v1600_v34 = vsel %vm278_vm0, %v415_v25, %v4319_v3  ;;  %v416_v21 = vld [vmem:[#allocation2 + $0xc8] sm:$0xff] }
 0x1af   : > { %2245 = vst [vmem:[#allocation3 + $0x19] sm:$0xff] %v2158_v10  ;;  %v1796_v49 = vsel %vm1781_vm7, %v1763_v61, %v4314_v11  ;;  %v1764_v11 = vsel %vm1748_vm6, %v1731_v35, %v4310_v53  ;;  %v4551_v61 = vpack.i.bf16 %v5829_v44, %v5437_v63 }
 0x1b0   : > { %v1952_v40 = vpop.f32.mrf.mxu0  ;;  %1990 = vmatmul.f32.gmra.mxu0 %v1796_v49  ;;  %v1633_v49 = vsel %vm1616_vm2, %v1600_v34, %v4324_v0  ;;  %v1797_v55 = vsel %vm1781_vm7, %v1764_v11, %v4315_v24  ;;  %v4349_v0 = vunpack.i.l.bf16 %v5784_v62  ;;  %v4571_v11 = vpack.i.bf16 %v5829_v44, %v5733_v13 }
 0x1b1   : > { %v1953_v19 = vadd.f32 %v5780_v39, %v1952_v40 }
 0x1b2   : > { %4537 = vrot.lane.b32.xlu1 %v5715_v14, %s4756_s11  ;;  %v558_v14 = vld [vmem:[#allocation2 + $0x189] sm:$0xff] }
 0x1b3   : > { %v2066_v47 = vadd.f32 %v5555_v56, %v1953_v19  ;;  %4542 = vrot.lane.b32.xlu2 %v4541_v5, %s4759_s13  ;;  %v4320_v56 = vunpack.i.h.bf16 %v5735_v57  ;;  %v4334_v5 = vunpack.i.l.bf16 %v5757_v58  ;;  %v4556_v3 = vpack.i.bf16 %v558_v14, %v647_v33 }
 0x1b4   : > { %v4328_v7 = vpop.permute.xlu1 %4327  ;;  %4562 = vrot.lane.b32.xlu0 %v4561_v12, %s4754_s24  ;;  %v4576_v40 = vpack.i.bf16 %v558_v14, %v5771_v8  ;;  %v4325_v12 = vunpack.i.h.bf16 %v5788_v43  ;;  %v4339_v19 = vunpack.i.l.bf16 %v5812_v51  ;;  %v4335_v43 = vunpack.i.h.bf16 %v5757_v58 }
 0x1b5   : > { %v2159_v22 = vmax.f32 %v2066_v47, 0.0  ;;  %v4329_v41 = vunpack.i.l.bf16 %v4328_v7  ;;  %v5834_v38 = vpop.permute.xlu2 %4377  ;;  %v1601_v63 = vsel %vm278_vm0, %v416_v21, %v4320_v56  ;;  %v4330_v25 = vunpack.i.h.bf16 %v4328_v7 }
 0x1b6   : > { %v2279_v10 = vld [vmem:[#allocation3 + $0x18] sm:$0xff]  ;;  %v5842_v42 = vpop.permute.xlu0 %4352  ;;  %v1634_v8 = vsel %vm1616_vm2, %v1601_v63, %v4325_v12  ;;  %v4566_v56 = vpack.i.bf16 %v5782_v54, %v5681_v30  ;;  %v4340_v21 = vunpack.i.h.bf16 %v5812_v51  ;;  %v4350_v51 = vunpack.i.h.bf16 %v5784_v62 }
 0x1b7   : > { %2246 = vst [vmem:[#allocation3 + $0x21] sm:$0xff] %v2159_v22  ;;  %2736 = vmatmul.f32.gmra.mxu2 %v2279_v10  ;;  %v1666_v57 = vsel %vm1649_vm3, %v1633_v49, %v4329_v41  ;;  %v1667_v7 = vsel %vm1649_vm3, %v1634_v8, %v4330_v25  ;;  %v4354_v13 = vunpack.i.l.bf16 %v5842_v42 }
 0x1b8   : > { %1993 = vmatmul.f32.gmra.mxu0 %v1797_v55  ;;  %v1699_v53 = vsel %vm1682_vm4, %v1666_v57, %v4334_v5  ;;  %v1700_v30 = vsel %vm1682_vm4, %v1667_v7, %v4335_v43  ;;  %v654_v55 = vld [vmem:[#allocation2 + $0x199] sm:$0xff]  ;;  %v4355_v57 = vunpack.i.h.bf16 %v5842_v42  ;;  %v4365_v43 = vunpack.i.h.bf16 %v5809_v52 }
 0x1b9   : > { %v1732_v14 = vsel %vm1715_vm5, %v1699_v53, %v4339_v19 }
 0x1ba   : > { %4552 = vrot.lane.b32.xlu1 %v4551_v61, %s4760_s15  ;;  %v5874_v61 = vpop.f32.mrf.mxu1  ;;  %v1608_v62 = vsel %vm278_vm0, %v5611_v23, %v4355_v57  ;;  %v655_v23 = vld [vmem:[#allocation2 + $0x1a1] sm:$0xff] }
 0x1bb   : > { %4557 = vrot.lane.b32.xlu2 %v4556_v3, %s4758_s12 }
 0x1bc   : > { %v4343_v24 = vpop.permute.xlu1 %4342  ;;  %4577 = vrot.lane.b32.xlu0 %v4576_v40, %s4759_s13  ;;  %v1733_v40 = vsel %vm1715_vm5, %v1700_v30, %v4340_v21 }
 0x1bd   : > { %v4344_v47 = vunpack.i.l.bf16 %v4343_v24  ;;  %v1955_v35 = vpop.f32.mrf.mxu0  ;;  %v5859_v34 = vpop.permute.xlu2 %4392  ;;  %v4345_v54 = vunpack.i.h.bf16 %v4343_v24 }
 0x1be   : > { %v1956_v33 = vadd.f32 %v5780_v39, %v1955_v35  ;;  %v5863_v22 = vld [vmem:[#allocation3 + $0x20] sm:$0xff]  ;;  %v5868_v10 = vpop.permute.xlu0 %4367  ;;  %v5896_v35 = vld [vmem:[#allocation2 + $0x182] sm:$0xff] }
 0x1bf   : > { %v2343_v41 = vld [vmem:[#allocation3 + $0x1a] sm:$0xff]  ;;  %2739 = vmatmul.f32.gmra.mxu2 %v5863_v22  ;;  %v1765_v58 = vsel %vm1748_vm6, %v1732_v14, %v4344_v47  ;;  %v1766_v19 = vsel %vm1748_vm6, %v1733_v40, %v4345_v54  ;;  %v2344_v24 = vld [vmem:[#allocation3 + $0x22] sm:$0xff]  ;;  %v4364_v47 = vunpack.i.l.bf16 %v5809_v52  ;;  %v4370_v21 = vunpack.i.h.bf16 %v5868_v10 }
 0x1c0   : > { %2962 = vmatmul.f32.gmra.mxu1 %v2343_v41  ;;  %v2069_v49 = vadd.f32 %v5601_v32, %v1956_v33  ;;  %v1798_v5 = vsel %vm1781_vm7, %v1765_v58, %v4349_v0  ;;  %v417_v32 = vld [vmem:[#allocation2 + $0xd8] sm:$0xff]  ;;  %v1799_v14 = vsel %vm1781_vm7, %v1766_v19, %v4350_v51  ;;  %v4369_v52 = vunpack.i.l.bf16 %v5868_v10 }
 0x1c1   : > { %1996 = vmatmul.f32.gmra.mxu0 %v1798_v5  ;;  %v1602_v8 = vsel %vm278_vm0, %v417_v32, %v4354_v13  ;;  %v4380_v54 = vunpack.i.h.bf16 %v5834_v38 }
 0x1c2   : > { %v2160_v3 = vmax.f32 %v2069_v49, 0.0  ;;  %4567 = vrot.lane.b32.xlu1 %v4566_v56, %s4755_s29  ;;  %v622_v56 = vld [vmem:[#allocation2 + $0x198] sm:$0xff]  ;;  %v5902_v58 = vpop.f32.mrf.mxu1 }
 0x1c3   : > { %4572 = vrot.lane.b32.xlu2 %v4571_v11, %s4756_s11  ;;  %s3775_s11 = scalar_lea.hbm %s7344_s5, %s3922_s10 }
 0x1c4   : > { %2247 = vst [vmem:[#allocation3 + $0x31] sm:$0xff] %v2160_v3  ;;  %v4358_v44 = vpop.permute.xlu1 %4357  ;;  %1548 = vrot.lane.b32.xlu0 %v654_v55, %s4758_s12  ;;  %v4379_v55 = vunpack.i.l.bf16 %v5834_v38 }
 0x1c5   : > { %v4360_v12 = vunpack.i.h.bf16 %v4358_v44  ;;  %v4359_v63 = vunpack.i.l.bf16 %v4358_v44  ;;  %v1958_v25 = vpop.f32.mrf.mxu0  ;;  %v5888_v53 = vpop.permute.xlu2 %4407 }
 0x1c6   : > { %v1959_v42 = vadd.f32 %v5780_v39, %v1958_v25  ;;  %v4383_v0 = vpop.permute.xlu0 %4382  ;;  %v5922_v25 = vld [vmem:[#allocation2 + $0x18a] sm:$0xff] }
 0x1c7   : > { %v1635_v7 = vsel %vm1616_vm2, %v1602_v8, %v4359_v63  ;;  %v1641_v33 = vsel %vm1616_vm2, %v1608_v62, %v4360_v12  ;;  %v4385_v57 = vunpack.i.h.bf16 %v4383_v0  ;;  %v4384_v13 = vunpack.i.l.bf16 %v4383_v0  ;;  %v623_v0 = vld [vmem:[#allocation2 + $0x1a0] sm:$0xff] }
 0x1c8   : > { %2965 = vmatmul.f32.gmra.mxu1 %v2344_v24  ;;  %v2072_v41 = vadd.f32 %v5663_v17, %v1959_v42  ;;  %v1668_v49 = vsel %vm1649_vm3, %v1635_v7, %v4364_v47  ;;  %v1674_v5 = vsel %vm1649_vm3, %v1641_v33, %v4365_v43 }
 0x1c9   : > { %1999 = vmatmul.f32.gmra.mxu0 %v1799_v14  ;;  %v1701_v32 = vsel %vm1682_vm4, %v1668_v49, %v4369_v52  ;;  %v1707_v44 = vsel %vm1682_vm4, %v1674_v5, %v4370_v21  ;;  %v4395_v5 = vunpack.i.h.bf16 %v5859_v34 }
 0x1ca   : > { %v2161_v11 = vmax.f32 %v2072_v41, 0.0  ;;  %1292 = vrot.lane.b32.xlu1 %v5896_v35, %s4757_s9  ;;  %v5936_v41 = vpop.f32.mrf.mxu1 }
 0x1cb   : > { %v5910_v17 = vld [vmem:[#allocation3 + $0x30] sm:$0xff]  ;;  %1420 = vrot.lane.b32.xlu2 %v622_v56, %s4760_s15 }
 0x1cc   : > { %2248 = vst [vmem:[#allocation3 + $0x39] sm:$0xff] %v2161_v11  ;;  %v4373_v30 = vpop.permute.xlu1 %4372  ;;  %2742 = vmatmul.f32.gmra.mxu2 %v5910_v17  ;;  %1550 = vrot.lane.b32.xlu0 %v655_v23, %s4758_s12  ;;  %v418_v11 = vld [vmem:[#allocation2 + $0xe0] sm:$0xff]  ;;  %s3778_s12 = sshll.u32 %s3775_s11, 4  ;;  %s3779_s12 = int_to_ptr.hbm [resolvable:$true] %s3778_s12 }
 0x1cd   : > { %v4375_v10 = vunpack.i.h.bf16 %v4373_v30  ;;  %v4374_v3 = vunpack.i.l.bf16 %v4373_v30  ;;  %v5917_v51 = vpop.permute.xlu2 %4422  ;;  %v4394_v30 = vunpack.i.l.bf16 %v5859_v34  ;;  %s4691_s13 = sshra.s32 %s3779_s12, 4  ;;  %s4692_s13 = int_to_ptr.hbm [resolvable:$true] %s4691_s13 }
 0x1ce   : > { %v1961_v40 = vpop.f32.mrf.mxu0  ;;  %v4398_v12 = vpop.permute.xlu0 %4397  ;;  %p4698_p11 = scmp.lt.s32.totalorder %s4692_s13, %s7344_s5 }
 0x1cf   : > { %v1962_v63 = vadd.f32 %v5780_v39, %v1961_v40  ;;  %v1734_v38 = vsel %vm1715_vm5, %v1701_v32, %v4374_v3  ;;  %v1740_v19 = vsel %vm1715_vm5, %v1707_v44, %v4375_v10  ;;  %v4399_v3 = vunpack.i.l.bf16 %v4398_v12 }
 0x1d0   : > { %v1767_v42 = vsel %vm1748_vm6, %v1734_v38, %v4379_v55  ;;  %v1773_v24 = vsel %vm1748_vm6, %v1740_v19, %v4380_v54  ;;  %v4409_v38 = vunpack.i.l.bf16 %v5888_v53 }
 0x1d1   : > { %v2075_v62 = vadd.f32 %v5705_v46, %v1962_v63  ;;  %v1800_v8 = vsel %vm1781_vm7, %v1767_v42, %v4384_v13  ;;  %v1806_v43 = vsel %vm1781_vm7, %v1773_v24, %v4385_v57  ;;  %v4410_v63 = vunpack.i.h.bf16 %v5888_v53 }
 0x1d2   : > { %1294 = vrot.lane.b32.xlu1 %v5922_v25, %s4757_s9  ;;  %2002 = vmatmul.f32.gmra.mxu0 %v1800_v8  ;;  %s3776_s9 = sshll.u32 %s7002_s28, 4  ;;  %s3777_s9 = int_to_ptr.vmem [resolvable:$true] %s3776_s9 }
 0x1d3   : > { %v2162_v47 = vmax.f32 %v2075_v62, 0.0  ;;  %2020 = vmatmul.f32.vlgmr.msra.gmra.mxu3 %v1806_v43  ;;  %v5933_v7 = vld [vmem:[#allocation3 + $0x38] sm:$0xff]  ;;  %1422 = vrot.lane.b32.xlu2 %v623_v0, %s4760_s15  ;;  %s4693_s15 = scalar_lea.hbm %s4692_s13, 256 }
 0x1d4   : > { %v2345_v33 = vld [vmem:[#allocation3 + $0x32] sm:$0xff]  ;;  %v4388_v14 = vpop.permute.xlu1 %4387  ;;  %2745 = vmatmul.f32.gmra.mxu2 %v5933_v7  ;;  %3941 = vmatpush.msra.mxu3 %v5505_v1  ;;  %v4400_v1 = vunpack.i.h.bf16 %v4398_v12  ;;  %v2346_v13 = vld [vmem:[#allocation3 + $0x3a] sm:$0xff]  ;;  %p4694_p1 = scmp.ne.s32.totalorder %s4692_s13, %s4693_s15  ;;  %p4699_p2 = scmp.lt.s32.totalorder %s4697_s6, %s4693_s15 }
 0x1d5   : > { %2968 = vmatmul.f32.gmra.mxu1 %v2345_v33  ;;  %2249 = vst [vmem:[#allocation3 + $0x49] sm:$0xff] %v2162_v47  ;;  %v4390_v46 = vunpack.i.h.bf16 %v4388_v14  ;;  %v4389_v56 = vunpack.i.l.bf16 %v4388_v14  ;;  %v5939_v23 = vpop.permute.xlu2 %4437 }
 0x1d6   : > { %v1964_v21 = vpop.f32.mrf.mxu0  ;;  %v4413_v52 = vpop.permute.xlu0 %4412  ;;  %3942 = vmatpush.msra.mxu3 %v5525_v28  ;;  %p4695_p4 = pnand %p4694_p1, %p4865_p3  ;;  %p4700_p9 = por %p4699_p2, %p4698_p11 }
 0x1d7   : > { %v1965_v49 = vadd.f32 %v5780_v39, %v1964_v21  ;;  %v1609_v54 = vsel %vm278_vm0, %v5700_v18, %v4390_v46  ;;  %v1603_v55 = vsel %vm278_vm0, %v418_v11, %v4389_v56  ;;  %v4415_v62 = vunpack.i.h.bf16 %v4413_v52 }
 0x1d8   : > { %3943 = vmatpush.msra.mxu3 %v5530_v15  ;;  %v1636_v28 = vsel %vm1616_vm2, %v1603_v55, %v4394_v30  ;;  %v1642_v32 = vsel %vm1616_vm2, %v1609_v54, %v4395_v5  ;;  %v5958_v15 = vpop.f32.mrf.mxu1  ;;  %v4414_v8 = vunpack.i.l.bf16 %v4413_v52  ;;  %v4425_v30 = vunpack.i.h.bf16 %v5917_v51  ;;  %p4696_p8 = pneg %p4695_p4 }
 0x1d9   : > { %v2078_v10 = vadd.f32 %v5743_v59, %v1965_v49  ;;  %v1669_v12 = vsel %vm1649_vm3, %v1636_v28, %v4399_v3  ;;  %v4424_v54 = vunpack.i.l.bf16 %v5917_v51 }
 0x1da   : > { %3944 = vmatpush.msra.mxu3 %v5543_v20  ;;  %v1675_v20 = vsel %vm1649_vm3, %v1642_v32, %v4400_v1  ;;  %v425_v1 = vld [vmem:[#allocation2 + $0x138] sm:$0xff]  ;;  %p4701_p10 = pnand %p4700_p9, %p4696_p8 }
 0x1db   : > { %v2163_v57 = vmax.f32 %v2078_v10, 0.0  ;;  %v419_v10 = vld [vmem:[#allocation2 + $0xf0] sm:$0xff]  ;;  %v1610_v51 = vsel %vm278_vm0, %v425_v1, %v4425_v30 }
 0x1dc   : > { %v4403_v34 = vpop.permute.xlu1 %4402  ;;  %v5954_v44 = vld [vmem:[#allocation3 + $0x48] sm:$0xff]  ;;  %3945 = vmatpush.msra.mxu3 %v5553_v4  ;;  %v1604_v28 = vsel %vm278_vm0, %v419_v10, %v4424_v54  ;;  %v426_v10 = vld [vmem:[#allocation2 + $0x140] sm:$0xff] }
 0x1dd   : > { %2971 = vmatmul.f32.gmra.mxu1 %v2346_v13  ;;  %2250 = vst [vmem:[#allocation3 + $0x51] sm:$0xff] %v2163_v57  ;;  %v4405_v18 = vunpack.i.h.bf16 %v4403_v34  ;;  %v4404_v40 = vunpack.i.l.bf16 %v4403_v34  ;;  %2748 = vmatmul.f32.gmra.mxu2 %v5954_v44  ;;  %v5966_v42 = vpop.permute.xlu2 %4452 }
 0x1de   : > { %v5960_v59 = vpop.permute.xlu0 %4427  ;;  %3946 = vmatpush.msra.mxu3 %v5565_v45 }
 0x1df   : > { %v1967_v19 = vpop.f32.mrf.mxu0  ;;  %v1702_v24 = vsel %vm1682_vm4, %v1669_v12, %v4404_v40  ;;  %v1708_v4 = vsel %vm1682_vm4, %v1675_v20, %v4405_v18  ;;  %v4430_v57 = vunpack.i.h.bf16 %v5960_v59  ;;  %v4429_v13 = vunpack.i.l.bf16 %v5960_v59 }
 0x1e0   : > { %v1968_v0 = vadd.f32 %v5780_v39, %v1967_v19  ;;  %3947 = vmatpush.msra.mxu3 %v5570_v29  ;;  %v1735_v47 = vsel %vm1715_vm5, %v1702_v24, %v4409_v38  ;;  %v1741_v53 = vsel %vm1715_vm5, %v1708_v4, %v4410_v63  ;;  %v5985_v5 = vpop.f32.mrf.mxu1  ;;  %v4440_v59 = vunpack.i.h.bf16 %v5939_v23 }
 0x1e1   : > { %v1768_v29 = vsel %vm1748_vm6, %v1735_v47, %v4414_v8  ;;  %v4439_v63 = vunpack.i.l.bf16 %v5939_v23 }
 0x1e2   : > { %v2081_v43 = vadd.f32 %v5766_v60, %v1968_v0  ;;  %3948 = vmatpush.msra.mxu3 %v5583_v37  ;;  %v1774_v60 = vsel %vm1748_vm6, %v1741_v53, %v4415_v62 }
 0x1e4   : > { %v2164_v33 = vmax.f32 %v2081_v43, 0.0  ;;  %v4418_v45 = vpop.permute.xlu1 %4417  ;;  %v5977_v14 = vld [vmem:[#allocation3 + $0x50] sm:$0xff]  ;;  %3949 = vmatpush.msra.mxu3 %v5588_v36  ;;  %v4454_v43 = vunpack.i.l.bf16 %v5966_v42 }
 0x1e5   : > { %v2347_v46 = vld [vmem:[#allocation3 + $0x4a] sm:$0xff]  ;;  %v4420_v56 = vunpack.i.h.bf16 %v4418_v45  ;;  %v4419_v11 = vunpack.i.l.bf16 %v4418_v45  ;;  %2751 = vmatmul.f32.gmra.mxu2 %v5977_v14  ;;  %v5990_v3 = vpop.permute.xlu2 %4467  ;;  %v2348_v18 = vld [vmem:[#allocation3 + $0x52] sm:$0xff] }
 0x1e6   : > { %2974 = vmatmul.f32.gmra.mxu1 %v2347_v46  ;;  %2251 = vst [vmem:[#allocation3 + $0x61] sm:$0xff] %v2164_v33  ;;  %v4443_v21 = vpop.permute.xlu0 %4442  ;;  %3950 = vmatpush.msra.mxu3 %v5597_v16 }
 0x1e7   : > { %v1970_v52 = vpop.f32.mrf.mxu0  ;;  %v1801_v37 = vsel %vm1781_vm7, %v1768_v29, %v4419_v11  ;;  %v1807_v49 = vsel %vm1781_vm7, %v1774_v60, %v4420_v56  ;;  %v4445_v24 = vunpack.i.h.bf16 %v4443_v21  ;;  %v4444_v4 = vunpack.i.l.bf16 %v4443_v21 }
 0x1e8   : > { %v1971_v55 = vadd.f32 %v5780_v39, %v1970_v52  ;;  %2005 = vmatmul.f32.gmra.mxu0 %v1801_v37  ;;  %2023 = vmatmul.f32.gmra.mxu3 %v1807_v49  ;;  %v2629_v37 = vld [vmem:[#allocation9 + $0x1f8] sm:$0xff] }
 0x1e9   : > { %3951 = vmatpush.msra.mxu3 %v5606_v6  ;;  %v1643_v6 = vsel %vm1616_vm2, %v1610_v51, %v4430_v57  ;;  %3053 = vmatpush.msrb.mxu0 %v2629_v37 }
 0x1ea   : > { %v2084_v36 = vadd.f32 %v5805_v27, %v1971_v55  ;;  %v1637_v27 = vsel %vm1616_vm2, %v1604_v28, %v4429_v13  ;;  %v420_v55 = vld [vmem:[#allocation2 + $0xf8] sm:$0xff] }
 0x1eb   : > { %3952 = vmatpush.msra.mxu3 %v5625_v31  ;;  %v6011_v31 = vpop.f32.mrf.mxu1 }
 0x1ec   : > { %v2165_v32 = vmax.f32 %v2084_v36, 0.0  ;;  %v4433_v34 = vpop.permute.xlu1 %4432  ;;  %v2628_v36 = vld [vmem:[#allocation9 + $0x1f0] sm:$0xff] }
 0x1ed   : > { %v4435_v40 = vunpack.i.h.bf16 %v4433_v34  ;;  %v4434_v20 = vunpack.i.l.bf16 %v4433_v34  ;;  %v5999_v12 = vld [vmem:[#allocation3 + $0x60] sm:$0xff]  ;;  %3953 = vmatpush.msra.mxu3 %v5646_v26  ;;  %v6015_v8 = vpop.permute.xlu2 %4482  ;;  %v4455_v26 = vunpack.i.h.bf16 %v5966_v42  ;;  %3054 = vmatpush.msrb.mxu0 %v2628_v36 }
 0x1ee   : > { %2977 = vmatmul.f32.gmra.mxu1 %v2348_v18  ;;  %2252 = vst [vmem:[#allocation3 + $0x69] sm:$0xff] %v2165_v32  ;;  %2754 = vmatmul.f32.gmra.mxu2 %v5999_v12  ;;  %v4458_v16 = vpop.permute.xlu0 %4457  ;;  %v2627_v18 = vld [vmem:[#allocation9 + $0x1e8] sm:$0xff] }
 0x1ef   : > { %v1670_v38 = vsel %vm1649_vm3, %v1637_v27, %v4434_v20  ;;  %v1676_v19 = vsel %vm1649_vm3, %v1643_v6, %v4435_v40  ;;  %3954 = vmatpush.msra.mxu3 %v5651_v2  ;;  %v4460_v49 = vunpack.i.h.bf16 %v4458_v16  ;;  %v4459_v30 = vunpack.i.l.bf16 %v4458_v16  ;;  %3055 = vmatpush.msrb.mxu0 %v2627_v18  ;;  %v421_v18 = vld [vmem:[#allocation2 + $0x108] sm:$0xff] }
 0x1f0   : > { %v1703_v0 = vsel %vm1682_vm4, %v1670_v38, %v4439_v63  ;;  %v1709_v62 = vsel %vm1682_vm4, %v1676_v19, %v4440_v59  ;;  %v4470_v16 = vunpack.i.h.bf16 %v5990_v3  ;;  %v4469_v6 = vunpack.i.l.bf16 %v5990_v3  ;;  %v2626_v38 = vld [vmem:[#allocation9 + $0x1e0] sm:$0xff] }
 0x1f1   : > { %3955 = vmatpush.msra.mxu3 %v5657_v48  ;;  %v1736_v48 = vsel %vm1715_vm5, %v1703_v0, %v4444_v4  ;;  %v1742_v56 = vsel %vm1715_vm5, %v1709_v62, %v4445_v24  ;;  %v1611_v40 = vsel %vm278_vm0, %v426_v10, %v4460_v49  ;;  %v1605_v20 = vsel %vm278_vm0, %v420_v55, %v4459_v30  ;;  %v2625_v0 = vld [vmem:[#allocation9 + $0x1d8] sm:$0xff]  ;;  %v2622_v30 = vld [vmem:[#allocation9 + $0x1c0] sm:$0xff] }
 0x1f2   : > { %3056 = vmatpush.msrb.mxu0 %v2626_v38  ;;  %v2621_v55 = vld [vmem:[#allocation9 + $0x1b8] sm:$0xff]  ;;  %v2618_v38 = vld [vmem:[#allocation9 + $0x1a0] sm:$0xff] }
 0x1f3   : > { %3956 = vmatpush.msra.mxu3 %v5675_v50  ;;  %v6032_v54 = vpop.f32.mrf.mxu1 }
 0x1f4   : > { %v4448_v23 = vpop.permute.xlu1 %4447  ;;  %3057 = vmatpush.msrb.mxu0 %v2625_v0 }
 0x1f5   : > { %v4450_v47 = vunpack.i.h.bf16 %v4448_v23  ;;  %v4449_v53 = vunpack.i.l.bf16 %v4448_v23  ;;  %v1973_v2 = vpop.f32.mrf.mxu0  ;;  %v6020_v33 = vld [vmem:[#allocation3 + $0x68] sm:$0xff]  ;;  %v6034_v28 = vpop.permute.xlu2 %4497 }
 0x1f6   : > { %v2349_v45 = vld [vmem:[#allocation3 + $0x62] sm:$0xff]  ;;  %v1974_v46 = vadd.f32 %v5780_v39, %v1973_v2  ;;  %2757 = vmatmul.f32.gmra.mxu2 %v6020_v33  ;;  %v4473_v11 = vpop.permute.xlu0 %4472  ;;  %v2350_v51 = vld [vmem:[#allocation3 + $0x6a] sm:$0xff] }
 0x1f7   : > { %2980 = vmatmul.f32.gmra.mxu1 %v2349_v45  ;;  %v1769_v42 = vsel %vm1748_vm6, %v1736_v48, %v4449_v53  ;;  %v1775_v29 = vsel %vm1748_vm6, %v1742_v56, %v4450_v47  ;;  %v4475_v24 = vunpack.i.h.bf16 %v4473_v11  ;;  %v4474_v4 = vunpack.i.l.bf16 %v4473_v11  ;;  %v2624_v47 = vld [vmem:[#allocation9 + $0x1d0] sm:$0xff] }
 0x1f8   : > { %v2087_v60 = vadd.f32 %v5836_v9, %v1974_v46  ;;  %v1802_v21 = vsel %vm1781_vm7, %v1769_v42, %v4454_v43  ;;  %v1808_v50 = vsel %vm1781_vm7, %v1775_v29, %v4455_v26  ;;  %v4485_v43 = vunpack.i.h.bf16 %v6015_v8  ;;  %3058 = vmatpush.msrb.mxu0 %v2624_v47  ;;  %v2623_v29 = vld [vmem:[#allocation9 + $0x1c8] sm:$0xff] }
 0x1f9   : > { %2008 = vmatmul.f32.gmra.mxu0 %v1802_v21  ;;  %2026 = vmatmul.f32.gmra.mxu3 %v1808_v50 }
 0x1fa   : > { %v2166_v52 = vmax.f32 %v2087_v60, 0.0  ;;  %3059 = vmatpush.msrb.mxu0 %v2623_v29 }
 0x1fb   : > { %v6055_v60 = vpop.f32.mrf.mxu1 }
 0x1fc   : > { %2253 = vst [vmem:[#allocation3 + $0x79] sm:$0xff] %v2166_v52  ;;  %v4463_v1 = vpop.permute.xlu1 %4462  ;;  %3060 = vmatpush.msrb.mxu0 %v2622_v30 }
 0x1fd   : > { %v4465_v57 = vunpack.i.h.bf16 %v4463_v1  ;;  %v4464_v9 = vunpack.i.l.bf16 %v4463_v1  ;;  %v1976_v13 = vpop.f32.mrf.mxu0  ;;  %v6060_v52 = vpop.permute.xlu2 %4512 }
 0x1fe   : > { %v1977_v32 = vadd.f32 %v5780_v39, %v1976_v13  ;;  %v4488_v34 = vpop.permute.xlu0 %4487  ;;  %3061 = vmatpush.msrb.mxu0 %v2621_v55  ;;  %v2614_v55 = vld [vmem:[#allocation9 + $0x180] sm:$0xff] }
 0x1ff   : > { %2983 = vmatmul.f32.gmra.mxu1 %v2350_v51  ;;  %v1638_v27 = vsel %vm1616_vm2, %v1605_v20, %v4464_v9  ;;  %v1644_v59 = vsel %vm1616_vm2, %v1611_v40, %v4465_v57  ;;  %v4490_v45 = vunpack.i.h.bf16 %v4488_v34  ;;  %v4489_v46 = vunpack.i.l.bf16 %v4488_v34  ;;  %v2620_v57 = vld [vmem:[#allocation9 + $0x1b0] sm:$0xff]  ;;  %v427_v40 = vld [vmem:[#allocation2 + $0x150] sm:$0xff] }
 0x200   : > { %v2090_v63 = vadd.f32 %v5874_v61, %v1977_v32  ;;  %v1671_v62 = vsel %vm1649_vm3, %v1638_v27, %v4469_v6  ;;  %v1677_v23 = vsel %vm1649_vm3, %v1644_v59, %v4470_v16  ;;  %v4484_v61 = vunpack.i.l.bf16 %v6015_v8  ;;  %3062 = vmatpush.msrb.mxu0 %v2620_v57  ;;  %v2619_v6 = vld [vmem:[#allocation9 + $0x1a8] sm:$0xff] }
 0x201   : > { %v1704_v48 = vsel %vm1682_vm4, %v1671_v62, %v4474_v4  ;;  %v1710_v56 = vsel %vm1682_vm4, %v1677_v23, %v4475_v24  ;;  %v4500_v59 = vunpack.i.h.bf16 %v6034_v28  ;;  %v2617_v23 = vld [vmem:[#allocation9 + $0x198] sm:$0xff] }
 0x202   : > { %v2167_v19 = vmax.f32 %v2090_v63, 0.0  ;;  %3063 = vmatpush.msrb.mxu0 %v2619_v6  ;;  %v4499_v63 = vunpack.i.l.bf16 %v6034_v28 }
 0x203   : > { %v6046_v26 = vld [vmem:[#allocation3 + $0x78] sm:$0xff] }
 0x204   : > { %2254 = vst [vmem:[#allocation3 + $0x81] sm:$0xff] %v2167_v19  ;;  %v4478_v3 = vpop.permute.xlu1 %4477  ;;  %2760 = vmatmul.f32.gmra.mxu2 %v6046_v26  ;;  %v6073_v19 = vpop.f32.mrf.mxu1  ;;  %3064 = vmatpush.msrb.mxu0 %v2618_v38 }
 0x205   : > { %v4480_v53 = vunpack.i.h.bf16 %v4478_v3  ;;  %v4479_v2 = vunpack.i.l.bf16 %v4478_v3  ;;  %v6078_v62 = vpop.permute.xlu2 %4527 }
 0x206   : > { %v1979_v11 = vpop.f32.mrf.mxu0  ;;  %v6053_v42 = vpop.permute.xlu0 %4502  ;;  %3065 = vmatpush.msrb.mxu0 %v2617_v23  ;;  %v422_v23 = vld [vmem:[#allocation2 + $0x110] sm:$0xff] }
 0x207   : > { %v1980_v21 = vadd.f32 %v5780_v39, %v1979_v11  ;;  %v1737_v8 = vsel %vm1715_vm5, %v1704_v48, %v4479_v2  ;;  %v1743_v50 = vsel %vm1715_vm5, %v1710_v56, %v4480_v53  ;;  %v4505_v3 = vunpack.i.h.bf16 %v6053_v42  ;;  %v2615_v11 = vld [vmem:[#allocation9 + $0x188] sm:$0xff] }
 0x208   : > { %v1770_v37 = vsel %vm1748_vm6, %v1737_v8, %v4484_v61  ;;  %v1776_v49 = vsel %vm1748_vm6, %v1743_v50, %v4485_v43  ;;  %v4504_v43 = vunpack.i.l.bf16 %v6053_v42  ;;  %v4514_v8 = vunpack.i.l.bf16 %v6060_v52 }
 0x209   : > { %v2093_v10 = vadd.f32 %v5902_v58, %v1980_v21  ;;  %v1803_v1 = vsel %vm1781_vm7, %v1770_v37, %v4489_v46  ;;  %v1809_v36 = vsel %vm1781_vm7, %v1776_v49, %v4490_v45  ;;  %v4515_v21 = vunpack.i.h.bf16 %v6060_v52 }
 0x20a   : > { %2011 = vmatmul.f32.gmra.mxu0 %v1803_v1  ;;  %2029 = vmatmul.f32.gmra.mxu3 %v1809_v36 }
 0x20b   : > { %v2168_v9 = vmax.f32 %v2093_v10, 0.0  ;;  %v6067_v13 = vld [vmem:[#allocation3 + $0x80] sm:$0xff] }
 0x20c   : > { %v2351_v51 = vld [vmem:[#allocation3 + $0x7a] sm:$0xff]  ;;  %v4493_v32 = vpop.permute.xlu1 %4492  ;;  %2763 = vmatmul.f32.gmra.mxu2 %v6067_v13  ;;  %v2352_v47 = vld [vmem:[#allocation3 + $0x82] sm:$0xff]  ;;  %v6097_v57 = vpop.f32.mrf.mxu1 }
 0x20d   : > { %2986 = vmatmul.f32.gmra.mxu1 %v2351_v51  ;;  %2255 = vst [vmem:[#allocation3 + $0x91] sm:$0xff] %v2168_v9  ;;  %v4495_v34 = vunpack.i.h.bf16 %v4493_v32  ;;  %v4494_v58 = vunpack.i.l.bf16 %v4493_v32  ;;  %v4543_v51 = vpop.permute.xlu2 %4542 }
 0x20e   : > { %v1982_v20 = vpop.f32.mrf.mxu0  ;;  %v4518_v16 = vpop.permute.xlu0 %4517 }
 0x20f   : > { %v1983_v27 = vadd.f32 %v5780_v39, %v1982_v20  ;;  %v1612_v24 = vsel %vm278_vm0, %v427_v40, %v4495_v34  ;;  %v1606_v4 = vsel %vm278_vm0, %v421_v18, %v4494_v58  ;;  %v4520_v10 = vunpack.i.h.bf16 %v4518_v16 }
 0x210   : > { %v1639_v28 = vsel %vm1616_vm2, %v1606_v4, %v4499_v63  ;;  %v1645_v53 = vsel %vm1616_vm2, %v1612_v24, %v4500_v59  ;;  %v4519_v1 = vunpack.i.l.bf16 %v4518_v16  ;;  %v4530_v24 = vunpack.i.h.bf16 %v6078_v62 }
 0x211   : > { %v2096_v0 = vadd.f32 %v5936_v41, %v1983_v27  ;;  %v2616_v41 = vld [vmem:[#allocation9 + $0x190] sm:$0xff]  ;;  %v1678_v42 = vsel %vm1649_vm3, %v1645_v53, %v4505_v3  ;;  %v1672_v29 = vsel %vm1649_vm3, %v1639_v28, %v4504_v43  ;;  %v2645_v27 = vld [vmem:[#allocation9 + $0x278] sm:$0xff]  ;;  %v4529_v4 = vunpack.i.l.bf16 %v6078_v62  ;;  %v428_v3 = vld [vmem:[#allocation2 + $0x158] sm:$0xff] }
 0x212   : > { %3066 = vmatpush.msrb.mxu0 %v2616_v41  ;;  %3166 = vmatpush.msrb.mxu2 %v2645_v27  ;;  %v1613_v28 = vsel %vm278_vm0, %v428_v3, %v4530_v24 }
 0x213   : > { %v2169_v61 = vmax.f32 %v2096_v0, 0.0  ;;  %v1607_v53 = vsel %vm278_vm0, %v422_v23, %v4529_v4 }
 0x214   : > { %v4508_v2 = vpop.permute.xlu1 %4507  ;;  %v6084_v45 = vld [vmem:[#allocation3 + $0x90] sm:$0xff]  ;;  %3067 = vmatpush.msrb.mxu0 %v2615_v11  ;;  %v6116_v62 = vpop.f32.mrf.mxu1 }
 0x215   : > { %2989 = vmatmul.f32.gmra.mxu1 %v2352_v47  ;;  %2256 = vst [vmem:[#allocation3 + $0x99] sm:$0xff] %v2169_v61  ;;  %v4510_v46 = vunpack.i.h.bf16 %v4508_v2  ;;  %v4509_v48 = vunpack.i.l.bf16 %v4508_v2  ;;  %2766 = vmatmul.f32.gmra.mxu2 %v6084_v45 }
 0x216   : > { %v6087_v56 = vpop.permute.xlu0 %4532  ;;  %3068 = vmatpush.msrb.mxu0 %v2614_v55 }
 0x217   : > { %v1985_v50 = vpop.f32.mrf.mxu0  ;;  %v1705_v37 = vsel %vm1682_vm4, %v1672_v29, %v4509_v48  ;;  %v1711_v49 = vsel %vm1682_vm4, %v1678_v42, %v4510_v46  ;;  %v4535_v61 = vunpack.i.h.bf16 %v6087_v56  ;;  %v4534_v47 = vunpack.i.l.bf16 %v6087_v56  ;;  %v4558_v29 = vpop.permute.xlu2 %4557 }
 0x218   : > { %v1986_v30 = vadd.f32 %v5780_v39, %v1985_v50  ;;  %v1738_v9 = vsel %vm1715_vm5, %v1705_v37, %v4514_v8  ;;  %v1744_v52 = vsel %vm1715_vm5, %v1711_v49, %v4515_v21  ;;  %v4545_v8 = vunpack.i.h.bf16 %v4543_v51 }
 0x219   : > { %v1777_v16 = vsel %vm1748_vm6, %v1744_v52, %v4520_v10  ;;  %v1646_v56 = vsel %vm1616_vm2, %v1613_v28, %v4535_v61  ;;  %v1640_v21 = vsel %vm1616_vm2, %v1607_v53, %v4534_v47  ;;  %v4544_v50 = vunpack.i.l.bf16 %v4543_v51 }
 0x21a   : > { %v2099_v36 = vadd.f32 %v5958_v15, %v1986_v30  ;;  %v1771_v15 = vsel %vm1748_vm6, %v1738_v9, %v4519_v1  ;;  %v4560_v9 = vunpack.i.h.bf16 %v4558_v29  ;;  %v4559_v52 = vunpack.i.l.bf16 %v4558_v29 }
 0x21c   : > { %v2170_v32 = vmax.f32 %v2099_v36, 0.0  ;;  %v4523_v34 = vpop.permute.xlu1 %4522  ;;  %v6101_v58 = vld [vmem:[#allocation3 + $0x98] sm:$0xff]  ;;  %v6135_v27 = vpop.f32.mrf.mxu1 }
 0x21d   : > { %v2353_v18 = vld [vmem:[#allocation3 + $0x92] sm:$0xff]  ;;  %v4525_v40 = vunpack.i.h.bf16 %v4523_v34  ;;  %v4524_v20 = vunpack.i.l.bf16 %v4523_v34  ;;  %2769 = vmatmul.f32.gmra.mxu2 %v6101_v58  ;;  %v2354_v46 = vld [vmem:[#allocation3 + $0x9a] sm:$0xff] }
 0x21e   : > { %2992 = vmatmul.f32.gmra.mxu1 %v2353_v18  ;;  %2257 = vst [vmem:[#allocation3 + $0xa9] sm:$0xff] %v2170_v32  ;;  %v4548_v6 = vpop.permute.xlu0 %4547 }
 0x21f   : > { %v1988_v59 = vpop.f32.mrf.mxu0  ;;  %v1804_v63 = vsel %vm1781_vm7, %v1771_v15, %v4524_v20  ;;  %v1810_v38 = vsel %vm1781_vm7, %v1777_v16, %v4525_v40  ;;  %v4550_v30 = vunpack.i.h.bf16 %v4548_v6  ;;  %v4549_v55 = vunpack.i.l.bf16 %v4548_v6  ;;  %v2644_v6 = vld [vmem:[#allocation9 + $0x270] sm:$0xff] }
 0x220   : > { %v1989_v0 = vadd.f32 %v5780_v39, %v1988_v59  ;;  %2014 = vmatmul.f32.gmra.mxu0 %v1804_v63  ;;  %2032 = vmatmul.f32.gmra.mxu3 %v1810_v38  ;;  %v4573_v38 = vpop.permute.xlu2 %4572 }
 0x221   : > { %3167 = vmatpush.msrb.mxu2 %v2644_v6  ;;  %v4574_v28 = vunpack.i.l.bf16 %v4573_v38 }
 0x222   : > { %v2102_v43 = vadd.f32 %v5985_v5, %v1989_v0 }
 0x224   : > { %v2171_v2 = vmax.f32 %v2102_v43, 0.0  ;;  %v4538_v41 = vpop.permute.xlu1 %4537  ;;  %v429_v43 = vld [vmem:[#allocation2 + $0x168] sm:$0xff] }
 0x225   : > { %v4540_v48 = vunpack.i.h.bf16 %v4538_v41  ;;  %v4539_v11 = vunpack.i.l.bf16 %v4538_v41  ;;  %v6118_v42 = vld [vmem:[#allocation3 + $0xa8] sm:$0xff] }
 0x226   : > { %2995 = vmatmul.f32.gmra.mxu1 %v2354_v46  ;;  %2258 = vst [vmem:[#allocation3 + $0xb1] sm:$0xff] %v2171_v2  ;;  %2772 = vmatmul.f32.gmra.mxu2 %v6118_v42  ;;  %v6121_v5 = vpop.permute.xlu0 %4562 }
 0x227   : > { %v1673_v37 = vsel %vm1649_vm3, %v1640_v21, %v4539_v11  ;;  %v1679_v49 = vsel %vm1649_vm3, %v1646_v56, %v4540_v48  ;;  %v4564_v3 = vunpack.i.l.bf16 %v6121_v5  ;;  %v2373_v56 = vld [vmem:[#allocation3 + $0x18] sm:$0xff]  ;;  %v6154_v21 = vpop.f32.mrf.mxu1 }
 0x228   : > { %v1706_v10 = vsel %vm1682_vm4, %v1673_v37, %v4544_v50  ;;  %v1712_v1 = vsel %vm1682_vm4, %v1679_v49, %v4545_v8  ;;  %v4565_v8 = vunpack.i.h.bf16 %v6121_v5  ;;  %v1421_v37 = vpop.permute.xlu2 %1420  ;;  %v430_v49 = vld [vmem:[#allocation2 + $0x170] sm:$0xff] }
 0x229   : > { %v1739_v15 = vsel %vm1715_vm5, %v1706_v10, %v4549_v55  ;;  %v1745_v16 = vsel %vm1715_vm5, %v1712_v1, %v4550_v30  ;;  %v1614_v41 = vsel %vm278_vm0, %v429_v43, %v4564_v3 }
 0x22a   : > { %v1615_v5 = vsel %vm278_vm0, %v430_v49, %v4565_v8 }
 0x22c   : > { %v4553_v36 = vpop.permute.xlu1 %4552 }
 0x22d   : > { %v4555_v32 = vunpack.i.h.bf16 %v4553_v36  ;;  %v4554_v34 = vunpack.i.l.bf16 %v4553_v36  ;;  %v1991_v18 = vpop.f32.mrf.mxu0  ;;  %v6129_v40 = vld [vmem:[#allocation3 + $0xb0] sm:$0xff] }
 0x22e   : > { %v2355_v20 = vld [vmem:[#allocation3 + $0xaa] sm:$0xff]  ;;  %v1992_v51 = vadd.f32 %v5780_v39, %v1991_v18  ;;  %2775 = vmatmul.f32.gmra.mxu2 %v6129_v40  ;;  %v4578_v0 = vpop.permute.xlu0 %4577  ;;  %v2356_v2 = vld [vmem:[#allocation3 + $0xb2] sm:$0xff] }
 0x22f   : > { %2998 = vmatmul.f32.gmra.mxu1 %v2355_v20  ;;  %v1772_v59 = vsel %vm1748_vm6, %v1739_v15, %v4554_v34  ;;  %v1778_v63 = vsel %vm1748_vm6, %v1745_v16, %v4555_v32  ;;  %v4579_v29 = vunpack.i.l.bf16 %v4578_v0  ;;  %v2643_v32 = vld [vmem:[#allocation9 + $0x268] sm:$0xff]  ;;  %v4580_v6 = vunpack.i.h.bf16 %v4578_v0 }
 0x230   : > { %v2105_v24 = vadd.f32 %v6011_v31, %v1992_v51  ;;  %v1805_v39 = vsel %vm1781_vm7, %v1772_v59, %v4559_v52  ;;  %v1811_v4 = vsel %vm1781_vm7, %v1778_v63, %v4560_v9  ;;  %v6147_v31 = vld [vmem:[%s7341_s2] ss:$0 sm:$0xff]  ;;  %v4575_v9 = vunpack.i.h.bf16 %v4573_v38  ;;  %3168 = vmatpush.msrb.mxu2 %v2643_v32  ;;  %v6169_v51 = vpop.f32.mrf.mxu2  ;;  %v2642_v38 = vld [vmem:[#allocation9 + $0x260] sm:$0xff]  ;;  %v1423_v3 = vpop.permute.xlu2 %1422 }
 0x231   : > { %2017 = vmatmul.f32.gmra.mxu0 %v1805_v39  ;;  %2035 = vmatmul.f32.gmra.mxu3 %v1811_v4 }
 0x232   : > { %v2172_v23 = vmax.f32 %v2105_v24, 0.0  ;;  %v6178_v24 = vpop.f32.mrf.mxu1  ;;  %3169 = vmatpush.msrb.mxu2 %v2642_v38 }
 0x234   : > { %2259 = vst [vmem:[#allocation3 + $0xc1] sm:$0xff] %v2172_v23  ;;  %v4568_v61 = vpop.permute.xlu1 %4567 }
 0x235   : > { %v4569_v47 = vunpack.i.l.bf16 %v4568_v61  ;;  %v1994_v53 = vpop.f32.mrf.mxu0  ;;  %v4570_v30 = vunpack.i.h.bf16 %v4568_v61 }
 0x236   : > { %v1995_v46 = vadd.f32 %v6147_v31, %v1994_v53  ;;  %v1549_v10 = vpop.permute.xlu0 %1548 }
 0x237   : > { %3001 = vmatmul.f32.gmra.mxu1 %v2356_v2  ;;  %v1647_v48 = vsel %vm1616_vm2, %v1614_v41, %v4569_v47  ;;  %v1648_v34 = vsel %vm1616_vm2, %v1615_v5, %v4570_v30 }
 0x238   : > { %v6152_v11 = vadd.f32 %v6032_v54, %v1995_v46  ;;  %v1680_v50 = vsel %vm1649_vm3, %v1647_v48, %v4574_v28  ;;  %v1681_v63 = vsel %vm1649_vm3, %v1648_v34, %v4575_v9  ;;  %v6191_v2 = vpop.f32.mrf.mxu2 }
 0x239   : > { %3069 = vmatmul.f32.vlgmr.msrb.gmra.mxu0 %v2373_v56  ;;  %v1713_v36 = vsel %vm1682_vm4, %v1680_v50, %v4579_v29  ;;  %v1714_v0 = vsel %vm1682_vm4, %v1681_v63, %v4580_v6  ;;  %v683_v56 = vld [vmem:[#allocation2 + $0x172] sm:$0xff] }
 0x23a   : > { %v7354_v55 = vmax.f32 %v6152_v11, 0.0  ;;  %v6203_v8 = vpop.f32.mrf.mxu1 }
 0x23b   : > { %v6159_v1 = vld [vmem:[#allocation3 + $0xc0] sm:$0xff] }
 0x23c   : > { %2260 = vst [vmem:[#allocation3 + $0xc9] sm:$0xff] %v7354_v55  ;;  %v1293_v54 = vpop.permute.xlu1 %1292  ;;  %2778 = vmatmul.f32.gmra.mxu2 %v6159_v1 }
 0x23d   : > { %v1746_v52 = vsel %vm1715_vm5, %v1713_v36, %v1293_v54 }
 0x23e   : > { %v1779_v18 = vsel %vm1748_vm6, %v1746_v52, %v1421_v37  ;;  %v1997_v20 = vpop.f32.mrf.mxu0  ;;  %v2641_v37 = vld [vmem:[#allocation9 + $0x258] sm:$0xff] }
 0x23f   : > { %v1998_v15 = vadd.f32 %v6147_v31, %v1997_v20  ;;  %v1812_v16 = vsel %vm1781_vm7, %v1779_v18, %v1549_v10  ;;  %3170 = vmatpush.msrb.mxu2 %v2641_v37  ;;  %v2640_v18 = vld [vmem:[#allocation9 + $0x250] sm:$0xff] }
 0x240   : > { %2038 = vmatmul.f32.gmra.mxu3 %v1812_v16  ;;  %v6211_v49 = vpop.f32.mrf.mxu2  ;;  %v686_v20 = vld [vmem:[#allocation2 + $0x19a] sm:$0xff] }
 0x241   : > { %v6174_v59 = vadd.f32 %v6055_v60, %v1998_v15  ;;  %3072 = vmatmul.f32.gmra.mxu0 %v5863_v22  ;;  %v1551_v60 = vpop.permute.xlu0 %1550  ;;  %3171 = vmatpush.msrb.mxu2 %v2640_v18  ;;  %v2639_v15 = vld [vmem:[#allocation9 + $0x248] sm:$0xff]  ;;  %v2632_v37 = vld [vmem:[#allocation9 + $0x210] sm:$0xff] }
 0x243   : > { %v7353_v39 = vmax.f32 %v6174_v59, 0.0  ;;  %v6181_v4 = vld [vmem:[#allocation3 + $0xc8] sm:$0xff]  ;;  %3172 = vmatpush.msrb.mxu2 %v2639_v15 }
 0x244   : > { %v2357_v23 = vld [vmem:[#allocation3 + $0xc2] sm:$0xff]  ;;  %v1295_v43 = vpop.permute.xlu1 %1294  ;;  %2781 = vmatmul.f32.gmra.mxu2 %v6181_v4  ;;  %v2358_v48 = vld [vmem:[#allocation3 + $0xca] sm:$0xff] }
 0x245   : > { %3004 = vmatmul.f32.gmra.mxu1 %v2357_v23  ;;  %2261 = vst [vmem:[#allocation3 + $0xd9] sm:$0xff] %v7353_v39  ;;  %v1747_v22 = vsel %vm1715_vm5, %v1714_v0, %v1295_v43  ;;  %v687_v23 = vld [vmem:[#allocation2 + $0x1a2] sm:$0xff] }
 0x246   : > { %v1780_v61 = vsel %vm1748_vm6, %v1747_v22, %v1423_v3  ;;  %v2000_v47 = vpop.f32.mrf.mxu0  ;;  %v2638_v3 = vld [vmem:[#allocation9 + $0x240] sm:$0xff]  ;;  %v2635_v22 = vld [vmem:[#allocation9 + $0x228] sm:$0xff] }
 0x247   : > { %v2001_v28 = vadd.f32 %v6147_v31, %v2000_v47  ;;  %v1813_v53 = vsel %vm1781_vm7, %v1780_v61, %v1551_v60  ;;  %3173 = vmatpush.msrb.mxu2 %v2638_v3 }
 0x248   : > { %2041 = vmatmul.f32.gmra.mxu3 %v1813_v53  ;;  %v6223_v32 = vpop.f32.mrf.mxu2 }
 0x249   : > { %v6194_v41 = vadd.f32 %v6073_v19, %v2001_v28  ;;  %3075 = vmatmul.f32.gmra.mxu0 %v5910_v17  ;;  %v2634_v28 = vld [vmem:[#allocation9 + $0x220] sm:$0xff] }
 0x24b   : > { %v7352_v46 = vmax.f32 %v6194_v41, 0.0 }
 0x24c   : > { %v6198_v29 = vld [vmem:[#allocation3 + $0xd8] sm:$0xff] }
 0x24d   : > { %3007 = vmatmul.f32.gmra.mxu1 %v2358_v48  ;;  %2262 = vst [vmem:[#allocation3 + $0xe1] sm:$0xff] %v7352_v46  ;;  %2784 = vmatmul.f32.gmra.mxu2 %v6198_v29 }
 0x24f   : > { %v2003_v50 = vpop.f32.mrf.mxu0 }
 0x250   : > { %v2004_v19 = vadd.f32 %v6147_v31, %v2003_v50  ;;  %3911 = vmatmul.msk.f32.vlgmr.msrb.gmra.mxu3 %vm278_vm0, %v683_v56  ;;  %v2633_v56 = vld [vmem:[#allocation9 + $0x218] sm:$0xff] }
 0x251   : > { %3078 = vmatmul.f32.gmra.mxu0 %v5933_v7 }
 0x252   : > { %v6209_v17 = vadd.f32 %v6097_v57, %v2004_v19  ;;  %v2134_v57 = vpop.f32.mrf.mxu1 }
 0x254   : > { %v7351_v30 = vmax.f32 %v6209_v17, 0.0  ;;  %v6214_v10 = vld [vmem:[#allocation3 + $0xe0] sm:$0xff] }
 0x255   : > { %v2359_v54 = vld [vmem:[#allocation3 + $0xda] sm:$0xff]  ;;  %2787 = vmatmul.f32.gmra.mxu2 %v6214_v10  ;;  %v2360_v52 = vld [vmem:[#allocation3 + $0xe2] sm:$0xff] }
 0x256   : > { %3010 = vmatmul.f32.gmra.mxu1 %v2359_v54  ;;  %2263 = vst [vmem:[#allocation3 + $0xf1] sm:$0xff] %v7351_v30  ;;  %v2021_v36 = vpop.f32.mrf.mxu3  ;;  %v2631_v54 = vld [vmem:[#allocation9 + $0x208] sm:$0xff] }
 0x257   : > { %v2022_v7 = vadd.f32 %v6147_v31, %v2021_v36 }
 0x258   : > { %3912 = vmatmul.msk.f32.gmra.mxu3 %vm278_vm0, %v5896_v35  ;;  %v6231_v35 = vpop.f32.mrf.mxu2 }
 0x259   : > { %v2135_v5 = vadd.f32 %v2134_v57, %v2022_v7  ;;  %3081 = vmatmul.f32.gmra.mxu0 %v5954_v44 }
 0x25a   : > { %v2137_v38 = vpop.f32.mrf.mxu1 }
 0x25b   : > { %v2182_v9 = vmax.f32 %v2135_v5, 0.0 }
 0x25d   : > { %2269 = vst [vmem:[#allocation3 + $0x139] sm:$0xff] %v2182_v9  ;;  %v6225_v34 = vld [vmem:[#allocation3 + $0xf0] sm:$0xff]  ;;  %v2630_v9 = vld [vmem:[#allocation9 + $0x200] sm:$0xff] }
 0x25e   : > { %3013 = vmatmul.f32.gmra.mxu1 %v2360_v52  ;;  %2790 = vmatmul.f32.gmra.mxu2 %v6225_v34 }
 0x260   : > { %3913 = vmatmul.msk.f32.gmra.mxu3 %vm278_vm0, %v5922_v25  ;;  %v6243_v0 = vpop.f32.mrf.mxu2 }
 0x261   : > { %3084 = vmatmul.f32.gmra.mxu0 %v5977_v14 }
 0x262   : > { %v2140_v53 = vpop.f32.mrf.mxu1 }
 0x265   : > { %v2006_v44 = vpop.f32.mrf.mxu0 }
 0x266   : > { %v2007_v16 = vadd.f32 %v6147_v31, %v2006_v44 }
 0x268   : > { %v6235_v6 = vadd.f32 %v6116_v62, %v2007_v16  ;;  %3914 = vmatmul.msk.f32.gmra.mxu3 %vm278_vm0, %v686_v20  ;;  %v2637_v62 = vld [vmem:[#allocation9 + $0x238] sm:$0xff]  ;;  %v6251_v19 = vpop.f32.mrf.mxu2 }
 0x269   : > { %3087 = vmatmul.f32.gmra.mxu0 %v5999_v12  ;;  %3174 = vmatpush.msrb.mxu2 %v2637_v62  ;;  %v2636_v12 = vld [vmem:[#allocation9 + $0x230] sm:$0xff]  ;;  %7366 = vst [vmem:[#allocation14_spill] sm:$0xff] %v6251_v19 }
 0x26a   : > { %v7350_v63 = vmax.f32 %v6235_v6, 0.0  ;;  %v6261_v52 = vpop.f32.mrf.mxu1 }
 0x26b   : > { %v2024_v25 = vpop.f32.mrf.mxu3  ;;  %3175 = vmatpush.msrb.mxu2 %v2636_v12  ;;  %v6290_v12 = vld [vmem:[#allocation3 + $0x19] sm:$0xff] }
 0x26c   : > { %2264 = vst [vmem:[#allocation3 + $0xf9] sm:$0xff] %v7350_v63  ;;  %v2025_v14 = vadd.f32 %v6147_v31, %v2024_v25  ;;  %v2672_v63 = vld [vmem:[#allocation9 + $0x350] sm:$0xff] }
 0x26d   : > { %3176 = vmatpush.msrb.mxu2 %v2635_v22 }
 0x26e   : > { %v2138_v43 = vadd.f32 %v2137_v38, %v2025_v14 }
 0x26f   : > { %3177 = vmatpush.msrb.mxu2 %v2634_v28 }
 0x270   : > { %v2183_v60 = vmax.f32 %v2138_v43, 0.0  ;;  %3915 = vmatmul.msk.f32.gmra.mxu3 %vm278_vm0, %v687_v23  ;;  %v6264_v18 = vpop.f32.mrf.mxu2  ;;  %v2596_v43 = vld [vmem:[#allocation9 + $0xf0] sm:$0xff] }
 0x271   : > { %3090 = vmatmul.f32.gmra.mxu0 %v6020_v33  ;;  %3178 = vmatpush.msrb.mxu2 %v2633_v56  ;;  %7367 = vst [vmem:[#allocation15_spill] sm:$0xff] %v6264_v18  ;;  %v6305_v56 = vld [vmem:[#allocation3 + $0x21] sm:$0xff]  ;;  %v2492_v18 = vld [vmem:[#allocation3 + $0x138] sm:$0xff] }
 0x272   : > { %2270 = vst [vmem:[#allocation3 + $0x141] sm:$0xff] %v2183_v60  ;;  %v6271_v16 = vpop.f32.mrf.mxu1 }
 0x273   : > { %v6247_v61 = vld [vmem:[#allocation3 + $0xf8] sm:$0xff]  ;;  %3179 = vmatpush.msrb.mxu2 %v2632_v37 }
 0x274   : > { %v2361_v47 = vld [vmem:[#allocation3 + $0xf2] sm:$0xff]  ;;  %2793 = vmatmul.f32.gmra.mxu2 %v6247_v61  ;;  %v2362_v7 = vld [vmem:[#allocation3 + $0xfa] sm:$0xff] }
 0x275   : > { %3016 = vmatmul.f32.gmra.mxu1 %v2361_v47  ;;  %3180 = vmatpush.msrb.mxu2 %v2631_v54  ;;  %v2593_v37 = vld [vmem:[#allocation9 + $0xd8] sm:$0xff] }
 0x276   : > { %v2009_v48 = vpop.f32.mrf.mxu0 }
 0x277   : > { %v2010_v50 = vadd.f32 %v6147_v31, %v2009_v48  ;;  %3181 = vmatpush.msrb.mxu2 %v2630_v9  ;;  %v2594_v48 = vld [vmem:[#allocation9 + $0xe0] sm:$0xff] }
 0x279   : > { %v6254_v33 = vadd.f32 %v6135_v27, %v2010_v50  ;;  %3093 = vmatmul.f32.gmra.mxu0 %v6046_v26  ;;  %v6373_v30 = vld [vmem:[#allocation3 + $0x140] sm:$0xff] }
 0x27a   : > { %v6282_v14 = vpop.f32.mrf.mxu1  ;;  %v2367_v46 = vld [vmem:[#allocation3 + $0x13a] sm:$0xff] }
 0x27b   : > { %v7349_v36 = vmax.f32 %v6254_v33, 0.0 }
 0x27c   : > { %v2027_v57 = vpop.f32.mrf.mxu3 }
 0x27d   : > { %3019 = vmatmul.f32.gmra.mxu1 %v2362_v7  ;;  %2265 = vst [vmem:[#allocation3 + $0x109] sm:$0xff] %v7349_v36  ;;  %v2028_v5 = vadd.f32 %v6147_v31, %v2027_v57  ;;  %v2592_v7 = vld [vmem:[#allocation9 + $0xd0] sm:$0xff]  ;;  %v2585_v36 = vld [vmem:[#allocation9 + $0x98] sm:$0xff] }
 0x27e   : > { %v6318_v57 = vld [vmem:[#allocation3 + $0x31] sm:$0xff] }
 0x27f   : > { %v2141_v27 = vadd.f32 %v2140_v53, %v2028_v5  ;;  %v2595_v53 = vld [vmem:[#allocation9 + $0xe8] sm:$0xff] }
 0x281   : > { %v2184_v26 = vmax.f32 %v2141_v27, 0.0  ;;  %3096 = vmatmul.f32.gmra.mxu0 %v6067_v13  ;;  %v6277_v13 = vpop.f32.mrf.mxu2 }
 0x282   : > { %7368 = vst [vmem:[#allocation16_spill] sm:$0xff] %v6277_v13 }
 0x283   : > { %2271 = vst [vmem:[#allocation3 + $0x151] sm:$0xff] %v2184_v26  ;;  %v2591_v26 = vld [vmem:[#allocation9 + $0xc8] sm:$0xff] }
 0x284   : > { %v6266_v44 = vld [vmem:[#allocation3 + $0x108] sm:$0xff] }
 0x285   : > { %2796 = vmatmul.f32.gmra.mxu2 %v6266_v44 }
 0x287   : > { %v2012_v20 = vpop.f32.mrf.mxu0 }
 0x288   : > { %v2013_v15 = vadd.f32 %v6147_v31, %v2012_v20 }
 0x289   : > { %3099 = vmatmul.f32.gmra.mxu0 %v6084_v45  ;;  %v2597_v45 = vld [vmem:[#allocation9 + $0xf8] sm:$0xff] }
 0x28a   : > { %v6274_v25 = vadd.f32 %v6154_v21, %v2013_v15  ;;  %v6287_v21 = vpop.f32.mrf.mxu2  ;;  %2827 = vmatpush.msrb.mxu3 %v2597_v45  ;;  %v6335_v45 = vld [vmem:[#allocation3 + $0x39] sm:$0xff] }
 0x28b   : > { %7369 = vst [vmem:[#allocation17_spill] sm:$0xff] %v6287_v21  ;;  %v2663_v21 = vld [vmem:[#allocation9 + $0x308] sm:$0xff] }
 0x28c   : > { %v7348_v38 = vmax.f32 %v6274_v25, 0.0  ;;  %2828 = vmatpush.msrb.mxu3 %v2596_v43 }
 0x28e   : > { %2266 = vst [vmem:[#allocation3 + $0x111] sm:$0xff] %v7348_v38  ;;  %2829 = vmatpush.msrb.mxu3 %v2595_v53  ;;  %v2675_v38 = vld [vmem:[#allocation9 + $0x368] sm:$0xff] }
 0x290   : > { %2830 = vmatpush.msrb.mxu3 %v2594_v48 }
 0x291   : > { %3102 = vmatmul.f32.gmra.mxu0 %v6101_v58  ;;  %v6292_v58 = vpop.f32.mrf.mxu1 }
 0x292   : > { %v6296_v47 = vpop.f32.mrf.mxu2  ;;  %2831 = vmatpush.msrb.mxu3 %v2593_v37  ;;  %v6350_v37 = vld [vmem:[#allocation3 + $0x49] sm:$0xff] }
 0x293   : > { %7370 = vst [vmem:[#allocation18_spill] sm:$0xff] %v6296_v47 }
 0x294   : > { %2832 = vmatpush.msrb.mxu3 %v2592_v7 }
 0x295   : > { %v6284_v23 = vld [vmem:[#allocation3 + $0x110] sm:$0xff] }
 0x296   : > { %v2363_v3 = vld [vmem:[#allocation3 + $0x10a] sm:$0xff]  ;;  %2799 = vmatmul.f32.gmra.mxu2 %v6284_v23  ;;  %v2364_v60 = vld [vmem:[#allocation3 + $0x112] sm:$0xff]  ;;  %2833 = vmatpush.msrb.mxu3 %v2591_v26 }
 0x297   : > { %3022 = vmatmul.f32.gmra.mxu1 %v2363_v3 }
 0x299   : > { %3105 = vmatmul.f32.gmra.mxu0 %v6118_v42  ;;  %v6307_v50 = vpop.f32.mrf.mxu1 }
 0x29d   : > { %v2015_v62 = vpop.f32.mrf.mxu0 }
 0x29e   : > { %v2016_v22 = vadd.f32 %v6147_v31, %v2015_v62  ;;  %3182 = vmatmul.f32.vlgmr.msrb.gmra.mxu2 %v6290_v12 }
 0x29f   : > { %3025 = vmatmul.f32.gmra.mxu1 %v2364_v60 }
 0x2a0   : > { %v6299_v28 = vadd.f32 %v6178_v24, %v2016_v22  ;;  %v6310_v24 = vpop.f32.mrf.mxu2 }
 0x2a1   : > { %3108 = vmatmul.f32.gmra.mxu0 %v6129_v40  ;;  %7371 = vst [vmem:[#allocation19_spill] sm:$0xff] %v6310_v24  ;;  %v6313_v40 = vpop.f32.mrf.mxu3  ;;  %v6322_v27 = vpop.f32.mrf.mxu1  ;;  %v2368_v24 = vld [vmem:[#allocation3 + $0x142] sm:$0xff] }
 0x2a2   : > { %v7347_v42 = vmax.f32 %v6299_v28, 0.0  ;;  %7372 = vst [vmem:[#allocation20_spill] sm:$0xff] %v6322_v27 }
 0x2a4   : > { %2267 = vst [vmem:[#allocation3 + $0x121] sm:$0xff] %v7347_v42  ;;  %v6363_v42 = vld [vmem:[#allocation3 + $0x51] sm:$0xff] }
 0x2a6   : > { %3185 = vmatmul.f32.gmra.mxu2 %v6305_v56 }
 0x2a8   : > { %v6328_v20 = vpop.f32.mrf.mxu2 }
 0x2a9   : > { %3111 = vmatmul.f32.gmra.mxu0 %v6159_v1  ;;  %7373 = vst [vmem:[#allocation21_spill] sm:$0xff] %v6328_v20  ;;  %v6330_v15 = vpop.f32.mrf.mxu3  ;;  %v6341_v62 = vpop.f32.mrf.mxu1 }
 0x2aa   : > { %7374 = vst [vmem:[#allocation22_spill] sm:$0xff] %v6341_v62  ;;  %v2647_v62 = vld [vmem:[#allocation9 + $0x288] sm:$0xff] }
 0x2ab   : > { %v6315_v54 = vld [vmem:[#allocation3 + $0x120] sm:$0xff] }
 0x2ac   : > { %2802 = vmatmul.f32.vlgmr.msra.gmra.mxu3 %v6315_v54 }
 0x2ae   : > { %v2018_v5 = vpop.f32.mrf.mxu0  ;;  %3188 = vmatmul.f32.gmra.mxu2 %v6318_v57 }
 0x2af   : > { %v2019_v9 = vadd.f32 %v6147_v31, %v2018_v5  ;;  %v2587_v5 = vld [vmem:[#allocation9 + $0xa8] sm:$0xff] }
 0x2b0   : > { %v6347_v48 = vpop.f32.mrf.mxu2 }
 0x2b1   : > { %v6325_v1 = vadd.f32 %v6203_v8, %v2019_v9  ;;  %3114 = vmatmul.f32.gmra.mxu0 %v6181_v4  ;;  %v2590_v8 = vld [vmem:[#allocation9 + $0xc0] sm:$0xff]  ;;  %v2589_v4 = vld [vmem:[#allocation9 + $0xb8] sm:$0xff]  ;;  %7375 = vst [vmem:[#allocation23_spill] sm:$0xff] %v6347_v48  ;;  %v2668_v48 = vld [vmem:[#allocation9 + $0x330] sm:$0xff] }
 0x2b2   : > { %2834 = vmatpush.msrb.mxu3 %v2590_v8  ;;  %v2677_v9 = vld [vmem:[#allocation9 + $0x378] sm:$0xff]  ;;  %v2676_v8 = vld [vmem:[#allocation9 + $0x370] sm:$0xff] }
 0x2b3   : > { %v7346_v3 = vmax.f32 %v6325_v1, 0.0  ;;  %3392 = vmatpush.msra.mxu1 %v2677_v9  ;;  %v2586_v9 = vld [vmem:[#allocation9 + $0xa0] sm:$0xff] }
 0x2b4   : > { %v6343_v60 = vpop.f32.mrf.mxu3  ;;  %2835 = vmatpush.msrb.mxu3 %v2589_v4  ;;  %v6358_v4 = vpop.f32.mrf.mxu1 }
 0x2b5   : > { %2268 = vst [vmem:[#allocation3 + $0x129] sm:$0xff] %v7346_v3  ;;  %3393 = vmatpush.msra.mxu1 %v2676_v8  ;;  %v2673_v8 = vld [vmem:[#allocation9 + $0x358] sm:$0xff] }
 0x2b6   : > { %v6337_v43 = vpop.f32.mrf.mxu0  ;;  %3191 = vmatmul.f32.gmra.mxu2 %v6335_v45  ;;  %7376 = vst [vmem:[#allocation24_spill] sm:$0xff] %v6358_v4 }
 0x2b7   : > { %3394 = vmatpush.msra.mxu1 %v2675_v38  ;;  %v6376_v38 = vld [vmem:[#allocation3 + $0x61] sm:$0xff] }
 0x2b9   : > { %3117 = vmatmul.f32.gmra.mxu0 %v6198_v29  ;;  %v2588_v29 = vld [vmem:[#allocation9 + $0xb0] sm:$0xff] }
 0x2ba   : > { %2836 = vmatpush.msrb.mxu3 %v2588_v29  ;;  %v6368_v29 = vpop.f32.mrf.mxu2 }
 0x2bb   : > { %7377 = vst [vmem:[#allocation25_spill] sm:$0xff] %v6368_v29 }
 0x2bc   : > { %v6345_v22 = vld [vmem:[#allocation3 + $0x128] sm:$0xff]  ;;  %2837 = vmatpush.msrb.mxu3 %v2587_v5  ;;  %v2674_v5 = vld [vmem:[#allocation9 + $0x360] sm:$0xff]  ;;  %v6378_v39 = vpop.f32.mrf.mxu1 }
 0x2bd   : > { %v2365_v53 = vld [vmem:[#allocation3 + $0x122] sm:$0xff]  ;;  %2805 = vmatmul.f32.gmra.mxu3 %v6345_v22  ;;  %v2366_v3 = vld [vmem:[#allocation3 + $0x12a] sm:$0xff]  ;;  %3395 = vmatpush.msra.mxu1 %v2674_v5  ;;  %7378 = vst [vmem:[#allocation26_spill] sm:$0xff] %v6378_v39 }
 0x2be   : > { %3028 = vmatmul.f32.gmra.mxu1 %v2365_v53  ;;  %v6352_v7 = vpop.f32.mrf.mxu0  ;;  %3194 = vmatmul.f32.gmra.mxu2 %v6350_v37  ;;  %v6360_v53 = vld [vmem:[#allocation3 + $0x138] sm:$0xff]  ;;  %v2671_v5 = vld [vmem:[#allocation9 + $0x348] sm:$0xff] }
 0x2bf   : > { %2838 = vmatpush.msrb.mxu3 %v2586_v9  ;;  %3396 = vmatpush.msra.mxu1 %v2673_v8  ;;  %v2670_v9 = vld [vmem:[#allocation9 + $0x340] sm:$0xff]  ;;  %v2583_v8 = vld [vmem:[#allocation9 + $0x88] sm:$0xff] }
 0x2c1   : > { %3120 = vmatmul.f32.gmra.mxu0 %v6214_v10  ;;  %2839 = vmatpush.msrb.mxu3 %v2585_v36  ;;  %v2584_v36 = vld [vmem:[#allocation9 + $0x90] sm:$0xff] }
 0x2c2   : > { %3397 = vmatpush.msra.mxu1 %v2672_v63  ;;  %v6383_v55 = vpop.f32.mrf.mxu2  ;;  %v2031_v63 = vadd.f32 %v6147_v31, %v6313_v40 }
 0x2c3   : > { %v6356_v26 = vpop.f32.mrf.mxu3  ;;  %7379 = vst [vmem:[#allocation27_spill] sm:$0xff] %v6383_v55  ;;  %2840 = vmatpush.msrb.mxu3 %v2584_v36  ;;  %v2664_v55 = vld [vmem:[#allocation9 + $0x310] sm:$0xff] }
 0x2c4   : > { %3398 = vmatpush.msra.mxu1 %v2671_v5  ;;  %v6390_v5 = vld [vmem:[#allocation3 + $0x150] sm:$0xff] }
 0x2c5   : > { %2808 = vmatmul.f32.gmra.mxu3 %v6360_v53 }
 0x2c6   : > { %3031 = vmatmul.f32.gmra.mxu1 %v2366_v3  ;;  %v6365_v10 = vpop.f32.mrf.mxu0  ;;  %3197 = vmatmul.f32.gmra.mxu2 %v6363_v42 }
 0x2c7   : > { %3399 = vmatpush.msra.mxu1 %v2670_v9  ;;  %2841 = vmatpush.msrb.mxu3 %v2583_v8  ;;  %v6393_v9 = vld [vmem:[#allocation3 + $0x69] sm:$0xff]  ;;  %v2582_v8 = vld [vmem:[#allocation9 + $0x80] sm:$0xff] }
 0x2c9   : > { %3123 = vmatmul.f32.gmra.mxu0 %v6225_v34  ;;  %2842 = vmatpush.msrb.mxu3 %v2582_v8 }
 0x2cb   : > { %v6371_v3 = vpop.f32.mrf.mxu3 }
 0x2cd   : > { %2811 = vmatmul.f32.gmra.mxu3 %v6373_v30 }
 0x2ce   : > { %3034 = vmatmul.f32.gmra.mxu1 %v2367_v46  ;;  %v6380_v34 = vpop.f32.mrf.mxu0  ;;  %3200 = vmatmul.f32.gmra.mxu2 %v6376_v38  ;;  %v2669_v46 = vld [vmem:[#allocation9 + $0x338] sm:$0xff] }
 0x2cf   : > { %3400 = vmatpush.msra.mxu1 %v2669_v46  ;;  %v6399_v46 = vpop.f32.mrf.mxu1 }
 0x2d0   : > { %7380 = vst [vmem:[#allocation28_spill] sm:$0xff] %v6399_v46 }
 0x2d1   : > { %3126 = vmatmul.f32.gmra.mxu0 %v6247_v61  ;;  %3401 = vmatpush.msra.mxu1 %v2668_v48  ;;  %v2667_v61 = vld [vmem:[#allocation9 + $0x328] sm:$0xff]  ;;  %v6403_v48 = vpop.f32.mrf.mxu2 }
 0x2d2   : > { %7381 = vst [vmem:[#allocation29_spill] sm:$0xff] %v6403_v48 }
 0x2d3   : > { %v2143_v29 = vpop.f32.mrf.mxu3  ;;  %3402 = vmatpush.msra.mxu1 %v2667_v61  ;;  %v2034_v61 = vadd.f32 %v6147_v31, %v6330_v15 }
 0x2d4   : > { %v6388_v20 = vadd.f32 %v2143_v29, %v2031_v63  ;;  %v2666_v29 = vld [vmem:[#allocation9 + $0x320] sm:$0xff]  ;;  %v2665_v63 = vld [vmem:[#allocation9 + $0x318] sm:$0xff] }
 0x2d5   : > { %2814 = vmatmul.f32.gmra.mxu3 %v6390_v5  ;;  %3403 = vmatpush.msra.mxu1 %v2666_v29  ;;  %v2662_v29 = vld [vmem:[#allocation9 + $0x300] sm:$0xff] }
 0x2d6   : > { %3037 = vmatmul.f32.gmra.mxu1 %v2368_v24  ;;  %v7355_v36 = vmax.f32 %v6388_v20, 0.0  ;;  %3203 = vmatmul.f32.gmra.mxu2 %v6393_v9  ;;  %v6397_v40 = vpop.f32.mrf.mxu0  ;;  %v2661_v24 = vld [vmem:[#allocation9 + $0x2f8] sm:$0xff] }
 0x2d7   : > { %3279 = vmatpush.msra.mxu3 %v2661_v24  ;;  %3404 = vmatpush.msra.mxu1 %v2665_v63  ;;  %v6416_v15 = vpop.f32.mrf.mxu1 }
 0x2d8   : > { %2272 = vst [vmem:[#allocation3 + $0x159] sm:$0xff] %v7355_v36  ;;  %v6410_v36 = vld [vmem:[#allocation3 + $0x79] sm:$0xff] }
 0x2d9   : > { %3129 = vmatmul.f32.gmra.mxu0 %v6266_v44  ;;  %3405 = vmatpush.msra.mxu1 %v2664_v55  ;;  %v2709_v44 = vld [vmem:[#allocation9 + $0x478] sm:$0xff]  ;;  %7382 = vst [vmem:[#allocation30_spill] sm:$0xff] %v6416_v15  ;;  %v6426_v63 = vpop.f32.mrf.mxu2  ;;  %v6430_v15 = vld [vmem:[#allocation3 + $0x81] sm:$0xff] }
 0x2da   : > { %3618 = vmatpush.msra.mxu2 %v2709_v44  ;;  %7384 = vst [vmem:[#allocation32_spill] sm:$0xff] %v6426_v63 }
 0x2db   : > { %v2146_v47 = vpop.f32.mrf.mxu3  ;;  %3406 = vmatpush.msra.mxu1 %v2663_v21  ;;  %v2693_v21 = vld [vmem:[#allocation9 + $0x3f8] sm:$0xff] }
 0x2dc   : > { %v6408_v46 = vadd.f32 %v2146_v47, %v2034_v61  ;;  %v2037_v47 = vadd.f32 %v6147_v31, %v6343_v60  ;;  %3505 = vmatpush.msra.mxu0 %v2693_v21  ;;  %v2660_v60 = vld [vmem:[#allocation9 + $0x2f0] sm:$0xff]  ;;  %v2040_v21 = vadd.f32 %v6147_v31, %v6356_v26 }
 0x2dd   : > { %3407 = vmatpush.msra.mxu1 %v2662_v29  ;;  %3280 = vmatpush.msra.mxu3 %v2660_v60  ;;  %v2692_v26 = vld [vmem:[#allocation9 + $0x3f0] sm:$0xff]  ;;  %v2043_v60 = vadd.f32 %v6147_v31, %v6371_v3  ;;  %v2659_v31 = vld [vmem:[#allocation9 + $0x2e8] sm:$0xff] }
 0x2de   : > { %v7356_v8 = vmax.f32 %v6408_v46, 0.0  ;;  %3206 = vmatmul.f32.gmra.mxu2 %v6410_v36  ;;  %v6421_v55 = vpop.f32.mrf.mxu0  ;;  %3506 = vmatpush.msra.mxu0 %v2692_v26  ;;  %v6477_v3 = vld [vmem:[#allocation3 + $0xa9] sm:$0xff] }
 0x2df   : > { %v6414_v24 = vld [vmem:[#allocation3 + $0x158] sm:$0xff]  ;;  %7383 = vst [vmem:[#allocation31_spill] sm:$0xff] %v6421_v55  ;;  %v6440_v29 = vpop.f32.mrf.mxu1  ;;  %3281 = vmatpush.msra.mxu3 %v2659_v31  ;;  %v2310_v26 = vld [vmem:[#allocation3 + $0x9] sm:$0xff] }
 0x2e0   : > { %v2369_v48 = vld [vmem:[#allocation3 + $0x152] sm:$0xff]  ;;  %2273 = vst [vmem:[#allocation3 + $0x169] sm:$0xff] %v7356_v8  ;;  %2817 = vmatmul.f32.gmra.mxu3 %v6414_v24  ;;  %v2334_v55 = vld [vmem:[#allocation3 + $0x129] sm:$0xff] }
 0x2e1   : > { %3040 = vmatmul.f32.gmra.mxu1 %v2369_v48  ;;  %3132 = vmatmul.f32.gmra.mxu0 %v6284_v23  ;;  %v2370_v23 = vld [vmem:[#allocation3 + $0x15a] sm:$0xff]  ;;  %7385 = vst [vmem:[#allocation33_spill] sm:$0xff] %v6440_v29  ;;  %v6448_v39 = vpop.f32.mrf.mxu2  ;;  %v2688_v31 = vld [vmem:[#allocation9 + $0x3d0] sm:$0xff] }
 0x2e2   : > { %7387 = vst [vmem:[#allocation35_spill] sm:$0xff] %v6448_v39 }
 0x2e3   : > { %v2149_v61 = vpop.f32.mrf.mxu3 }
 0x2e4   : > { %v6428_v44 = vadd.f32 %v2149_v61, %v2037_v47 }
 0x2e6   : > { %v7357_v8 = vmax.f32 %v6428_v44, 0.0  ;;  %3209 = vmatmul.f32.gmra.mxu2 %v6430_v15  ;;  %v6444_v47 = vpop.f32.mrf.mxu0 }
 0x2e7   : > { %v6434_v48 = vld [vmem:[#allocation3 + $0x168] sm:$0xff]  ;;  %7386 = vst [vmem:[#allocation34_spill] sm:$0xff] %v6444_v47 }
 0x2e8   : > { %2274 = vst [vmem:[#allocation3 + $0x171] sm:$0xff] %v7357_v8  ;;  %2820 = vmatmul.f32.gmra.mxu3 %v6434_v48  ;;  %v6450_v8 = vld [vmem:[#allocation3 + $0x91] sm:$0xff] }
 0x2e9   : > { %3043 = vmatmul.f32.gmra.mxu1 %v2370_v23  ;;  %3135 = vmatmul.f32.gmra.mxu0 %v6315_v54  ;;  %v2708_v54 = vld [vmem:[#allocation9 + $0x470] sm:$0xff] }
 0x2ea   : > { %3619 = vmatpush.msra.mxu2 %v2708_v54  ;;  %v6468_v54 = vld [vmem:[#allocation3 + $0x99] sm:$0xff] }
 0x2eb   : > { %v2152_v61 = vpop.f32.mrf.mxu3 }
 0x2ec   : > { %v6446_v63 = vadd.f32 %v2152_v61, %v2040_v21  ;;  %v6462_v61 = vpop.f32.mrf.mxu1 }
 0x2ed   : > { %7388 = vst [vmem:[#allocation36_spill] sm:$0xff] %v6462_v61  ;;  %v2707_v61 = vld [vmem:[#allocation9 + $0x468] sm:$0xff] }
 0x2ee   : > { %v7358_v23 = vmax.f32 %v6446_v63, 0.0  ;;  %3212 = vmatmul.f32.gmra.mxu2 %v6450_v8  ;;  %v6466_v4 = vpop.f32.mrf.mxu0 }
 0x2ef   : > { %v6454_v13 = vld [vmem:[#allocation3 + $0x170] sm:$0xff]  ;;  %7389 = vst [vmem:[#allocation37_spill] sm:$0xff] %v6466_v4  ;;  %3620 = vmatpush.msra.mxu2 %v2707_v61 }
 0x2f0   : > { %v2371_v29 = vld [vmem:[#allocation3 + $0x16a] sm:$0xff]  ;;  %2275 = vst [vmem:[#allocation3 + $0x181] sm:$0xff] %v7358_v23  ;;  %2823 = vmatmul.f32.gmra.mxu3 %v6454_v13  ;;  %v2309_v23 = vld [vmem:[#allocation3 + $0x1] sm:$0xff] }
 0x2f1   : > { %3046 = vmatmul.f32.gmra.mxu1 %v2371_v29  ;;  %3138 = vmatmul.f32.gmra.mxu0 %v6345_v22  ;;  %v6472_v22 = vpop.f32.mrf.mxu2  ;;  %v2372_v29 = vld [vmem:[#allocation3 + $0x172] sm:$0xff] }
 0x2f2   : > { %7390 = vst [vmem:[#allocation38_spill] sm:$0xff] %v6472_v22  ;;  %v2470_v4 = vld [vmem:[#allocation3 + $0x30] sm:$0xff] }
 0x2f3   : > { %v2155_v21 = vpop.f32.mrf.mxu3 }
 0x2f4   : > { %v6464_v39 = vadd.f32 %v2155_v21, %v2043_v60  ;;  %v6479_v60 = vpop.f32.mrf.mxu1  ;;  %v2691_v21 = vld [vmem:[#allocation9 + $0x3e8] sm:$0xff] }
 0x2f5   : > { %7391 = vst [vmem:[#allocation39_spill] sm:$0xff] %v6479_v60  ;;  %3507 = vmatpush.msra.mxu0 %v2691_v21  ;;  %v2471_v60 = vld [vmem:[#allocation3 + $0x38] sm:$0xff] }
 0x2f6   : > { %v7359_v47 = vmax.f32 %v6464_v39, 0.0  ;;  %3215 = vmatmul.f32.gmra.mxu2 %v6468_v54  ;;  %v6482_v22 = vpop.f32.mrf.mxu0 }
 0x2f7   : > { %7392 = vst [vmem:[#allocation40_spill] sm:$0xff] %v6482_v22  ;;  %v2687_v22 = vld [vmem:[#allocation9 + $0x3c8] sm:$0xff] }
 0x2f8   : > { %2276 = vst [vmem:[#allocation3 + $0x189] sm:$0xff] %v7359_v47  ;;  %2843 = vmatmul.f32.vlgmr.msrb.gmra.mxu3 %v2309_v23  ;;  %v2690_v23 = vld [vmem:[#allocation9 + $0x3e0] sm:$0xff]  ;;  %v6487_v47 = vld [vmem:[#allocation3 + $0xb1] sm:$0xff] }
 0x2f9   : > { %3049 = vmatmul.f32.gmra.mxu1 %v2372_v29  ;;  %3141 = vmatmul.f32.gmra.mxu0 %v6360_v53  ;;  %v6484_v29 = vpop.f32.mrf.mxu2  ;;  %v2689_v53 = vld [vmem:[#allocation9 + $0x3d8] sm:$0xff] }
 0x2fa   : > { %7393 = vst [vmem:[#allocation41_spill] sm:$0xff] %v6484_v29  ;;  %3508 = vmatpush.msra.mxu0 %v2690_v23  ;;  %v2685_v23 = vld [vmem:[#allocation9 + $0x3b8] sm:$0xff] }
 0x2fb   : > { %v2681_v29 = vld [vmem:[#allocation9 + $0x398] sm:$0xff] }
 0x2fc   : > { %3509 = vmatpush.msra.mxu0 %v2689_v53  ;;  %v6490_v21 = vpop.f32.mrf.mxu1  ;;  %v6498_v53 = vld [vmem:[#allocation3 + $0xc1] sm:$0xff] }
 0x2fd   : > { %7394 = vst [vmem:[#allocation42_spill] sm:$0xff] %v6490_v21 }
 0x2fe   : > { %3218 = vmatmul.f32.gmra.mxu2 %v6477_v3  ;;  %3510 = vmatpush.msra.mxu0 %v2688_v31  ;;  %v2706_v31 = vld [vmem:[#allocation9 + $0x460] sm:$0xff] }
 0x2ff   : > { %3621 = vmatpush.msra.mxu2 %v2706_v31  ;;  %v2473_v31 = vld [vmem:[#allocation3 + $0x50] sm:$0xff] }
 0x300   : > { %2846 = vmatmul.f32.gmra.mxu3 %v2310_v26  ;;  %v2686_v26 = vld [vmem:[#allocation9 + $0x3c0] sm:$0xff]  ;;  %3511 = vmatpush.msra.mxu0 %v2687_v22 }
 0x301   : > { %3408 = vmatmul.f32.vlgmr.msra.gmra.mxu1 %v2470_v4  ;;  %3144 = vmatmul.f32.gmra.mxu0 %v6373_v30  ;;  %v2658_v4 = vld [vmem:[#allocation9 + $0x2e0] sm:$0xff]  ;;  %v6493_v61 = vpop.f32.mrf.mxu2  ;;  %v6495_v30 = vpop.f32.mrf.mxu0 }
 0x302   : > { %7395 = vst [vmem:[#allocation43_spill] sm:$0xff] %v6493_v61  ;;  %3282 = vmatpush.msra.mxu3 %v2658_v4  ;;  %3512 = vmatpush.msra.mxu0 %v2686_v26  ;;  %v2682_v26 = vld [vmem:[#allocation9 + $0x3a0] sm:$0xff] }
 0x303   : > { %7396 = vst [vmem:[#allocation44_spill] sm:$0xff] %v6495_v30  ;;  %v2484_v30 = vld [vmem:[#allocation3 + $0xd8] sm:$0xff] }
 0x304   : > { %3513 = vmatpush.msra.mxu0 %v2685_v23  ;;  %v6505_v22 = vpop.f32.mrf.mxu1  ;;  %v7400_v23 = vmax.f32 %v6152_v11, 0.0 }
 0x305   : > { %7398 = vst [vmem:[#allocation46_spill] sm:$0xff] %v6505_v22  ;;  %v2678_v22 = vld [vmem:[#allocation9 + $0x380] sm:$0xff] }
 0x306   : > { %3221 = vmatmul.f32.gmra.mxu2 %v6487_v47 }
 0x308   : > { %2849 = vmatmul.f32.gmra.mxu3 %v6290_v12  ;;  %v2472_v12 = vld [vmem:[#allocation3 + $0x48] sm:$0xff] }
 0x309   : > { %3411 = vmatmul.f32.gmra.mxu1 %v2471_v60  ;;  %3147 = vmatmul.f32.gmra.mxu0 %v6390_v5  ;;  %v2684_v60 = vld [vmem:[#allocation9 + $0x3b0] sm:$0xff]  ;;  %v6502_v61 = vpop.f32.mrf.mxu2  ;;  %v2683_v5 = vld [vmem:[#allocation9 + $0x3a8] sm:$0xff]  ;;  %v6507_v4 = vpop.f32.mrf.mxu0 }
 0x30a   : > { %7397 = vst [vmem:[#allocation45_spill] sm:$0xff] %v6502_v61  ;;  %3514 = vmatpush.msra.mxu0 %v2684_v60  ;;  %v2680_v61 = vld [vmem:[#allocation9 + $0x390] sm:$0xff] }
 0x30b   : > { %7399 = vst [vmem:[#allocation47_spill] sm:$0xff] %v6507_v4  ;;  %v2700_v4 = vld [vmem:[#allocation9 + $0x430] sm:$0xff] }
 0x30c   : > { %3515 = vmatpush.msra.mxu0 %v2683_v5  ;;  %v6515_v60 = vpop.f32.mrf.mxu1  ;;  %v2679_v5 = vld [vmem:[#allocation9 + $0x388] sm:$0xff] }
 0x30d   : > { %7401 = vst [vmem:[#allocation48_spill] sm:$0xff] %v6515_v60 }
 0x30e   : > { %3224 = vmatmul.f32.gmra.mxu2 %v6498_v53  ;;  %3516 = vmatpush.msra.mxu0 %v2682_v26  ;;  %v7403_v26 = vmax.f32 %v6174_v59, 0.0 }
 0x310   : > { %2852 = vmatmul.f32.gmra.mxu3 %v6305_v56  ;;  %v2657_v56 = vld [vmem:[#allocation9 + $0x2d8] sm:$0xff]  ;;  %3517 = vmatpush.msra.mxu0 %v2681_v29 }
 0x311   : > { %3414 = vmatmul.f32.gmra.mxu1 %v2472_v12  ;;  %3150 = vmatmul.f32.gmra.mxu0 %v6414_v24  ;;  %v6517_v11 = vpop.f32.mrf.mxu0 }
 0x312   : > { %3283 = vmatpush.msra.mxu3 %v2657_v56  ;;  %3518 = vmatpush.msra.mxu0 %v2680_v61  ;;  %7402 = vst [vmem:[#allocation49_spill] sm:$0xff] %v6517_v11  ;;  %v7405_v61 = vmax.f32 %v6194_v41, 0.0  ;;  %v2704_v41 = vld [vmem:[#allocation9 + $0x450] sm:$0xff] }
 0x313   : > { %v6631_v11 = vld [vmem:[#allocation3 + $0x151] sm:$0xff] }
 0x314   : > { %3519 = vmatpush.msra.mxu0 %v2679_v5  ;;  %v6525_v29 = vpop.f32.mrf.mxu1  ;;  %v2475_v5 = vld [vmem:[#allocation3 + $0x68] sm:$0xff] }
 0x315   : > { %7404 = vst [vmem:[#allocation50_spill] sm:$0xff] %v6525_v29  ;;  %v7408_v29 = vmax.f32 %v6209_v17, 0.0 }
 0x316   : > { %3227 = vmatmul.f32.gmra.mxu2 %v7400_v23  ;;  %v2705_v23 = vld [vmem:[#allocation9 + $0x458] sm:$0xff]  ;;  %3520 = vmatpush.msra.mxu0 %v2678_v22 }
 0x317   : > { %3622 = vmatpush.msra.mxu2 %v2705_v23 }
 0x318   : > { %2855 = vmatmul.f32.gmra.mxu3 %v6318_v57 }
 0x319   : > { %3417 = vmatmul.f32.gmra.mxu1 %v2473_v31  ;;  %v6512_v12 = vpop.f32.mrf.mxu2  ;;  %3153 = vmatmul.f32.gmra.mxu0 %v6434_v48  ;;  %v2474_v31 = vld [vmem:[#allocation3 + $0x60] sm:$0xff]  ;;  %v6529_v59 = vpop.f32.mrf.mxu0 }
 0x31a   : > { %7406 = vst [vmem:[#allocation51_spill] sm:$0xff] %v6529_v59  ;;  %3623 = vmatpush.msra.mxu2 %v2704_v41  ;;  %v7414_v59 = vmax.f32 %v6254_v33, 0.0  ;;  %v2479_v33 = vld [vmem:[#allocation3 + $0x98] sm:$0xff] }
 0x31c   : > { %v6537_v22 = vpop.f32.mrf.mxu1 }
 0x31d   : > { %7407 = vst [vmem:[#allocation52_spill] sm:$0xff] %v6537_v22  ;;  %v2477_v22 = vld [vmem:[#allocation3 + $0x80] sm:$0xff] }
 0x31e   : > { %3230 = vmatmul.f32.gmra.mxu2 %v7403_v26  ;;  %v6532_v26 = vld [vmem:[#allocation3 + $0x180] sm:$0xff] }
 0x320   : > { %2858 = vmatmul.f32.gmra.mxu3 %v6335_v45 }
 0x321   : > { %3420 = vmatmul.f32.gmra.mxu1 %v2474_v31  ;;  %3156 = vmatmul.f32.gmra.mxu0 %v6454_v13  ;;  %v6523_v56 = vpop.f32.mrf.mxu2  ;;  %v2656_v31 = vld [vmem:[#allocation9 + $0x2d0] sm:$0xff]  ;;  %v6544_v60 = vpop.f32.mrf.mxu0 }
 0x322   : > { %3284 = vmatpush.msra.mxu3 %v2656_v31  ;;  %7409 = vst [vmem:[#allocation53_spill] sm:$0xff] %v6544_v60  ;;  %v7410_v31 = vmax.f32 %v6235_v6, 0.0  ;;  %v2703_v6 = vld [vmem:[#allocation9 + $0x448] sm:$0xff] }
 0x323   : > { %3624 = vmatpush.msra.mxu2 %v2703_v6  ;;  %v2654_v6 = vld [vmem:[#allocation9 + $0x2c0] sm:$0xff] }
 0x324   : > { %v6551_v17 = vpop.f32.mrf.mxu1 }
 0x325   : > { %7411 = vst [vmem:[#allocation54_spill] sm:$0xff] %v6551_v17 }
 0x326   : > { %3233 = vmatmul.f32.gmra.mxu2 %v7405_v61  ;;  %v2476_v61 = vld [vmem:[#allocation3 + $0x78] sm:$0xff] }
 0x328   : > { %2861 = vmatmul.f32.gmra.mxu3 %v6350_v37 }
 0x329   : > { %3423 = vmatmul.f32.gmra.mxu1 %v2475_v5  ;;  %3159 = vmatmul.f32.gmra.mxu0 %v6532_v26  ;;  %v6535_v23 = vpop.f32.mrf.mxu2  ;;  %v6542_v5 = vld [vmem:[#allocation3 + $0x188] sm:$0xff]  ;;  %v6559_v60 = vpop.f32.mrf.mxu0 }
 0x32a   : > { %7413 = vst [vmem:[#allocation56_spill] sm:$0xff] %v6559_v60 }
 0x32c   : > { %v6563_v17 = vpop.f32.mrf.mxu1 }
 0x32d   : > { %7415 = vst [vmem:[#allocation57_spill] sm:$0xff] %v6563_v17 }
 0x32e   : > { %3236 = vmatmul.f32.gmra.mxu2 %v7408_v29 }
 0x32f   : > { %v6553_v29 = vpop.f32.mrf.mxu3 }
 0x330   : > { %2864 = vmatmul.f32.gmra.mxu3 %v6363_v42  ;;  %7412 = vst [vmem:[#allocation55_spill] sm:$0xff] %v6553_v29 }
 0x331   : > { %3426 = vmatmul.f32.gmra.mxu1 %v2476_v61  ;;  %3162 = vmatmul.f32.gmra.mxu0 %v6542_v5  ;;  %v6547_v21 = vpop.f32.mrf.mxu2  ;;  %v2655_v61 = vld [vmem:[#allocation9 + $0x2c8] sm:$0xff] }
 0x332   : > { %3285 = vmatpush.msra.mxu3 %v2655_v61  ;;  %v7418_v61 = vmax.f32 %v6274_v25, 0.0 }
 0x334   : > { %3286 = vmatpush.msra.mxu3 %v2654_v6  ;;  %v7425_v6 = vmax.f32 %v6325_v1, 0.0  ;;  %v2701_v1 = vld [vmem:[#allocation9 + $0x438] sm:$0xff] }
 0x336   : > { %3239 = vmatmul.f32.gmra.mxu2 %v7410_v31  ;;  %v2478_v31 = vld [vmem:[#allocation3 + $0x90] sm:$0xff] }
 0x338   : > { %2867 = vmatmul.f32.gmra.mxu3 %v6376_v38 }
 0x339   : > { %3429 = vmatmul.f32.gmra.mxu1 %v2477_v22  ;;  %v6556_v41 = vpop.f32.mrf.mxu2  ;;  %3521 = vmatmul.f32.vlgmr.msra.gmra.mxu0 %v6318_v57  ;;  %v6571_v57 = vpop.f32.mrf.mxu0 }
 0x33a   : > { %7417 = vst [vmem:[#allocation59_spill] sm:$0xff] %v6571_v57  ;;  %v2702_v57 = vld [vmem:[#allocation9 + $0x440] sm:$0xff] }
 0x33b   : > { %3625 = vmatpush.msra.mxu2 %v2702_v57 }
 0x33d   : > { %3626 = vmatpush.msra.mxu2 %v2701_v1  ;;  %v2652_v1 = vld [vmem:[#allocation9 + $0x2b0] sm:$0xff] }
 0x33e   : > { %3242 = vmatmul.f32.gmra.mxu2 %v7414_v59 }
 0x33f   : > { %3627 = vmatpush.msra.mxu2 %v2700_v4 }
 0x340   : > { %v6565_v29 = vpop.f32.mrf.mxu3  ;;  %2870 = vmatmul.f32.gmra.mxu3 %v6393_v9 }
 0x341   : > { %3432 = vmatmul.f32.gmra.mxu1 %v2478_v31  ;;  %v6568_v22 = vpop.f32.mrf.mxu2  ;;  %3524 = vmatmul.f32.gmra.mxu0 %v6335_v45  ;;  %v6581_v31 = vpop.f32.mrf.mxu1  ;;  %v7421_v45 = vmax.f32 %v6299_v28, 0.0  ;;  %v2481_v28 = vld [vmem:[#allocation3 + $0xb0] sm:$0xff] }
 0x342   : > { %7416 = vst [vmem:[#allocation58_spill] sm:$0xff] %v6568_v22  ;;  %v6585_v25 = vpop.f32.mrf.mxu0 }
 0x343   : > { %7420 = vst [vmem:[#allocation61_spill] sm:$0xff] %v6581_v31 }
 0x344   : > { %7422 = vst [vmem:[#allocation62_spill] sm:$0xff] %v6585_v25  ;;  %v2483_v25 = vld [vmem:[#allocation3 + $0xc8] sm:$0xff] }
 0x346   : > { %3245 = vmatmul.f32.gmra.mxu2 %v7418_v61  ;;  %v2480_v61 = vld [vmem:[#allocation3 + $0xa8] sm:$0xff] }
 0x348   : > { %v6575_v59 = vpop.f32.mrf.mxu3  ;;  %2873 = vmatmul.f32.gmra.mxu3 %v6410_v36 }
 0x349   : > { %3435 = vmatmul.f32.gmra.mxu1 %v2479_v33  ;;  %v6578_v17 = vpop.f32.mrf.mxu2  ;;  %3527 = vmatmul.f32.gmra.mxu0 %v6350_v37  ;;  %v6593_v37 = vpop.f32.mrf.mxu1 }
 0x34a   : > { %7419 = vst [vmem:[#allocation60_spill] sm:$0xff] %v6578_v17  ;;  %v6598_v57 = vpop.f32.mrf.mxu0  ;;  %v2493_v17 = vld [vmem:[#allocation3 + $0x140] sm:$0xff] }
 0x34b   : > { %7424 = vst [vmem:[#allocation64_spill] sm:$0xff] %v6593_v37  ;;  %v6607_v37 = vld [vmem:[#allocation3 + $0x139] sm:$0xff] }
 0x34c   : > { %7426 = vst [vmem:[#allocation65_spill] sm:$0xff] %v6598_v57 }
 0x34e   : > { %3248 = vmatmul.f32.gmra.mxu2 %v7421_v45  ;;  %v2653_v45 = vld [vmem:[#allocation9 + $0x2b8] sm:$0xff] }
 0x34f   : > { %3287 = vmatpush.msra.mxu3 %v2653_v45 }
 0x350   : > { %2876 = vmatmul.f32.gmra.mxu3 %v6430_v15  ;;  %v6588_v33 = vpop.f32.mrf.mxu3 }
 0x351   : > { %3438 = vmatmul.f32.gmra.mxu1 %v2480_v61  ;;  %v6590_v60 = vpop.f32.mrf.mxu2  ;;  %3530 = vmatmul.f32.gmra.mxu0 %v6363_v42  ;;  %v6605_v42 = vpop.f32.mrf.mxu1 }
 0x352   : > { %7423 = vst [vmem:[#allocation63_spill] sm:$0xff] %v6590_v60  ;;  %3288 = vmatpush.msra.mxu3 %v2652_v1  ;;  %v2699_v1 = vld [vmem:[#allocation9 + $0x428] sm:$0xff]  ;;  %v2332_v60 = vld [vmem:[#allocation3 + $0x111] sm:$0xff] }
 0x353   : > { %7428 = vst [vmem:[#allocation67_spill] sm:$0xff] %v6605_v42  ;;  %v6620_v42 = vld [vmem:[#allocation3 + $0x141] sm:$0xff]  ;;  %3628 = vmatpush.msra.mxu2 %v2699_v1  ;;  %v2696_v1 = vld [vmem:[#allocation9 + $0x410] sm:$0xff] }
 0x356   : > { %3251 = vmatmul.f32.gmra.mxu2 %v7425_v6  ;;  %v2482_v6 = vld [vmem:[#allocation3 + $0xc0] sm:$0xff] }
 0x358   : > { %2879 = vmatmul.f32.gmra.mxu3 %v6450_v8  ;;  %v6603_v61 = vpop.f32.mrf.mxu3 }
 0x359   : > { %3441 = vmatmul.f32.gmra.mxu1 %v2481_v28  ;;  %v6600_v31 = vpop.f32.mrf.mxu2  ;;  %3533 = vmatmul.f32.gmra.mxu0 %v6376_v38  ;;  %v6614_v38 = vpop.f32.mrf.mxu0 }
 0x35a   : > { %7427 = vst [vmem:[#allocation66_spill] sm:$0xff] %v6600_v31  ;;  %v6618_v57 = vpop.f32.mrf.mxu1  ;;  %v2485_v31 = vld [vmem:[#allocation3 + $0xe0] sm:$0xff] }
 0x35b   : > { %7430 = vst [vmem:[#allocation69_spill] sm:$0xff] %v6614_v38 }
 0x35c   : > { %7431 = vst [vmem:[#allocation70_spill] sm:$0xff] %v6618_v57 }
 0x35e   : > { %3254 = vmatmul.f32.gmra.mxu2 %v6607_v37 }
 0x360   : > { %2882 = vmatmul.f32.gmra.mxu3 %v6468_v54 }
 0x361   : > { %3444 = vmatmul.f32.gmra.mxu1 %v2482_v6  ;;  %v6611_v28 = vpop.f32.mrf.mxu2  ;;  %3536 = vmatmul.f32.gmra.mxu0 %v6393_v9  ;;  %v6629_v38 = vpop.f32.mrf.mxu0 }
 0x362   : > { %7429 = vst [vmem:[#allocation68_spill] sm:$0xff] %v6611_v28  ;;  %v6633_v57 = vpop.f32.mrf.mxu1 }
 0x363   : > { %v6616_v45 = vpop.f32.mrf.mxu3  ;;  %7433 = vst [vmem:[#allocation72_spill] sm:$0xff] %v6629_v38  ;;  %v2698_v38 = vld [vmem:[#allocation9 + $0x420] sm:$0xff] }
 0x364   : > { %7434 = vst [vmem:[#allocation73_spill] sm:$0xff] %v6633_v57  ;;  %v2697_v57 = vld [vmem:[#allocation9 + $0x418] sm:$0xff]  ;;  %3629 = vmatpush.msra.mxu2 %v2698_v38  ;;  %v7440_v38 = vmax.f32 %v6408_v46, 0.0 }
 0x365   : > { %v2327_v46 = vld [vmem:[#allocation3 + $0xd9] sm:$0xff] }
 0x366   : > { %3257 = vmatmul.f32.gmra.mxu2 %v6620_v42 }
 0x367   : > { %3630 = vmatpush.msra.mxu2 %v2697_v57 }
 0x368   : > { %2885 = vmatmul.f32.gmra.mxu3 %v6477_v3 }
 0x369   : > { %3447 = vmatmul.f32.gmra.mxu1 %v2483_v25  ;;  %v6624_v6 = vpop.f32.mrf.mxu2  ;;  %3539 = vmatmul.f32.gmra.mxu0 %v6410_v36  ;;  %v6644_v28 = vpop.f32.mrf.mxu0 }
 0x36a   : > { %7432 = vst [vmem:[#allocation71_spill] sm:$0xff] %v6624_v6  ;;  %v7436_v6 = vmax.f32 %v6388_v20, 0.0  ;;  %v6646_v4 = vpop.f32.mrf.mxu1  ;;  %3631 = vmatpush.msra.mxu2 %v2696_v1  ;;  %v7444_v1 = vmax.f32 %v6428_v44, 0.0  ;;  %v2328_v44 = vld [vmem:[#allocation3 + $0xe1] sm:$0xff] }
 0x36b   : > { %v6627_v9 = vpop.f32.mrf.mxu3  ;;  %7437 = vst [vmem:[#allocation75_spill] sm:$0xff] %v6644_v28  ;;  %v2694_v28 = vld [vmem:[#allocation9 + $0x400] sm:$0xff] }
 0x36c   : > { %7438 = vst [vmem:[#allocation76_spill] sm:$0xff] %v6646_v4  ;;  %v2326_v4 = vld [vmem:[#allocation3 + $0xc9] sm:$0xff] }
 0x36e   : > { %3260 = vmatmul.f32.gmra.mxu2 %v6631_v11 }
 0x370   : > { %2888 = vmatmul.f32.gmra.mxu3 %v6487_v47 }
 0x371   : > { %3450 = vmatmul.f32.gmra.mxu1 %v2484_v30  ;;  %v6637_v25 = vpop.f32.mrf.mxu2  ;;  %3542 = vmatmul.f32.gmra.mxu0 %v6430_v15  ;;  %v2651_v30 = vld [vmem:[#allocation9 + $0x2a8] sm:$0xff] }
 0x372   : > { %7435 = vst [vmem:[#allocation74_spill] sm:$0xff] %v6637_v25  ;;  %3289 = vmatpush.msra.mxu3 %v2651_v30  ;;  %v2486_v25 = vld [vmem:[#allocation3 + $0xf0] sm:$0xff]  ;;  %v6661_v57 = vpop.f32.mrf.mxu1 }
 0x373   : > { %v6640_v36 = vpop.f32.mrf.mxu3  ;;  %7443 = vst [vmem:[#allocation80_spill] sm:$0xff] %v6661_v57 }
 0x376   : > { %3263 = vmatmul.f32.gmra.mxu2 %v7436_v6  ;;  %v2695_v6 = vld [vmem:[#allocation9 + $0x408] sm:$0xff] }
 0x377   : > { %3632 = vmatpush.msra.mxu2 %v2695_v6  ;;  %v2487_v6 = vld [vmem:[#allocation3 + $0xf8] sm:$0xff] }
 0x378   : > { %2891 = vmatmul.f32.gmra.mxu3 %v6498_v53 }
 0x379   : > { %3453 = vmatmul.f32.gmra.mxu1 %v2485_v31  ;;  %v6649_v15 = vpop.f32.mrf.mxu2  ;;  %3545 = vmatmul.f32.gmra.mxu0 %v6450_v8  ;;  %v6656_v31 = vpop.f32.mrf.mxu0 }
 0x37a   : > { %7439 = vst [vmem:[#allocation77_spill] sm:$0xff] %v6649_v15  ;;  %3633 = vmatpush.msra.mxu2 %v2694_v28  ;;  %v2650_v28 = vld [vmem:[#allocation9 + $0x2a0] sm:$0xff] }
 0x37b   : > { %v6652_v20 = vpop.f32.mrf.mxu3  ;;  %7441 = vst [vmem:[#allocation78_spill] sm:$0xff] %v6656_v31  ;;  %3290 = vmatpush.msra.mxu3 %v2650_v28  ;;  %v7448_v31 = vmax.f32 %v6446_v63, 0.0  ;;  %v2489_v63 = vld [vmem:[#allocation3 + $0x110] sm:$0xff] }
 0x37e   : > { %3266 = vmatmul.f32.gmra.mxu2 %v7440_v38 }
 0x380   : > { %2894 = vmatmul.f32.gmra.mxu3 %v2326_v4 }
 0x381   : > { %3456 = vmatmul.f32.gmra.mxu1 %v2486_v25  ;;  %v6658_v8 = vpop.f32.mrf.mxu2  ;;  %3548 = vmatmul.f32.gmra.mxu0 %v6468_v54  ;;  %v6670_v25 = vpop.f32.mrf.mxu1 }
 0x382   : > { %7442 = vst [vmem:[#allocation79_spill] sm:$0xff] %v6658_v8  ;;  %v6672_v54 = vpop.f32.mrf.mxu0 }
 0x383   : > { %v6663_v30 = vpop.f32.mrf.mxu3  ;;  %7446 = vst [vmem:[#allocation82_spill] sm:$0xff] %v6670_v25  ;;  %v7452_v25 = vmax.f32 %v6464_v39, 0.0 }
 0x384   : > { %7447 = vst [vmem:[#allocation83_spill] sm:$0xff] %v6672_v54  ;;  %v2329_v54 = vld [vmem:[#allocation3 + $0xf1] sm:$0xff] }
 0x386   : > { %3269 = vmatmul.f32.gmra.mxu2 %v7444_v1  ;;  %v2488_v1 = vld [vmem:[#allocation3 + $0x108] sm:$0xff] }
 0x388   : > { %2897 = vmatmul.f32.gmra.mxu3 %v2327_v46 }
 0x389   : > { %3459 = vmatmul.f32.gmra.mxu1 %v2487_v6  ;;  %v6667_v38 = vpop.f32.mrf.mxu2  ;;  %3551 = vmatmul.f32.gmra.mxu0 %v6477_v3  ;;  %v6683_v3 = vpop.f32.mrf.mxu1 }
 0x38a   : > { %7445 = vst [vmem:[#allocation81_spill] sm:$0xff] %v6667_v38  ;;  %v6685_v28 = vpop.f32.mrf.mxu0 }
 0x38b   : > { %v6674_v57 = vpop.f32.mrf.mxu3  ;;  %7450 = vst [vmem:[#allocation85_spill] sm:$0xff] %v6683_v3 }
 0x38c   : > { %7451 = vst [vmem:[#allocation86_spill] sm:$0xff] %v6685_v28  ;;  %v2490_v28 = vld [vmem:[#allocation3 + $0x120] sm:$0xff] }
 0x38e   : > { %3272 = vmatmul.f32.gmra.mxu2 %v7448_v31  ;;  %v2649_v31 = vld [vmem:[#allocation9 + $0x298] sm:$0xff] }
 0x38f   : > { %3291 = vmatpush.msra.mxu3 %v2649_v31  ;;  %v2331_v31 = vld [vmem:[#allocation3 + $0x109] sm:$0xff] }
 0x390   : > { %2900 = vmatmul.f32.gmra.mxu3 %v2328_v44 }
 0x391   : > { %3462 = vmatmul.f32.gmra.mxu1 %v2488_v1  ;;  %v6678_v6 = vpop.f32.mrf.mxu2  ;;  %3554 = vmatmul.f32.gmra.mxu0 %v6487_v47  ;;  %v6694_v1 = vld [vmem:[#allocation3 + $0x32] sm:$0xff]  ;;  %v6696_v3 = vpop.f32.mrf.mxu1 }
 0x392   : > { %7449 = vst [vmem:[#allocation84_spill] sm:$0xff] %v6678_v6  ;;  %v6699_v39 = vpop.f32.mrf.mxu0  ;;  %v2491_v6 = vld [vmem:[#allocation3 + $0x128] sm:$0xff] }
 0x393   : > { %v6681_v38 = vpop.f32.mrf.mxu3  ;;  %7454 = vst [vmem:[#allocation88_spill] sm:$0xff] %v6696_v3 }
 0x394   : > { %7455 = vst [vmem:[#allocation89_spill] sm:$0xff] %v6699_v39  ;;  %v2648_v39 = vld [vmem:[#allocation9 + $0x290] sm:$0xff] }
 0x395   : > { %3292 = vmatpush.msra.mxu3 %v2648_v39 }
 0x396   : > { %3275 = vmatmul.f32.gmra.mxu2 %v7452_v25  ;;  %v2330_v25 = vld [vmem:[#allocation3 + $0xf9] sm:$0xff] }
 0x397   : > { %3293 = vmatpush.msra.mxu3 %v2647_v62  ;;  %v6743_v62 = vld [vmem:[#allocation3 + $0x6a] sm:$0xff] }
 0x398   : > { %2903 = vmatmul.f32.gmra.mxu3 %v2329_v54 }
 0x399   : > { %3465 = vmatmul.f32.gmra.mxu1 %v2489_v63  ;;  %v6689_v8 = vpop.f32.mrf.mxu2  ;;  %3557 = vmatmul.f32.gmra.mxu0 %v6498_v53  ;;  %v6705_v53 = vld [vmem:[#allocation3 + $0x3a] sm:$0xff]  ;;  %v6708_v3 = vpop.f32.mrf.mxu1 }
 0x39a   : > { %7453 = vst [vmem:[#allocation87_spill] sm:$0xff] %v6689_v8  ;;  %v6710_v15 = vpop.f32.mrf.mxu0 }
 0x39b   : > { %v6692_v47 = vpop.f32.mrf.mxu3  ;;  %7457 = vst [vmem:[#allocation91_spill] sm:$0xff] %v6708_v3 }
 0x39c   : > { %7458 = vst [vmem:[#allocation92_spill] sm:$0xff] %v6710_v15 }
 0x39e   : > { %3634 = vmatmul.f32.vlgmr.msra.gmra.mxu2 %v6694_v1 }
 0x3a0   : > { %2906 = vmatmul.f32.gmra.mxu3 %v2330_v25 }
 0x3a1   : > { %3468 = vmatmul.f32.gmra.mxu1 %v2490_v28  ;;  %3560 = vmatmul.f32.gmra.mxu0 %v2326_v4  ;;  %v6701_v63 = vpop.f32.mrf.mxu2  ;;  %v6719_v3 = vpop.f32.mrf.mxu1 }
 0x3a2   : > { %7456 = vst [vmem:[#allocation90_spill] sm:$0xff] %v6701_v63  ;;  %v6716_v63 = vld [vmem:[#allocation3 + $0x4a] sm:$0xff] }
 0x3a3   : > { %v6703_v8 = vpop.f32.mrf.mxu3 }
 0x3a6   : > { %3637 = vmatmul.f32.gmra.mxu2 %v6705_v53 }
 0x3a8   : > { %2909 = vmatmul.f32.gmra.mxu3 %v2331_v31 }
 0x3a9   : > { %3471 = vmatmul.f32.gmra.mxu1 %v2491_v6  ;;  %3563 = vmatmul.f32.gmra.mxu0 %v2327_v46  ;;  %v6714_v28 = vpop.f32.mrf.mxu2  ;;  %v6721_v6 = vpop.f32.mrf.mxu0  ;;  %v6725_v46 = vld [vmem:[#allocation3 + $0x52] sm:$0xff] }
 0x3aa   : > { %7460 = vst [vmem:[#allocation94_spill] sm:$0xff] %v6714_v28  ;;  %v2333_v28 = vld [vmem:[#allocation3 + $0x121] sm:$0xff] }
 0x3ab   : > { %v6712_v4 = vpop.f32.mrf.mxu3  ;;  %7461 = vst [vmem:[#allocation95_spill] sm:$0xff] %v6721_v6 }
 0x3ac   : > { %7459 = vst [vmem:[#allocation93_spill] sm:$0xff] %v6712_v4  ;;  %v2494_v4 = vld [vmem:[#allocation3 + $0x150] sm:$0xff] }
 0x3ae   : > { %3640 = vmatmul.f32.gmra.mxu2 %v6716_v63 }
 0x3b0   : > { %2912 = vmatmul.f32.gmra.mxu3 %v2332_v60 }
 0x3b1   : > { %3474 = vmatmul.f32.gmra.mxu1 %v2492_v18  ;;  %3566 = vmatmul.f32.gmra.mxu0 %v2328_v44  ;;  %v6728_v39 = vpop.f32.mrf.mxu2  ;;  %v6732_v44 = vpop.f32.mrf.mxu1 }
 0x3b2   : > { %7463 = vst [vmem:[#allocation97_spill] sm:$0xff] %v6728_v39  ;;  %v6734_v6 = vpop.f32.mrf.mxu0 }
 0x3b3   : > { %v6723_v15 = vpop.f32.mrf.mxu3  ;;  %7465 = vst [vmem:[#allocation99_spill] sm:$0xff] %v6734_v6 }
 0x3b4   : > { %7462 = vst [vmem:[#allocation96_spill] sm:$0xff] %v6723_v15  ;;  %v6736_v15 = vld [vmem:[#allocation3 + $0x62] sm:$0xff] }
 0x3b6   : > { %3643 = vmatmul.f32.gmra.mxu2 %v6725_v46 }
 0x3b8   : > { %2915 = vmatmul.f32.gmra.mxu3 %v2333_v28 }
 0x3b9   : > { %3477 = vmatmul.f32.gmra.mxu1 %v2493_v17  ;;  %3569 = vmatmul.f32.gmra.mxu0 %v2329_v54  ;;  %v6739_v39 = vpop.f32.mrf.mxu2  ;;  %v6745_v54 = vpop.f32.mrf.mxu1 }
 0x3ba   : > { %7466 = vst [vmem:[#allocation100_spill] sm:$0xff] %v6739_v39  ;;  %v6748_v6 = vpop.f32.mrf.mxu0  ;;  %v6756_v39 = vld [vmem:[#allocation3 + $0x7a] sm:$0xff] }
 0x3bb   : > { %v6730_v18 = vpop.f32.mrf.mxu3  ;;  %7468 = vst [vmem:[#allocation102_spill] sm:$0xff] %v6748_v6 }
 0x3bc   : > { %7464 = vst [vmem:[#allocation98_spill] sm:$0xff] %v6730_v18  ;;  %v2646_v18 = vld [vmem:[#allocation9 + $0x280] sm:$0xff] }
 0x3bd   : > { %3294 = vmatpush.msra.mxu3 %v2646_v18  ;;  %v6769_v18 = vld [vmem:[#allocation3 + $0x82] sm:$0xff] }
 0x3be   : > { %3646 = vmatmul.f32.gmra.mxu2 %v6736_v15 }
 0x3c0   : > { %2918 = vmatmul.f32.gmra.mxu3 %v2334_v55 }
 0x3c1   : > { %3480 = vmatmul.f32.gmra.mxu1 %v2494_v4  ;;  %3572 = vmatmul.f32.gmra.mxu0 %v2330_v25  ;;  %v6752_v4 = vpop.f32.mrf.mxu2 }
 0x3c2   : > { %7469 = vst [vmem:[#allocation103_spill] sm:$0xff] %v6752_v4  ;;  %v6763_v6 = vpop.f32.mrf.mxu0 }
 0x3c3   : > { %v6741_v17 = vpop.f32.mrf.mxu3  ;;  %7471 = vst [vmem:[#allocation105_spill] sm:$0xff] %v6763_v6 }
 0x3c4   : > { %7467 = vst [vmem:[#allocation101_spill] sm:$0xff] %v6741_v17  ;;  %v6759_v17 = vpop.f32.mrf.mxu1 }
 0x3c6   : > { %3649 = vmatmul.f32.gmra.mxu2 %v6743_v62 }
 0x3c8   : > { %2921 = vmatmul.f32.gmra.mxu3 %v6607_v37 }
 0x3c9   : > { %3483 = vmatmul.f32.gmra.mxu1 %v6414_v24  ;;  %3575 = vmatmul.f32.gmra.mxu0 %v2331_v31  ;;  %v6767_v31 = vpop.f32.mrf.mxu2 }
 0x3ca   : > { %7473 = vst [vmem:[#allocation107_spill] sm:$0xff] %v6767_v31  ;;  %v2338_v31 = vld [vmem:[#allocation3 + $0x159] sm:$0xff] }
 0x3cb   : > { %v6754_v25 = vpop.f32.mrf.mxu3 }
 0x3cc   : > { %7470 = vst [vmem:[#allocation104_spill] sm:$0xff] %v6754_v25  ;;  %v6774_v4 = vpop.f32.mrf.mxu1  ;;  %v6776_v25 = vpop.f32.mrf.mxu0 }
 0x3cd   : > { %7474 = vst [vmem:[#allocation108_spill] sm:$0xff] %v6774_v4  ;;  %v4586_v4 = vld [vmem:[#allocation3] sm:$0xff] }
 0x3ce   : > { %3652 = vmatmul.f32.gmra.mxu2 %v6756_v39  ;;  %7475 = vst [vmem:[#allocation109_spill] sm:$0xff] %v6776_v25  ;;  %v6792_v25 = vld [vmem:[#allocation3 + $0x9a] sm:$0xff] }
 0x3d0   : > { %2924 = vmatmul.f32.gmra.mxu3 %v6620_v42 }
 0x3d1   : > { %3486 = vmatmul.f32.gmra.mxu1 %v6434_v48  ;;  %3578 = vmatmul.f32.gmra.mxu0 %v2332_v60  ;;  %v6780_v60 = vld [vmem:[#allocation3 + $0x92] sm:$0xff]  ;;  %v6783_v6 = vpop.f32.mrf.mxu2 }
 0x3d2   : > { %7477 = vst [vmem:[#allocation111_spill] sm:$0xff] %v6783_v6 }
 0x3d3   : > { %v6765_v24 = vpop.f32.mrf.mxu3 }
 0x3d4   : > { %7472 = vst [vmem:[#allocation106_spill] sm:$0xff] %v6765_v24 }
 0x3d6   : > { %3655 = vmatmul.f32.gmra.mxu2 %v6769_v18 }
 0x3d8   : > { %2927 = vmatmul.f32.gmra.mxu3 %v6631_v11 }
 0x3d9   : > { %3489 = vmatmul.f32.gmra.mxu1 %v6454_v13  ;;  %3581 = vmatmul.f32.gmra.mxu0 %v2333_v28  ;;  %v6788_v13 = vpop.f32.mrf.mxu1  ;;  %v6790_v28 = vpop.f32.mrf.mxu0 }
 0x3da   : > { %7479 = vst [vmem:[#allocation113_spill] sm:$0xff] %v6788_v13  ;;  %v6796_v6 = vpop.f32.mrf.mxu2  ;;  %v2340_v13 = vld [vmem:[#allocation3 + $0x171] sm:$0xff] }
 0x3db   : > { %v6778_v48 = vpop.f32.mrf.mxu3  ;;  %7480 = vst [vmem:[#allocation114_spill] sm:$0xff] %v6790_v28 }
 0x3dc   : > { %7476 = vst [vmem:[#allocation110_spill] sm:$0xff] %v6778_v48  ;;  %v2339_v48 = vld [vmem:[#allocation3 + $0x169] sm:$0xff] }
 0x3dd   : > { %7481 = vst [vmem:[#allocation115_spill] sm:$0xff] %v6796_v6 }
 0x3de   : > { %3658 = vmatmul.f32.gmra.mxu2 %v6780_v60 }
 0x3e0   : > { %2930 = vmatmul.f32.gmra.mxu3 %v2338_v31 }
 0x3e1   : > { %3492 = vmatmul.f32.gmra.mxu1 %v6532_v26  ;;  %3584 = vmatmul.f32.gmra.mxu0 %v2334_v55  ;;  %v6801_v55 = vld [vmem:[#allocation3 + $0xaa] sm:$0xff]  ;;  %v6806_v28 = vpop.f32.mrf.mxu0 }
 0x3e3   : > { %v6786_v24 = vpop.f32.mrf.mxu3 }
 0x3e4   : > { %7478 = vst [vmem:[#allocation112_spill] sm:$0xff] %v6786_v24  ;;  %v6803_v24 = vpop.f32.mrf.mxu1 }
 0x3e5   : > { %7483 = vst [vmem:[#allocation117_spill] sm:$0xff] %v6803_v24 }
 0x3e6   : > { %3661 = vmatmul.f32.gmra.mxu2 %v6792_v25 }
 0x3e8   : > { %2933 = vmatmul.f32.gmra.mxu3 %v2339_v48 }
 0x3e9   : > { %3495 = vmatmul.f32.gmra.mxu1 %v6542_v5  ;;  %3587 = vmatmul.f32.gmra.mxu0 %v6607_v37  ;;  %v6809_v5 = vpop.f32.mrf.mxu2  ;;  %v6813_v37 = vld [vmem:[#allocation3 + $0xb2] sm:$0xff]  ;;  %v6818_v19 = vpop.f32.mrf.mxu0 }
 0x3ea   : > { %7484 = vst [vmem:[#allocation118_spill] sm:$0xff] %v6809_v5  ;;  %v6825_v5 = vld [vmem:[#allocation3 + $0xc2] sm:$0xff] }
 0x3eb   : > { %v6799_v26 = vpop.f32.mrf.mxu3 }
 0x3ec   : > { %7482 = vst [vmem:[#allocation116_spill] sm:$0xff] %v6799_v26  ;;  %v2437_v26 = vld [vmem:[#allocation3 + $0x1a] sm:$0xff]  ;;  %v6816_v24 = vpop.f32.mrf.mxu1 }
 0x3ed   : > { %7486 = vst [vmem:[#allocation120_spill] sm:$0xff] %v6816_v24 }
 0x3ee   : > { %3664 = vmatmul.f32.gmra.mxu2 %v6801_v55 }
 0x3f0   : > { %2936 = vmatmul.f32.gmra.mxu3 %v2340_v13 }
 0x3f1   : > { %3498 = vmatmul.f32.gmra.mxu1 %v4586_v4  ;;  %3590 = vmatmul.f32.gmra.mxu0 %v6620_v42  ;;  %v6823_v42 = vpop.f32.mrf.mxu2  ;;  %v6828_v27 = vpop.f32.mrf.mxu0 }
 0x3f2   : > { %7488 = vst [vmem:[#allocation122_spill] sm:$0xff] %v6823_v42 }
 0x3f3   : > { %v6811_v6 = vpop.f32.mrf.mxu3 }
 0x3f4   : > { %7485 = vst [vmem:[#allocation119_spill] sm:$0xff] %v6811_v6  ;;  %v2438_v6 = vld [vmem:[#allocation3 + $0x22] sm:$0xff] }
 0x3f6   : > { %3667 = vmatmul.f32.gmra.mxu2 %v6813_v37 }
 0x3f8   : > { %3295 = vmatmul.f32.vlgmr.msra.gmra.mxu3 %v2437_v26 }
 0x3f9   : > { %3501 = vmatmul.f32.gmra.mxu1 %v4586_v4  ;;  %3593 = vmatmul.f32.gmra.mxu0 %v6631_v11  ;;  %v6832_v4 = vld [vmem:[#allocation3 + $0xca] sm:$0xff]  ;;  %v6835_v11 = vpop.f32.mrf.mxu2  ;;  %v6840_v42 = vpop.f32.mrf.mxu0 }
 0x3fa   : > { %7490 = vst [vmem:[#allocation124_spill] sm:$0xff] %v6835_v11 }
 0x3fb   : > { %v6821_v22 = vpop.f32.mrf.mxu3 }
 0x3fc   : > { %7487 = vst [vmem:[#allocation121_spill] sm:$0xff] %v6821_v22  ;;  %v6842_v22 = vld [vmem:[#allocation3 + $0xda] sm:$0xff] }
 0x3fe   : > { %3670 = vmatmul.f32.gmra.mxu2 %v6825_v5 }
 0x400   : > { %3298 = vmatmul.f32.gmra.mxu3 %v2438_v6 }
 0x401   : > { %3596 = vmatmul.f32.gmra.mxu0 %v2338_v31  ;;  %v6846_v6 = vpop.f32.mrf.mxu2 }
 0x402   : > { %7492 = vst [vmem:[#allocation126_spill] sm:$0xff] %v6846_v6 }
 0x403   : > { %v6830_v24 = vpop.f32.mrf.mxu3 }
 0x404   : > { %7489 = vst [vmem:[#allocation123_spill] sm:$0xff] %v6830_v24  ;;  %v6850_v24 = vld [vmem:[#allocation3 + $0xe2] sm:$0xff] }
 0x406   : > { %3673 = vmatmul.f32.gmra.mxu2 %v6832_v4 }
 0x408   : > { %3301 = vmatmul.f32.gmra.mxu3 %v6694_v1  ;;  %v6853_v1 = vpop.f32.mrf.mxu0 }
 0x409   : > { %3599 = vmatmul.f32.gmra.mxu0 %v2339_v48  ;;  %7494 = vst [vmem:[#allocation128_spill] sm:$0xff] %v6853_v1  ;;  %v2530_v48 = vld [vmem:[#allocation3 + $0x181] sm:$0xff]  ;;  %v6856_v11 = vpop.f32.mrf.mxu2 }
 0x40a   : > { %7495 = vst [vmem:[#allocation129_spill] sm:$0xff] %v6856_v11  ;;  %v6876_v11 = vld [vmem:[#allocation3 + $0x10a] sm:$0xff] }
 0x40b   : > { %v6838_v26 = vpop.f32.mrf.mxu3 }
 0x40c   : > { %7491 = vst [vmem:[#allocation125_spill] sm:$0xff] %v6838_v26 }
 0x40e   : > { %3676 = vmatmul.f32.gmra.mxu2 %v6842_v22 }
 0x410   : > { %3304 = vmatmul.f32.gmra.mxu3 %v6705_v53  ;;  %v6860_v53 = vld [vmem:[#allocation3 + $0xf2] sm:$0xff]  ;;  %v6864_v6 = vpop.f32.mrf.mxu0 }
 0x411   : > { %3602 = vmatmul.f32.gmra.mxu0 %v2340_v13  ;;  %v2531_v13 = vld [vmem:[#allocation3 + $0x189] sm:$0xff]  ;;  %7497 = vst [vmem:[#allocation131_spill] sm:$0xff] %v6864_v6  ;;  %v6868_v1 = vpop.f32.mrf.mxu2 }
 0x412   : > { %7499 = vst [vmem:[#allocation133_spill] sm:$0xff] %v6868_v1  ;;  %v6899_v6 = vld [vmem:[#allocation3 + $0x122] sm:$0xff] }
 0x413   : > { %v6848_v31 = vpop.f32.mrf.mxu3 }
 0x414   : > { %7493 = vst [vmem:[#allocation127_spill] sm:$0xff] %v6848_v31 }
 0x416   : > { %3679 = vmatmul.f32.gmra.mxu2 %v6850_v24 }
 0x418   : > { %3307 = vmatmul.f32.gmra.mxu3 %v6716_v63  ;;  %v6870_v63 = vld [vmem:[#allocation3 + $0xfa] sm:$0xff] }
 0x419   : > { %3605 = vmatmul.f32.gmra.mxu0 %v2530_v48 }
 0x41b   : > { %v6858_v26 = vpop.f32.mrf.mxu3 }
 0x41c   : > { %7496 = vst [vmem:[#allocation130_spill] sm:$0xff] %v6858_v26 }
 0x41e   : > { %3682 = vmatmul.f32.gmra.mxu2 %v6860_v53 }
 0x420   : > { %3310 = vmatmul.f32.gmra.mxu3 %v6725_v46  ;;  %v6879_v46 = vpop.f32.mrf.mxu2 }
 0x421   : > { %3608 = vmatmul.f32.gmra.mxu0 %v2531_v13  ;;  %7501 = vst [vmem:[#allocation135_spill] sm:$0xff] %v6879_v46  ;;  %v6884_v13 = vld [vmem:[%s7343_s4] ss:$0 sm:$0xff] }
 0x422   : > { %v2801_v1 = vadd.f32 %v6884_v13, %v6512_v12  ;;  %v2807_v12 = vadd.f32 %v6884_v13, %v6565_v29  ;;  %v6919_v29 = vld [vmem:[#allocation3 + $0x13a] sm:$0xff] }
 0x423   : > { %v6866_v31 = vpop.f32.mrf.mxu3 }
 0x424   : > { %7498 = vst [vmem:[#allocation132_spill] sm:$0xff] %v6866_v31 }
 0x426   : > { %3685 = vmatmul.f32.gmra.mxu2 %v6870_v63 }
 0x428   : > { %3313 = vmatmul.f32.gmra.mxu3 %v6736_v15  ;;  %v6895_v46 = vpop.f32.mrf.mxu2 }
 0x429   : > { %7503 = vst [vmem:[#allocation137_spill] sm:$0xff] %v6895_v46 }
 0x42b   : > { %v6874_v48 = vpop.f32.mrf.mxu3 }
 0x42c   : > { %7500 = vst [vmem:[#allocation134_spill] sm:$0xff] %v6874_v48  ;;  %v6891_v48 = vld [vmem:[#allocation3 + $0x112] sm:$0xff] }
 0x42e   : > { %3688 = vmatmul.f32.gmra.mxu2 %v6876_v11 }
 0x430   : > { %3316 = vmatmul.f32.gmra.mxu3 %v6743_v62  ;;  %v6905_v62 = vpop.f32.mrf.mxu2 }
 0x433   : > { %v2913_v31 = vpop.f32.mrf.mxu3 }
 0x434   : > { %v6889_v15 = vadd.f32 %v2913_v31, %v2801_v1 }
 0x436   : > { %7502 = vst [vmem:[#allocation136_spill] sm:$0xff] %v6889_v15  ;;  %3691 = vmatmul.f32.gmra.mxu2 %v6891_v48  ;;  %v6909_v15 = vld [vmem:[#allocation3 + $0x12a] sm:$0xff] }
 0x438   : > { %3319 = vmatmul.f32.gmra.mxu3 %v6756_v39  ;;  %v2810_v39 = vadd.f32 %v6884_v13, %v6575_v59 }
 0x43b   : > { %v6897_v26 = vpop.f32.mrf.mxu3 }
 0x43c   : > { %7504 = vst [vmem:[#allocation138_spill] sm:$0xff] %v6897_v26 }
 0x43e   : > { %3694 = vmatmul.f32.gmra.mxu2 %v6899_v6 }
 0x440   : > { %3322 = vmatmul.f32.gmra.mxu3 %v6769_v18  ;;  %v6917_v18 = vpop.f32.mrf.mxu2 }
 0x443   : > { %v2919_v31 = vpop.f32.mrf.mxu3 }
 0x444   : > { %v6907_v1 = vadd.f32 %v2919_v31, %v2807_v12  ;;  %v2813_v12 = vadd.f32 %v6884_v13, %v6588_v33 }
 0x446   : > { %7505 = vst [vmem:[#allocation139_spill] sm:$0xff] %v6907_v1  ;;  %3697 = vmatmul.f32.gmra.mxu2 %v6909_v15 }
 0x448   : > { %3325 = vmatmul.f32.gmra.mxu3 %v6780_v60  ;;  %v6927_v60 = vld [vmem:[#allocation3 + $0x142] sm:$0xff]  ;;  %v6930_v59 = vpop.f32.mrf.mxu2 }
 0x44b   : > { %v2922_v46 = vpop.f32.mrf.mxu3 }
 0x44c   : > { %v6915_v26 = vadd.f32 %v2922_v46, %v2810_v39  ;;  %v2816_v46 = vadd.f32 %v6884_v13, %v6603_v61  ;;  %v2822_v61 = vadd.f32 %v6884_v13, %v6627_v9 }
 0x44e   : > { %7506 = vst [vmem:[#allocation140_spill] sm:$0xff] %v6915_v26  ;;  %3700 = vmatmul.f32.gmra.mxu2 %v6919_v29 }
 0x450   : > { %3328 = vmatmul.f32.gmra.mxu3 %v6792_v25  ;;  %v6937_v25 = vld [vmem:[#allocation3 + $0x152] sm:$0xff]  ;;  %v6941_v33 = vpop.f32.mrf.mxu2 }
 0x453   : > { %v2925_v31 = vpop.f32.mrf.mxu3 }
 0x454   : > { %v6925_v1 = vadd.f32 %v2925_v31, %v2813_v12  ;;  %v2819_v12 = vadd.f32 %v6884_v13, %v6616_v45  ;;  %v6959_v45 = vld [vmem:[#allocation3 + $0x16a] sm:$0xff] }
 0x456   : > { %7507 = vst [vmem:[#allocation141_spill] sm:$0xff] %v6925_v1  ;;  %3703 = vmatmul.f32.gmra.mxu2 %v6927_v60 }
 0x458   : > { %3331 = vmatmul.f32.gmra.mxu3 %v6801_v55  ;;  %v6947_v55 = vld [vmem:[#allocation3 + $0x15a] sm:$0xff] }
 0x45b   : > { %v2928_v39 = vpop.f32.mrf.mxu3 }
 0x45c   : > { %v6935_v26 = vadd.f32 %v2928_v39, %v2816_v46  ;;  %v6953_v46 = vpop.f32.mrf.mxu2  ;;  %v2732_v39 = vadd.f32 %v6884_v13, %v6169_v51 }
 0x45e   : > { %7508 = vst [vmem:[#allocation142_spill] sm:$0xff] %v6935_v26  ;;  %3706 = vmatmul.f32.gmra.mxu2 %v6937_v25 }
 0x460   : > { %3334 = vmatmul.f32.gmra.mxu3 %v6813_v37 }
 0x463   : > { %v2931_v31 = vpop.f32.mrf.mxu3 }
 0x464   : > { %v6945_v1 = vadd.f32 %v2931_v31, %v2819_v12  ;;  %v2845_v12 = vadd.f32 %v6652_v20, %v2732_v39 }
 0x466   : > { %7509 = vst [vmem:[#allocation143_spill] sm:$0xff] %v6945_v1  ;;  %3709 = vmatmul.f32.gmra.mxu2 %v6947_v55  ;;  %v2958_v9 = vadd.f32 %v6261_v52, %v2845_v12  ;;  %v2735_v1 = vadd.f32 %v6884_v13, %v6191_v2  ;;  %v2738_v2 = vadd.f32 %v6884_v13, %v6211_v49 }
 0x468   : > { %3337 = vmatmul.f32.gmra.mxu3 %v6825_v5  ;;  %v2825_v5 = vadd.f32 %v6884_v13, %v6640_v36  ;;  %v2848_v20 = vadd.f32 %v6663_v30, %v2735_v1  ;;  %v2851_v30 = vadd.f32 %v6674_v57, %v2738_v2  ;;  %v2741_v57 = vadd.f32 %v6884_v13, %v6223_v32  ;;  %v7026_v2 = vpop.f32.mrf.mxu1 }
 0x46a   : > { %v2961_v52 = vadd.f32 %v6271_v16, %v2848_v20  ;;  %v2964_v49 = vadd.f32 %v6282_v14, %v2851_v30 }
 0x46b   : > { %v2934_v37 = vpop.f32.mrf.mxu3 }
 0x46c   : > { %v6957_v26 = vadd.f32 %v2934_v37, %v2822_v61  ;;  %v6971_v61 = vpop.f32.mrf.mxu2  ;;  %v6973_v37 = vld [vmem:[#allocation3 + $0x172] sm:$0xff]  ;;  %v3074_v16 = vadd.f32 %v6352_v7, %v2961_v52 }
 0x46e   : > { %3712 = vmatmul.f32.gmra.mxu2 %v6959_v45 }
 0x470   : > { %3340 = vmatmul.f32.gmra.mxu3 %v6832_v4  ;;  %v3071_v4 = vadd.f32 %v6337_v43, %v2958_v9  ;;  %v3187_v9 = vadd.f32 %v6535_v23, %v3074_v16  ;;  %v3077_v23 = vadd.f32 %v6365_v10, %v2964_v49  ;;  %v7511_v49 = vld [vmem:[#allocation58_spill] sm:$0xff] }
 0x472   : > { %v3184_v36 = vadd.f32 %v6523_v56, %v3071_v4 }
 0x473   : > { %v2937_v31 = vpop.f32.mrf.mxu3 }
 0x474   : > { %v6969_v51 = vadd.f32 %v2937_v31, %v2825_v5  ;;  %v6983_v5 = vpop.f32.mrf.mxu0  ;;  %v6985_v31 = vld [vmem:[#allocation3 + $0x182] sm:$0xff] }
 0x476   : > { %3715 = vmatmul.f32.gmra.mxu2 %v6973_v37 }
 0x478   : > { %3343 = vmatmul.f32.gmra.mxu3 %v6842_v22  ;;  %v6991_v22 = vpop.f32.mrf.mxu2 }
 0x47b   : > { %v3296_v39 = vpop.f32.mrf.mxu3 }
 0x47c   : > { %v3297_v12 = vadd.f32 %v3296_v39, %v3184_v36 }
 0x47e   : > { %v3410_v43 = vadd.f32 %v6719_v3, %v3297_v12  ;;  %3718 = vmatmul.f32.gmra.mxu2 %v6985_v31  ;;  %v7005_v3 = vld [vmem:[#allocation3 + $0x18a] sm:$0xff] }
 0x480   : > { %v3523_v56 = vadd.f32 %v6806_v28, %v3410_v43  ;;  %3346 = vmatmul.f32.gmra.mxu3 %v6850_v24  ;;  %v2854_v24 = vadd.f32 %v6681_v38, %v2741_v57  ;;  %v7011_v28 = vpop.f32.mrf.mxu0  ;;  %v3190_v38 = vadd.f32 %v6547_v21, %v3077_v23  ;;  %v7514_v57 = vld [vmem:[#allocation108_spill] sm:$0xff] }
 0x482   : > { %v3636_v1 = vadd.f32 %v6905_v62, %v3523_v56  ;;  %v7015_v62 = vpop.f32.mrf.mxu2  ;;  %v2967_v4 = vadd.f32 %v6292_v58, %v2854_v24  ;;  %v7515_v24 = vld [vmem:[#allocation31_spill] sm:$0xff] }
 0x483   : > { %v3299_v20 = vpop.f32.mrf.mxu3 }
 0x484   : > { %3731 = vst [vmem:[%s7002_s28] sm:$0xff] %v3636_v1  ;;  %v3300_v7 = vadd.f32 %v3299_v20, %v3187_v9 }
 0x486   : > { %v3413_v14 = vadd.f32 %v6732_v44, %v3300_v7  ;;  %3721 = vmatmul.f32.gmra.mxu2 %v7005_v3  ;;  %v2744_v44 = vadd.f32 %v6884_v13, %v6231_v35 }
 0x488   : > { %v3526_v32 = vadd.f32 %v6818_v19, %v3413_v14  ;;  %3349 = vmatmul.f32.gmra.mxu3 %v6860_v53  ;;  %v2857_v39 = vadd.f32 %v6692_v47, %v2744_v44  ;;  %v3080_v53 = vadd.f32 %v6380_v34, %v2967_v4  ;;  %v7030_v21 = vpop.f32.mrf.mxu0  ;;  %v2747_v34 = vadd.f32 %v6884_v13, %v6243_v0 }
 0x48a   : > { %v3639_v52 = vadd.f32 %v6917_v18, %v3526_v32  ;;  %v2970_v18 = vadd.f32 %v6307_v50, %v2857_v39  ;;  %v3193_v12 = vadd.f32 %v6556_v41, %v3080_v53  ;;  %v7035_v30 = vpop.f32.mrf.mxu2  ;;  %v7045_v41 = vpop.f32.mrf.mxu1  ;;  %v7517_v32 = vld [vmem:[#allocation22_spill] sm:$0xff]  ;;  %v7519_v39 = vld [vmem:[#allocation15_spill] sm:$0xff] }
 0x48b   : > { %v3302_v36 = vpop.f32.mrf.mxu3 }
 0x48c   : > { %3732 = vst [vmem:[%s7002_s28 + $0x8] sm:$0xff] %v3639_v52  ;;  %v3303_v10 = vadd.f32 %v3302_v36, %v3190_v38  ;;  %v3083_v43 = vadd.f32 %v6397_v40, %v2970_v18  ;;  %v7518_v38 = vld [vmem:[#allocation60_spill] sm:$0xff] }
 0x48d   : > { %v7520_v18 = vld [vmem:[#allocation96_spill] sm:$0xff] }
 0x48e   : > { %v3416_v19 = vadd.f32 %v6745_v54, %v3303_v10  ;;  %v3196_v0 = vadd.f32 %v7511_v49, %v3083_v43  ;;  %v7526_v49 = vld [vmem:[#allocation16_spill] sm:$0xff] }
 0x490   : > { %v3529_v58 = vadd.f32 %v6828_v27, %v3416_v19  ;;  %3352 = vmatmul.f32.gmra.mxu3 %v6870_v63  ;;  %v2860_v27 = vadd.f32 %v6703_v8, %v2747_v34  ;;  %v7050_v1 = vpop.f32.mrf.mxu0  ;;  %v7512_v8 = vld [vmem:[#allocation14_spill] sm:$0xff]  ;;  %v2753_v19 = vadd.f32 %v6884_v13, %v7519_v39  ;;  %v7533_v39 = vld [vmem:[#allocation101_spill] sm:$0xff] }
 0x492   : > { %v3642_v35 = vadd.f32 %v6930_v59, %v3529_v58  ;;  %v7510_v59 = vld [vmem:[#allocation20_spill] sm:$0xff]  ;;  %v7065_v44 = vpop.f32.mrf.mxu1 }
 0x493   : > { %v3305_v47 = vpop.f32.mrf.mxu3  ;;  %v2973_v16 = vadd.f32 %v7510_v59, %v2860_v27  ;;  %v7525_v59 = vld [vmem:[#allocation63_spill] sm:$0xff] }
 0x494   : > { %3733 = vst [vmem:[%s7002_s28 + $0x10] sm:$0xff] %v3642_v35  ;;  %v3306_v54 = vadd.f32 %v3305_v47, %v3193_v12  ;;  %v2866_v35 = vadd.f32 %v7520_v18, %v2753_v19  ;;  %v7522_v47 = vld [vmem:[#allocation34_spill] sm:$0xff] }
 0x495   : > { %v3086_v14 = vadd.f32 %v7515_v24, %v2973_v16 }
 0x496   : > { %v3419_v63 = vadd.f32 %v6759_v17, %v3306_v54  ;;  %v2750_v17 = vadd.f32 %v6884_v13, %v7512_v8  ;;  %v7523_v54 = vld [vmem:[#allocation131_spill] sm:$0xff] }
 0x497   : > { %v3199_v36 = vadd.f32 %v7518_v38, %v3086_v14  ;;  %v7530_v14 = vld [vmem:[#allocation26_spill] sm:$0xff]  ;;  %v7532_v38 = vld [vmem:[#allocation17_spill] sm:$0xff] }
 0x498   : > { %v3532_v50 = vadd.f32 %v6840_v42, %v3419_v63  ;;  %3355 = vmatmul.f32.gmra.mxu3 %v6876_v11  ;;  %v7055_v42 = vpop.f32.mrf.mxu2  ;;  %v7513_v11 = vld [vmem:[#allocation93_spill] sm:$0xff]  ;;  %v7070_v58 = vpop.f32.mrf.mxu0  ;;  %v7524_v63 = vld [vmem:[#allocation24_spill] sm:$0xff] }
 0x499   : > { %v2863_v20 = vadd.f32 %v7513_v11, %v2750_v17  ;;  %v2979_v43 = vadd.f32 %v7524_v63, %v2866_v35  ;;  %v7527_v17 = vld [vmem:[#allocation98_spill] sm:$0xff]  ;;  %v7528_v11 = vld [vmem:[#allocation117_spill] sm:$0xff] }
 0x49a   : > { %v3645_v56 = vadd.f32 %v6941_v33, %v3532_v50  ;;  %v7516_v33 = vld [vmem:[#allocation128_spill] sm:$0xff]  ;;  %v7085_v8 = vpop.f32.mrf.mxu1 }
 0x49b   : > { %v3308_v9 = vpop.f32.mrf.mxu3  ;;  %v2976_v4 = vadd.f32 %v7517_v32, %v2863_v20  ;;  %v7531_v32 = vld [vmem:[#allocation66_spill] sm:$0xff] }
 0x49c   : > { %3734 = vst [vmem:[%s7002_s28 + $0x18] sm:$0xff] %v3645_v56  ;;  %v3309_v40 = vadd.f32 %v3308_v9, %v3196_v0  ;;  %v2756_v0 = vadd.f32 %v6884_v13, %v7526_v49  ;;  %v7540_v49 = vld [vmem:[#allocation44_spill] sm:$0xff] }
 0x49d   : > { %v3089_v34 = vadd.f32 %v7522_v47, %v2976_v4 }
 0x49e   : > { %v3422_v7 = vadd.f32 %v7514_v57, %v3309_v40  ;;  %v2869_v40 = vadd.f32 %v7527_v17, %v2756_v0  ;;  %v7541_v17 = vld [vmem:[#allocation30_spill] sm:$0xff] }
 0x49f   : > { %v3202_v16 = vadd.f32 %v7525_v59, %v3089_v34 }
 0x4a0   : > { %v3535_v23 = vadd.f32 %v7516_v33, %v3422_v7  ;;  %3358 = vmatmul.f32.gmra.mxu3 %v6891_v48  ;;  %v7521_v48 = vld [vmem:[#allocation113_spill] sm:$0xff]  ;;  %v7090_v7 = vpop.f32.mrf.mxu0  ;;  %v2982_v33 = vadd.f32 %v7530_v14, %v2869_v40  ;;  %v7543_v14 = vld [vmem:[#allocation19_spill] sm:$0xff] }
 0x4a2   : > { %v3648_v52 = vadd.f32 %v6953_v46, %v3535_v23  ;;  %v7075_v46 = vpop.f32.mrf.mxu2  ;;  %v7105_v35 = vpop.f32.mrf.mxu1 }
 0x4a3   : > { %v3311_v10 = vpop.f32.mrf.mxu3 }
 0x4a4   : > { %3735 = vst [vmem:[%s7002_s28 + $0x20] sm:$0xff] %v3648_v52  ;;  %v3312_v53 = vadd.f32 %v3311_v10, %v3199_v36  ;;  %v2759_v36 = vadd.f32 %v6884_v13, %v7532_v38  ;;  %v7546_v38 = vld [vmem:[#allocation33_spill] sm:$0xff] }
 0x4a6   : > { %v3425_v12 = vadd.f32 %v7521_v48, %v3312_v53  ;;  %v2872_v19 = vadd.f32 %v7533_v39, %v2759_v36  ;;  %v7547_v39 = vld [vmem:[#allocation74_spill] sm:$0xff] }
 0x4a8   : > { %v3538_v27 = vadd.f32 %v7523_v54, %v3425_v12  ;;  %3361 = vmatmul.f32.gmra.mxu3 %v6899_v6  ;;  %v7529_v6 = vld [vmem:[#allocation37_spill] sm:$0xff]  ;;  %v7536_v12 = vld [vmem:[#allocation28_spill] sm:$0xff] }
 0x4a9   : > { %v3092_v57 = vadd.f32 %v7529_v6, %v2979_v43  ;;  %v2985_v47 = vadd.f32 %v7536_v12, %v2872_v19  ;;  %v7537_v54 = vld [vmem:[#allocation68_spill] sm:$0xff] }
 0x4aa   : > { %v3651_v50 = vadd.f32 %v6971_v61, %v3538_v27  ;;  %v7094_v24 = vpop.f32.mrf.mxu2 }
 0x4ab   : > { %v3314_v56 = vpop.f32.mrf.mxu3  ;;  %v3205_v4 = vadd.f32 %v7531_v32, %v3092_v57  ;;  %v3098_v0 = vadd.f32 %v7540_v49, %v2985_v47  ;;  %v7550_v47 = vld [vmem:[#allocation49_spill] sm:$0xff]  ;;  %v7553_v49 = vld [vmem:[#allocation23_spill] sm:$0xff] }
 0x4ac   : > { %3736 = vst [vmem:[%s7002_s28 + $0x28] sm:$0xff] %v3651_v50  ;;  %v3315_v9 = vadd.f32 %v3314_v56, %v3202_v16  ;;  %v7538_v50 = vld [vmem:[#allocation18_spill] sm:$0xff] }
 0x4ad   : > { %v2762_v59 = vadd.f32 %v6884_v13, %v7538_v50 }
 0x4ae   : > { %v3428_v20 = vadd.f32 %v7528_v11, %v3315_v9 }
 0x4b0   : > { %v3541_v61 = vadd.f32 %v6983_v5, %v3428_v20  ;;  %3364 = vmatmul.f32.gmra.mxu3 %v6909_v15  ;;  %v7534_v5 = vld [vmem:[#allocation120_spill] sm:$0xff]  ;;  %v7542_v20 = vld [vmem:[#allocation71_spill] sm:$0xff] }
 0x4b1   : > { %v7535_v15 = vld [vmem:[#allocation40_spill] sm:$0xff]  ;;  %v3211_v6 = vadd.f32 %v7542_v20, %v3098_v0  ;;  %v2565_v20 = vld [vmem:[#allocation3 + $0x1a2] sm:$0xff] }
 0x4b2   : > { %v3654_v23 = vadd.f32 %v6991_v22, %v3541_v61  ;;  %v3095_v18 = vadd.f32 %v7535_v15, %v2982_v33  ;;  %v7109_v22 = vpop.f32.mrf.mxu0  ;;  %v7114_v63 = vpop.f32.mrf.mxu2  ;;  %v7548_v15 = vld [vmem:[#allocation21_spill] sm:$0xff] }
 0x4b3   : > { %v3317_v52 = vpop.f32.mrf.mxu3 }
 0x4b4   : > { %3737 = vst [vmem:[%s7002_s28 + $0x30] sm:$0xff] %v3654_v23  ;;  %v3318_v10 = vadd.f32 %v3317_v52, %v3205_v4  ;;  %v3208_v27 = vadd.f32 %v7537_v54, %v3095_v18  ;;  %v7545_v4 = vld [vmem:[#allocation47_spill] sm:$0xff]  ;;  %v2768_v18 = vadd.f32 %v6884_v13, %v7548_v15  ;;  %v2564_v54 = vld [vmem:[#allocation3 + $0x19a] sm:$0xff] }
 0x4b5   : > { %3724 = vmatmul.f32.gmra.mxu2 %v2564_v54  ;;  %v7564_v54 = vld [vmem:[#allocation119_spill] sm:$0xff] }
 0x4b6   : > { %v3431_v53 = vadd.f32 %v7534_v5, %v3318_v10 }
 0x4b8   : > { %v3544_v48 = vadd.f32 %v7011_v28, %v3431_v53  ;;  %3367 = vmatmul.f32.gmra.mxu3 %v6919_v29  ;;  %v7539_v28 = vld [vmem:[#allocation104_spill] sm:$0xff] }
 0x4b9   : > { %v2875_v56 = vadd.f32 %v7539_v28, %v2762_v59 }
 0x4ba   : > { %v3657_v34 = vadd.f32 %v7015_v62, %v3544_v48  ;;  %v7124_v62 = vpop.f32.mrf.mxu1  ;;  %v7129_v57 = vpop.f32.mrf.mxu0 }
 0x4bb   : > { %v3320_v43 = vpop.f32.mrf.mxu3  ;;  %v2988_v40 = vadd.f32 %v7541_v17, %v2875_v56 }
 0x4bc   : > { %3738 = vst [vmem:[%s7002_s28 + $0x38] sm:$0xff] %v3657_v34  ;;  %v3321_v16 = vadd.f32 %v3320_v43, %v3208_v27  ;;  %v7551_v43 = vld [vmem:[#allocation36_spill] sm:$0xff] }
 0x4bd   : > { %v3101_v52 = vadd.f32 %v7545_v4, %v2988_v40  ;;  %v7555_v40 = vld [vmem:[#allocation51_spill] sm:$0xff]  ;;  %3727 = vmatmul.f32.gmra.mxu2 %v2565_v20 }
 0x4be   : > { %v3434_v29 = vadd.f32 %v7026_v2, %v3321_v16  ;;  %v2765_v2 = vadd.f32 %v6884_v13, %v7543_v14  ;;  %v7552_v16 = vld [vmem:[#allocation77_spill] sm:$0xff]  ;;  %v7556_v14 = vld [vmem:[#allocation39_spill] sm:$0xff] }
 0x4bf   : > { %v3214_v19 = vadd.f32 %v7547_v39, %v3101_v52  ;;  %v2533_v4 = vld [vmem:[#allocation3 + $0x1a1] sm:$0xff] }
 0x4c0   : > { %v3547_v9 = vadd.f32 %v7030_v21, %v3434_v29  ;;  %3370 = vmatmul.f32.gmra.mxu3 %v6927_v60  ;;  %v7134_v21 = vpop.f32.mrf.mxu2  ;;  %v7544_v60 = vld [vmem:[#allocation106_spill] sm:$0xff] }
 0x4c1   : > { %v2878_v23 = vadd.f32 %v7544_v60, %v2765_v2  ;;  %v2532_v29 = vld [vmem:[#allocation3 + $0x199] sm:$0xff]  ;;  %v7557_v60 = vld [vmem:[#allocation79_spill] sm:$0xff] }
 0x4c2   : > { %v3660_v11 = vadd.f32 %v7035_v30, %v3547_v9  ;;  %v7144_v5 = vpop.f32.mrf.mxu1  ;;  %v7149_v48 = vpop.f32.mrf.mxu0  ;;  %3611 = vmatmul.f32.gmra.mxu0 %v2532_v29 }
 0x4c3   : > { %v3323_v61 = vpop.f32.mrf.mxu3  ;;  %v2991_v36 = vadd.f32 %v7546_v38, %v2878_v23 }
 0x4c4   : > { %3739 = vst [vmem:[%s7002_s28 + $0x40] sm:$0xff] %v3660_v11  ;;  %v3324_v33 = vadd.f32 %v3323_v61, %v3211_v6 }
 0x4c5   : > { %v3104_v34 = vadd.f32 %v7550_v47, %v2991_v36  ;;  %v7560_v36 = vld [vmem:[#allocation53_spill] sm:$0xff]  ;;  %v7563_v47 = vld [vmem:[#allocation27_spill] sm:$0xff] }
 0x4c6   : > { %v3437_v32 = vadd.f32 %v7045_v41, %v3324_v33 }
 0x4c7   : > { %v3217_v28 = vadd.f32 %v7552_v16, %v3104_v34 }
 0x4c8   : > { %v3550_v30 = vadd.f32 %v7050_v1, %v3437_v32  ;;  %3373 = vmatmul.f32.gmra.mxu3 %v6937_v25  ;;  %v7549_v1 = vld [vmem:[#allocation110_spill] sm:$0xff] }
 0x4c9   : > { %v2881_v12 = vadd.f32 %v7549_v1, %v2768_v18 }
 0x4ca   : > { %v3663_v10 = vadd.f32 %v7055_v42, %v3550_v30  ;;  %v7154_v42 = vpop.f32.mrf.mxu2  ;;  %v7164_v9 = vpop.f32.mrf.mxu1  ;;  %3614 = vmatmul.f32.gmra.mxu0 %v2533_v4 }
 0x4cb   : > { %v3326_v53 = vpop.f32.mrf.mxu3  ;;  %v2994_v50 = vadd.f32 %v7551_v43, %v2881_v12 }
 0x4cc   : > { %3740 = vst [vmem:[%s7002_s28 + $0x48] sm:$0xff] %v3663_v10  ;;  %v3327_v41 = vadd.f32 %v3326_v53, %v3214_v19  ;;  %v7561_v53 = vld [vmem:[#allocation42_spill] sm:$0xff] }
 0x4cd   : > { %v3107_v11 = vadd.f32 %v7555_v40, %v2994_v50  ;;  %v7570_v40 = vld [vmem:[#allocation59_spill] sm:$0xff] }
 0x4ce   : > { %v3440_v25 = vadd.f32 %v7065_v44, %v3327_v41  ;;  %v2771_v44 = vadd.f32 %v6884_v13, %v7553_v49  ;;  %v7562_v41 = vld [vmem:[#allocation81_spill] sm:$0xff] }
 0x4cf   : > { %v3220_v23 = vadd.f32 %v7557_v60, %v3107_v11 }
 0x4d0   : > { %v3553_v27 = vadd.f32 %v7070_v58, %v3440_v25  ;;  %3376 = vmatmul.f32.gmra.mxu3 %v6947_v55  ;;  %v7554_v58 = vld [vmem:[#allocation112_spill] sm:$0xff] }
 0x4d1   : > { %v2884_v55 = vadd.f32 %v7554_v58, %v2771_v44 }
 0x4d2   : > { %v3666_v59 = vadd.f32 %v7075_v46, %v3553_v27  ;;  %v7169_v46 = vpop.f32.mrf.mxu0  ;;  %v3680_v61 = vpop.f32.mrf.mxu2 }
 0x4d3   : > { %v3329_v56 = vpop.f32.mrf.mxu3  ;;  %v2997_v2 = vadd.f32 %v7556_v14, %v2884_v55  ;;  %v3457_v39 = vpop.f32.mrf.mxu1 }
 0x4d4   : > { %3741 = vst [vmem:[%s7002_s28 + $0x50] sm:$0xff] %v3666_v59  ;;  %v3330_v0 = vadd.f32 %v3329_v56, %v3217_v28  ;;  %v7566_v59 = vld [vmem:[#allocation46_spill] sm:$0xff]  ;;  %v7567_v56 = vld [vmem:[#allocation84_spill] sm:$0xff] }
 0x4d5   : > { %v3110_v10 = vadd.f32 %v7560_v36, %v2997_v2  ;;  %v7572_v2 = vld [vmem:[#allocation87_spill] sm:$0xff] }
 0x4d6   : > { %v3443_v17 = vadd.f32 %v7085_v8, %v3330_v0  ;;  %v7558_v8 = vld [vmem:[#allocation25_spill] sm:$0xff] }
 0x4d7   : > { %v2774_v52 = vadd.f32 %v6884_v13, %v7558_v8  ;;  %v3223_v1 = vadd.f32 %v7562_v41, %v3110_v10  ;;  %v7568_v0 = vld [vmem:[#allocation29_spill] sm:$0xff] }
 0x4d8   : > { %v3556_v6 = vadd.f32 %v7090_v7, %v3443_v17  ;;  %3379 = vmatmul.f32.gmra.mxu3 %v6959_v45  ;;  %v7559_v7 = vld [vmem:[#allocation116_spill] sm:$0xff]  ;;  %v2780_v58 = vadd.f32 %v6884_v13, %v7568_v0  ;;  %v7569_v17 = vld [vmem:[#allocation121_spill] sm:$0xff] }
 0x4d9   : > { %v2887_v38 = vadd.f32 %v7559_v7, %v2774_v52  ;;  %v7574_v52 = vld [vmem:[#allocation123_spill] sm:$0xff] }
 0x4da   : > { %v3669_v33 = vadd.f32 %v7094_v24, %v3556_v6  ;;  %v3570_v19 = vpop.f32.mrf.mxu0  ;;  %v3683_v12 = vpop.f32.mrf.mxu2 }
 0x4db   : > { %v3332_v32 = vpop.f32.mrf.mxu3  ;;  %v3000_v15 = vadd.f32 %v7561_v53, %v2887_v38 }
 0x4dc   : > { %3742 = vst [vmem:[%s7002_s28 + $0x58] sm:$0xff] %v3669_v33  ;;  %v3333_v30 = vadd.f32 %v3332_v32, %v3220_v23  ;;  %v7573_v32 = vld [vmem:[#allocation32_spill] sm:$0xff] }
 0x4dd   : > { %v2783_v4 = vadd.f32 %v6884_v13, %v7573_v32 }
 0x4de   : > { %v3446_v45 = vadd.f32 %v7105_v35, %v3333_v30  ;;  %v2777_v35 = vadd.f32 %v6884_v13, %v7563_v47  ;;  %v7579_v47 = vld [vmem:[#allocation125_spill] sm:$0xff] }
 0x4df   : > { %v2896_v30 = vadd.f32 %v7574_v52, %v2783_v4  ;;  %v7590_v4 = vld [vmem:[#allocation72_spill] sm:$0xff] }
 0x4e0   : > { %v3559_v24 = vadd.f32 %v7109_v22, %v3446_v45  ;;  %3382 = vmatmul.f32.gmra.mxu3 %v6973_v37  ;;  %v2890_v27 = vadd.f32 %v7564_v54, %v2777_v35  ;;  %v7565_v37 = vld [vmem:[#allocation56_spill] sm:$0xff]  ;;  %v7576_v45 = vld [vmem:[#allocation50_spill] sm:$0xff] }
 0x4e1   : > { %v3113_v43 = vadd.f32 %v7565_v37, %v3000_v15  ;;  %v3009_v36 = vadd.f32 %v7576_v45, %v2896_v30  ;;  %v7581_v37 = vld [vmem:[#allocation52_spill] sm:$0xff]  ;;  %v7591_v30 = vld [vmem:[#allocation57_spill] sm:$0xff] }
 0x4e2   : > { %v3672_v18 = vadd.f32 %v7114_v63, %v3559_v24  ;;  %v3460_v63 = vpop.f32.mrf.mxu1  ;;  %v3003_v16 = vadd.f32 %v7566_v59, %v2890_v27  ;;  %v3573_v49 = vpop.f32.mrf.mxu0  ;;  %v7577_v24 = vld [vmem:[#allocation90_spill] sm:$0xff] }
 0x4e3   : > { %v3335_v25 = vpop.f32.mrf.mxu3  ;;  %v3226_v29 = vadd.f32 %v7567_v56, %v3113_v43  ;;  %v3686_v55 = vpop.f32.mrf.mxu2 }
 0x4e4   : > { %3743 = vst [vmem:[%s7002_s28 + $0x60] sm:$0xff] %v3672_v18  ;;  %v3336_v34 = vadd.f32 %v3335_v25, %v3223_v1  ;;  %v3116_v11 = vadd.f32 %v7570_v40, %v3003_v16  ;;  %v7578_v18 = vld [vmem:[#allocation35_spill] sm:$0xff] }
 0x4e5   : > { %v2786_v41 = vadd.f32 %v6884_v13, %v7578_v18 }
 0x4e6   : > { %v3449_v22 = vadd.f32 %v7124_v62, %v3336_v34  ;;  %v3229_v33 = vadd.f32 %v7572_v2, %v3116_v11  ;;  %v7580_v34 = vld [vmem:[#allocation65_spill] sm:$0xff] }
 0x4e7   : > { %v3122_v54 = vadd.f32 %v7580_v34, %v3009_v36  ;;  %v7587_v11 = vld [vmem:[#allocation97_spill] sm:$0xff]  ;;  %v7593_v36 = vld [vmem:[#allocation43_spill] sm:$0xff] }
 0x4e8   : > { %v3562_v50 = vadd.f32 %v7129_v57, %v3449_v22  ;;  %3385 = vmatmul.f32.gmra.mxu3 %v6985_v31  ;;  %v2893_v57 = vadd.f32 %v7569_v17, %v2780_v58  ;;  %v7585_v58 = vld [vmem:[#allocation69_spill] sm:$0xff] }
 0x4ea   : > { %v3675_v28 = vadd.f32 %v7134_v21, %v3562_v50  ;;  %v7571_v21 = vld [vmem:[#allocation48_spill] sm:$0xff]  ;;  %v3463_v60 = vpop.f32.mrf.mxu1  ;;  %v3576_v8 = vpop.f32.mrf.mxu0  ;;  %v7582_v50 = vld [vmem:[#allocation94_spill] sm:$0xff] }
 0x4eb   : > { %v3338_v44 = vpop.f32.mrf.mxu3  ;;  %v3006_v6 = vadd.f32 %v7571_v21, %v2893_v57  ;;  %v3689_v38 = vpop.f32.mrf.mxu2  ;;  %v3235_v59 = vadd.f32 %v7582_v50, %v3122_v54 }
 0x4ec   : > { %3744 = vst [vmem:[%s7002_s28 + $0x68] sm:$0xff] %v3675_v28  ;;  %v3339_v62 = vadd.f32 %v3338_v44, %v3226_v29  ;;  %v7583_v28 = vld [vmem:[#allocation38_spill] sm:$0xff]  ;;  %v7584_v44 = vld [vmem:[#allocation127_spill] sm:$0xff] }
 0x4ed   : > { %v2789_v56 = vadd.f32 %v6884_v13, %v7583_v28  ;;  %v7600_v28 = vld [vmem:[#allocation78_spill] sm:$0xff] }
 0x4ee   : > { %v3452_v31 = vadd.f32 %v7144_v5, %v3339_v62 }
 0x4ef   : > { %v2902_v0 = vadd.f32 %v7584_v44, %v2789_v56  ;;  %v7601_v44 = vld [vmem:[#allocation64_spill] sm:$0xff] }
 0x4f0   : > { %v3565_v20 = vadd.f32 %v7149_v48, %v3452_v31  ;;  %3388 = vmatmul.f32.gmra.mxu3 %v7005_v3  ;;  %v7575_v3 = vld [vmem:[#allocation62_spill] sm:$0xff] }
 0x4f1   : > { %v3119_v7 = vadd.f32 %v7575_v3, %v3006_v6  ;;  %v7586_v31 = vld [vmem:[#allocation54_spill] sm:$0xff]  ;;  %v7592_v3 = vld [vmem:[#allocation100_spill] sm:$0xff] }
 0x4f2   : > { %v3678_v14 = vadd.f32 %v7154_v42, %v3565_v20  ;;  %v3466_v25 = vpop.f32.mrf.mxu1  ;;  %v3579_v27 = vpop.f32.mrf.mxu0  ;;  %v3015_v40 = vadd.f32 %v7586_v31, %v2902_v0 }
 0x4f3   : > { %v3341_v23 = vpop.f32.mrf.mxu3  ;;  %v3232_v53 = vadd.f32 %v7577_v24, %v3119_v7  ;;  %v3692_v22 = vpop.f32.mrf.mxu2 }
 0x4f4   : > { %3745 = vst [vmem:[%s7002_s28 + $0x70] sm:$0xff] %v3678_v14  ;;  %v3342_v5 = vadd.f32 %v3341_v23, %v3229_v33  ;;  %v7588_v14 = vld [vmem:[#allocation41_spill] sm:$0xff]  ;;  %v7589_v23 = vld [vmem:[#allocation130_spill] sm:$0xff] }
 0x4f5   : > { %v2792_v2 = vadd.f32 %v6884_v13, %v7588_v14  ;;  %v7604_v14 = vld [vmem:[#allocation136_spill] sm:$0xff] }
 0x4f6   : > { %v3455_v48 = vadd.f32 %v7164_v9, %v3342_v5  ;;  %v2899_v9 = vadd.f32 %v7579_v47, %v2786_v41  ;;  %v3128_v5 = vadd.f32 %v7590_v4, %v3015_v40  ;;  %v7595_v41 = vld [vmem:[#allocation75_spill] sm:$0xff]  ;;  %v7596_v47 = vld [vmem:[#allocation61_spill] sm:$0xff] }
 0x4f8   : > { %v3568_v42 = vadd.f32 %v7169_v46, %v3455_v48  ;;  %v3241_v7 = vadd.f32 %v7592_v3, %v3128_v5 }
 0x4fa   : > { %v3681_v10 = vadd.f32 %v3680_v61, %v3568_v42  ;;  %v3012_v61 = vadd.f32 %v7581_v37, %v2899_v9  ;;  %v3469_v17 = vpop.f32.mrf.mxu1  ;;  %v3582_v57 = vpop.f32.mrf.mxu0  ;;  %v7598_v37 = vld [vmem:[#allocation45_spill] sm:$0xff] }
 0x4fb   : > { %v3344_v15 = vpop.f32.mrf.mxu3  ;;  %v3695_v21 = vpop.f32.mrf.mxu2 }
 0x4fc   : > { %3746 = vst [vmem:[%s7002_s28 + $0x78] sm:$0xff] %v3681_v10  ;;  %v3345_v1 = vadd.f32 %v3344_v15, %v3232_v53  ;;  %v3125_v62 = vadd.f32 %v7585_v58, %v3012_v61  ;;  %v2795_v10 = vadd.f32 %v6884_v13, %v7593_v36  ;;  %v7594_v15 = vld [vmem:[#allocation132_spill] sm:$0xff]  ;;  %v2798_v61 = vadd.f32 %v6884_v13, %v7598_v37 }
 0x4fe   : > { %v3458_v35 = vadd.f32 %v3457_v39, %v3345_v1  ;;  %v3238_v20 = vadd.f32 %v7587_v11, %v3125_v62 }
 0x500   : > { %v3571_v46 = vadd.f32 %v3570_v19, %v3458_v35  ;;  %v7597_v35 = vld [vmem:[#allocation103_spill] sm:$0xff] }
 0x502   : > { %v3684_v43 = vadd.f32 %v3683_v12, %v3571_v46  ;;  %v3472_v52 = vpop.f32.mrf.mxu1  ;;  %v3585_v42 = vpop.f32.mrf.mxu0 }
 0x503   : > { %v3347_v16 = vpop.f32.mrf.mxu3  ;;  %v3698_v53 = vpop.f32.mrf.mxu2 }
 0x504   : > { %3747 = vst [vmem:[%s7002_s28 + $0x80] sm:$0xff] %v3684_v43  ;;  %v3348_v29 = vadd.f32 %v3347_v16, %v3235_v59  ;;  %v7599_v59 = vld [vmem:[#allocation134_spill] sm:$0xff] }
 0x505   : > { %v2911_v16 = vadd.f32 %v7599_v59, %v2798_v61 }
 0x506   : > { %v3461_v39 = vadd.f32 %v3460_v63, %v3348_v29  ;;  %v2905_v63 = vadd.f32 %v7589_v23, %v2792_v2  ;;  %v7605_v2 = vld [vmem:[#allocation67_spill] sm:$0xff] }
 0x507   : > { %v7606_v23 = vld [vmem:[#allocation111_spill] sm:$0xff] }
 0x508   : > { %v3574_v19 = vadd.f32 %v3573_v49, %v3461_v39  ;;  %v3018_v48 = vadd.f32 %v7591_v30, %v2905_v63  ;;  %v7602_v39 = vld [vmem:[#allocation107_spill] sm:$0xff] }
 0x50a   : > { %v3687_v12 = vadd.f32 %v3686_v55, %v3574_v19  ;;  %v3475_v54 = vpop.f32.mrf.mxu1  ;;  %v3588_v50 = vpop.f32.mrf.mxu0 }
 0x50b   : > { %v3350_v6 = vpop.f32.mrf.mxu3 }
 0x50c   : > { %3748 = vst [vmem:[%s7002_s28 + $0x88] sm:$0xff] %v3687_v12  ;;  %v3351_v33 = vadd.f32 %v3350_v6, %v3238_v20  ;;  %v7603_v12 = vld [vmem:[#allocation83_spill] sm:$0xff] }
 0x50e   : > { %v3464_v32 = vadd.f32 %v3463_v60, %v3351_v33  ;;  %v2908_v60 = vadd.f32 %v7594_v15, %v2795_v10  ;;  %v3027_v33 = vadd.f32 %v7605_v2, %v7604_v14 }
 0x510   : > { %v3577_v49 = vadd.f32 %v3576_v8, %v3464_v32  ;;  %v3131_v8 = vadd.f32 %v7595_v41, %v3018_v48  ;;  %v3021_v9 = vadd.f32 %v7596_v47, %v2908_v60  ;;  %v7607_v32 = vld [vmem:[#allocation55_spill] sm:$0xff]  ;;  %v7609_v48 = vld [vmem:[#allocation86_spill] sm:$0xff]  ;;  %v7612_v41 = vld [vmem:[#allocation89_spill] sm:$0xff] }
 0x511   : > { %v2804_v4 = vadd.f32 %v6884_v13, %v7607_v32 }
 0x512   : > { %v3690_v55 = vadd.f32 %v3689_v38, %v3577_v49  ;;  %v3244_v34 = vadd.f32 %v7597_v35, %v3131_v8  ;;  %v3134_v56 = vadd.f32 %v7600_v28, %v3021_v9  ;;  %v3478_v31 = vpop.f32.mrf.mxu1  ;;  %v3591_v20 = vpop.f32.mrf.mxu0  ;;  %v7608_v49 = vld [vmem:[#allocation138_spill] sm:$0xff]  ;;  %v7613_v9 = vld [vmem:[#allocation139_spill] sm:$0xff] }
 0x513   : > { %v3353_v45 = vpop.f32.mrf.mxu3 }
 0x514   : > { %3749 = vst [vmem:[%s7002_s28 + $0x90] sm:$0xff] %v3690_v55  ;;  %v3354_v24 = vadd.f32 %v3353_v45, %v3241_v7  ;;  %v3247_v58 = vadd.f32 %v7602_v39, %v3134_v56  ;;  %v3140_v55 = vadd.f32 %v7609_v48, %v3027_v33  ;;  %v7610_v45 = vld [vmem:[#allocation70_spill] sm:$0xff]  ;;  %v7617_v56 = vld [vmem:[#allocation140_spill] sm:$0xff] }
 0x515   : > { %v7623_v33 = vld [vmem:[#allocation124_spill] sm:$0xff]  ;;  %v7625_v48 = vld [vmem:[#allocation142_spill] sm:$0xff] }
 0x516   : > { %v3467_v18 = vadd.f32 %v3466_v25, %v3354_v24  ;;  %v7611_v24 = vld [vmem:[#allocation115_spill] sm:$0xff] }
 0x518   : > { %v3580_v1 = vadd.f32 %v3579_v27, %v3467_v18  ;;  %v3701_v27 = vpop.f32.mrf.mxu2 }
 0x51a   : > { %v3693_v38 = vadd.f32 %v3692_v22, %v3580_v1  ;;  %v3024_v22 = vadd.f32 %v7601_v44, %v2911_v16  ;;  %v3481_v3 = vpop.f32.mrf.mxu1  ;;  %v7616_v16 = vld [vmem:[#allocation92_spill] sm:$0xff] }
 0x51b   : > { %v3356_v46 = vpop.f32.mrf.mxu3 }
 0x51c   : > { %3750 = vst [vmem:[%s7002_s28 + $0x98] sm:$0xff] %v3693_v38  ;;  %v3357_v43 = vadd.f32 %v3356_v46, %v3244_v34  ;;  %v3137_v11 = vadd.f32 %v7603_v12, %v3024_v22  ;;  %v7614_v38 = vld [vmem:[#allocation73_spill] sm:$0xff]  ;;  %v7619_v22 = vld [vmem:[#allocation122_spill] sm:$0xff] }
 0x51d   : > { %v3033_v35 = vadd.f32 %v7614_v38, %v7613_v9  ;;  %v7631_v9 = vld [vmem:[#allocation129_spill] sm:$0xff] }
 0x51e   : > { %v3470_v25 = vadd.f32 %v3469_v17, %v3357_v43  ;;  %v3250_v63 = vadd.f32 %v7606_v23, %v3137_v11 }
 0x520   : > { %v3583_v29 = vadd.f32 %v3582_v57, %v3470_v25  ;;  %v3704_v17 = vpop.f32.mrf.mxu2  ;;  %v3146_v25 = vadd.f32 %v7616_v16, %v3033_v35 }
 0x522   : > { %v3696_v0 = vadd.f32 %v3695_v21, %v3583_v29  ;;  %v3484_v47 = vpop.f32.mrf.mxu1 }
 0x523   : > { %v3359_v62 = vpop.f32.mrf.mxu3 }
 0x524   : > { %3751 = vst [vmem:[%s7002_s28 + $0xa0] sm:$0xff] %v3696_v0  ;;  %v3360_v19 = vadd.f32 %v3359_v62, %v3247_v58  ;;  %v3259_v0 = vadd.f32 %v7619_v22, %v3146_v25 }
 0x526   : > { %v3473_v40 = vadd.f32 %v3472_v52, %v3360_v19  ;;  %v2917_v52 = vadd.f32 %v7608_v49, %v2804_v4  ;;  %v7624_v4 = vld [vmem:[#allocation99_spill] sm:$0xff] }
 0x528   : > { %v3586_v6 = vadd.f32 %v3585_v42, %v3473_v40  ;;  %v3594_v42 = vpop.f32.mrf.mxu0  ;;  %v3030_v36 = vadd.f32 %v7610_v45, %v2917_v52  ;;  %v3707_v15 = vpop.f32.mrf.mxu2  ;;  %v7620_v40 = vld [vmem:[#allocation95_spill] sm:$0xff] }
 0x52a   : > { %v3699_v57 = vadd.f32 %v3698_v53, %v3586_v6  ;;  %v3253_v53 = vadd.f32 %v7611_v24, %v3140_v55  ;;  %v3143_v8 = vadd.f32 %v7612_v41, %v3030_v36  ;;  %v3487_v39 = vpop.f32.mrf.mxu1  ;;  %v7621_v6 = vld [vmem:[#allocation141_spill] sm:$0xff]  ;;  %v7626_v55 = vld [vmem:[#allocation82_spill] sm:$0xff]  ;;  %v7629_v41 = vld [vmem:[#allocation143_spill] sm:$0xff] }
 0x52b   : > { %v3362_v21 = vpop.f32.mrf.mxu3 }
 0x52c   : > { %3752 = vst [vmem:[%s7002_s28 + $0xa8] sm:$0xff] %v3699_v57  ;;  %v3363_v5 = vadd.f32 %v3362_v21, %v3250_v63 }
 0x52e   : > { %v3476_v30 = vadd.f32 %v3475_v54, %v3363_v5  ;;  %v7615_v54 = vld [vmem:[#allocation118_spill] sm:$0xff] }
 0x52f   : > { %v3256_v46 = vadd.f32 %v7615_v54, %v3143_v8  ;;  %v7630_v8 = vld [vmem:[#allocation85_spill] sm:$0xff] }
 0x530   : > { %v3589_v7 = vadd.f32 %v3588_v50, %v3476_v30  ;;  %v3597_v37 = vpop.f32.mrf.mxu0  ;;  %v3710_v50 = vpop.f32.mrf.mxu2 }
 0x532   : > { %v3702_v10 = vadd.f32 %v3701_v27, %v3589_v7  ;;  %v7618_v27 = vld [vmem:[#allocation76_spill] sm:$0xff]  ;;  %v3490_v21 = vpop.f32.mrf.mxu1 }
 0x533   : > { %v3365_v60 = vpop.f32.mrf.mxu3  ;;  %v3036_v29 = vadd.f32 %v7618_v27, %v7617_v56 }
 0x534   : > { %3753 = vst [vmem:[%s7002_s28 + $0xb0] sm:$0xff] %v3702_v10  ;;  %v3366_v13 = vadd.f32 %v3365_v60, %v3253_v53  ;;  %v7628_v53 = vld [vmem:[#allocation102_spill] sm:$0xff] }
 0x535   : > { %v3149_v12 = vadd.f32 %v7620_v40, %v3036_v29 }
 0x536   : > { %v3479_v18 = vadd.f32 %v3478_v31, %v3366_v13 }
 0x537   : > { %v3262_v57 = vadd.f32 %v7623_v33, %v3149_v12  ;;  %v7638_v33 = vld [vmem:[#allocation114_spill] sm:$0xff] }
 0x538   : > { %v3592_v1 = vadd.f32 %v3591_v20, %v3479_v18  ;;  %v3600_v19 = vpop.f32.mrf.mxu0  ;;  %v3713_v11 = vpop.f32.mrf.mxu2 }
 0x53a   : > { %v3705_v34 = vadd.f32 %v3704_v17, %v3592_v1  ;;  %v7622_v17 = vld [vmem:[#allocation80_spill] sm:$0xff]  ;;  %v3493_v60 = vpop.f32.mrf.mxu1  ;;  %v3045_v1 = vadd.f32 %v7630_v8, %v7629_v41 }
 0x53b   : > { %v3368_v61 = vpop.f32.mrf.mxu3  ;;  %v3039_v14 = vadd.f32 %v7622_v17, %v7621_v6 }
 0x53c   : > { %3754 = vst [vmem:[%s7002_s28 + $0xb8] sm:$0xff] %v3705_v34  ;;  %v3369_v43 = vadd.f32 %v3368_v61, %v3256_v46 }
 0x53d   : > { %v3152_v5 = vadd.f32 %v7624_v4, %v3039_v14 }
 0x53e   : > { %v3482_v59 = vadd.f32 %v3481_v3, %v3369_v43  ;;  %v3042_v3 = vadd.f32 %v7626_v55, %v7625_v48 }
 0x540   : > { %v3595_v28 = vadd.f32 %v3594_v42, %v3482_v59  ;;  %v3603_v49 = vpop.f32.mrf.mxu0  ;;  %v3716_v30 = vpop.f32.mrf.mxu2  ;;  %v7627_v42 = vld [vmem:[#allocation126_spill] sm:$0xff]  ;;  %v7633_v59 = vld [vmem:[#allocation88_spill] sm:$0xff] }
 0x541   : > { %v3265_v45 = vadd.f32 %v7627_v42, %v3152_v5  ;;  %v3048_v16 = vadd.f32 %v7633_v59, %v6957_v26  ;;  %v7637_v26 = vld [vmem:[#allocation135_spill] sm:$0xff] }
 0x542   : > { %v3708_v44 = vadd.f32 %v3707_v15, %v3595_v28  ;;  %v3155_v15 = vadd.f32 %v7628_v53, %v3042_v3  ;;  %v7634_v28 = vld [vmem:[#allocation133_spill] sm:$0xff] }
 0x543   : > { %v3371_v58 = vpop.f32.mrf.mxu3 }
 0x544   : > { %3755 = vst [vmem:[%s7002_s28 + $0xc0] sm:$0xff] %v3708_v44  ;;  %v3372_v62 = vadd.f32 %v3371_v58, %v3259_v0  ;;  %v3268_v38 = vadd.f32 %v7631_v9, %v3155_v15 }
 0x546   : > { %v3485_v31 = vadd.f32 %v3484_v47, %v3372_v62 }
 0x548   : > { %v3598_v20 = vadd.f32 %v3597_v37, %v3485_v31  ;;  %v3606_v18 = vpop.f32.mrf.mxu0  ;;  %v3719_v35 = vpop.f32.mrf.mxu2  ;;  %v7632_v37 = vld [vmem:[#allocation105_spill] sm:$0xff]  ;;  %v7636_v31 = vld [vmem:[#allocation91_spill] sm:$0xff] }
 0x549   : > { %v3158_v61 = vadd.f32 %v7632_v37, %v3045_v1  ;;  %v3051_v40 = vadd.f32 %v7636_v31, %v6969_v51 }
 0x54a   : > { %v3711_v2 = vadd.f32 %v3710_v50, %v3598_v20  ;;  %v3496_v50 = vpop.f32.mrf.mxu1 }
 0x54b   : > { %v3374_v23 = vpop.f32.mrf.mxu3  ;;  %v3271_v56 = vadd.f32 %v7634_v28, %v3158_v61 }
 0x54c   : > { %3756 = vst [vmem:[%s7002_s28 + $0xc8] sm:$0xff] %v3711_v2  ;;  %v3375_v63 = vadd.f32 %v3374_v23, %v3262_v57  ;;  %v3164_v57 = vadd.f32 %v7638_v33, %v3051_v40 }
 0x54e   : > { %v3488_v32 = vadd.f32 %v3487_v39, %v3375_v63  ;;  %v7635_v39 = vld [vmem:[#allocation109_spill] sm:$0xff] }
 0x54f   : > { %v3161_v58 = vadd.f32 %v7635_v39, %v3048_v16 }
 0x550   : > { %v3601_v52 = vadd.f32 %v3600_v19, %v3488_v32  ;;  %v3609_v27 = vpop.f32.mrf.mxu0  ;;  %v3722_v22 = vpop.f32.mrf.mxu2 }
 0x552   : > { %v3714_v7 = vadd.f32 %v3713_v11, %v3601_v52  ;;  %v3499_v19 = vpop.f32.mrf.mxu1  ;;  %v3274_v11 = vadd.f32 %v7637_v26, %v3161_v58 }
 0x553   : > { %v3377_v36 = vpop.f32.mrf.mxu3 }
 0x554   : > { %3757 = vst [vmem:[%s7002_s28 + $0xd0] sm:$0xff] %v3714_v7  ;;  %v3378_v10 = vadd.f32 %v3377_v36, %v3265_v45 }
 0x556   : > { %v3491_v24 = vadd.f32 %v3490_v21, %v3378_v10  ;;  %v7639_v21 = vld [vmem:[#allocation137_spill] sm:$0xff] }
 0x557   : > { %v3277_v32 = vadd.f32 %v7639_v21, %v3164_v57 }
 0x558   : > { %v3604_v13 = vadd.f32 %v3603_v49, %v3491_v24  ;;  %v3612_v6 = vpop.f32.mrf.mxu0  ;;  %v3725_v14 = vpop.f32.mrf.mxu2 }
 0x55a   : > { %v3717_v47 = vadd.f32 %v3716_v30, %v3604_v13  ;;  %v3502_v4 = vpop.f32.mrf.mxu1 }
 0x55b   : > { %v3380_v34 = vpop.f32.mrf.mxu3 }
 0x55c   : > { %3758 = vst [vmem:[%s7002_s28 + $0xd8] sm:$0xff] %v3717_v47  ;;  %v3381_v54 = vadd.f32 %v3380_v34, %v3268_v38 }
 0x55e   : > { %v3494_v46 = vadd.f32 %v3493_v60, %v3381_v54 }
 0x560   : > { %v3607_v43 = vadd.f32 %v3606_v18, %v3494_v46  ;;  %v3615_v49 = vpop.f32.mrf.mxu0  ;;  %v3728_v30 = vpop.f32.mrf.mxu2 }
 0x562   : > { %v3720_v25 = vadd.f32 %v3719_v35, %v3607_v43 }
 0x563   : > { %v3383_v29 = vpop.f32.mrf.mxu3 }
 0x564   : > { %3759 = vst [vmem:[%s7002_s28 + $0xe0] sm:$0xff] %v3720_v25  ;;  %v3384_v44 = vadd.f32 %v3383_v29, %v3271_v56 }
 0x566   : > { %v3497_v0 = vadd.f32 %v3496_v50, %v3384_v44 }
 0x568   : > { %v3610_v62 = vadd.f32 %v3609_v27, %v3497_v0 }
 0x56a   : > { %v3723_v12 = vadd.f32 %v3722_v22, %v3610_v62 }
 0x56b   : > { %v3386_v20 = vpop.f32.mrf.mxu3 }
 0x56c   : > { %3760 = vst [vmem:[%s7002_s28 + $0xe8] sm:$0xff] %v3723_v12  ;;  %v3387_v17 = vadd.f32 %v3386_v20, %v3274_v11 }
 0x56e   : > { %v3500_v2 = vadd.f32 %v3499_v19, %v3387_v17 }
 0x570   : > { %v3613_v23 = vadd.f32 %v3612_v6, %v3500_v2 }
 0x572   : > { %v3726_v63 = vadd.f32 %v3725_v14, %v3613_v23 }
 0x573   : > { %v3389_v51 = vpop.f32.mrf.mxu3 }
 0x574   : > { %3761 = vst [vmem:[%s7002_s28 + $0xf0] sm:$0xff] %v3726_v63  ;;  %v3390_v5 = vadd.f32 %v3389_v51, %v3277_v32 }
 0x576   : > { %v3503_v52 = vadd.f32 %v3502_v4, %v3390_v5 }
 0x578   : > { %v3616_v48 = vadd.f32 %v3615_v49, %v3503_v52 }
 0x57a   : > { %v3729_v55 = vadd.f32 %v3728_v30, %v3616_v48 }
 0x57c   : > { %3762 = vst [vmem:[%s7002_s28 + $0xf8] sm:$0xff] %v3729_v55 }
 0x57d   : > { %4704 = shalt.err (!%p4701_p10)
}
 0x57e   : > { %s4761_s8 = smov 128   ;;  %s4762_s16 = smov 8  }
 0x57f   : > { %3967 = dma.vmem_to_hbm [thread:$0]  (%p4865_p3), %s3777_s9, 4096, %s3779_s12, %s3764_s22, %s4761_s8, %s4761_s8, %s4762_s16  }
 0x580 PF: > { %s3793_s28 = sand.u32 1, %s4735_s18   ;;  %p7640_p12 = scmp.ge.s32.totalorder %s4747_s21, 2 }
 0x581   : > { %s3794_s10 = scalar_lea.sflag [#allocation6], %s3793_s28 }
 0x582   : > { %p3981_p13 = pnand %p7640_p12, %p4828_p6 }
 0x584   : > { %p3982_p0 = pneg %p3981_p13 }
 0x586   : > { %4730 = dma.done.wait (%p3982_p0), %s3794_s10, 4096  }
 0x587   : > { %4732 = vsyncadd (%p3982_p0), %s3794_s10, 4294963200  ;;  %p19_p5 = scmp.ge.s32.totalorder %s4855_s14, 4   ;;  %s7641_s18 = smov %s4739_s19 }
 0x588   : > { %s7642_s19 = smov %s4743_s20  ;;  %s7643_s20 = smov %s4871_s23 }
 0x589   : > { %s7644_s21 = smov %s4855_s14  ;;  %21 = sbr.rel (!%p19_p5) target bundleno = 6 (0x6), region = 97 }
 0x58e   :  { %3800 = vsyncpa [#allocation5], 1 }
 0x58f   :  { %3802 = vsyncpa [#allocation5 + $0x1], 1 }
 0x590   :  { %3803 = vsyncpa [#allocation8], 1 }
 0x591   :  { %3804 = vsyncpa [#allocation6], 1 }
 0x592   :  { %3806 = vsyncpa [#allocation6 + $0x1], 1 }

</bundles_post_ra>
